<compile_context>
chip_gen: v6e
topology: v6e:2x2x1
jax: 0.10.0
libtpu: 0.0.40
codegen_flags: <defaults>
</compile_context>

<pallas_src>
import functools

import jax
import jax.numpy as jnp
from jax.experimental import pallas as pl
from jax.experimental.pallas import tpu as pltpu


def _fixcnn_kernel(S_c, C_stem, H, W, P_H, P_C, n_classes,
                   x_ref, w_ref, bias_ref, lmat_ref, blin_ref,
                   out_ref, xp_ref, pf_ref):
    """One batch tile per grid step.

    x_ref    : VMEM (B, S_c, W, H)      -- time axis W on sublanes, electrodes H on lanes
    w_ref    : SMEM (C_stem*S_c*3,)     -- stem conv taps * BN scale, index (c*S_c+i)*3+k
    bias_ref : SMEM (C_stem,)           -- folded BN bias   beta - mean*scale
    lmat_ref : VMEM (W*P_H*P_C, n_classes) -- Linear weight, pooled-column order folded in
    blin_ref : VMEM (1, n_classes)
    out_ref  : VMEM (B, n_classes)
    xp_ref   : VMEM (B, S_c, W+2, H)    -- scratch: time axis zero-padded in-kernel
    pf_ref   : VMEM (B, W*P_H*P_C)      -- scratch: lane-flat pooled features
    """
    B = x_ref.shape[0]
    KW = 3  # stem conv kernel width (1, 3)

    # ---- in-kernel zero padding of the time axis (padding=(0,1) of the Conv2d) ----
    zrow = jnp.zeros((B, S_c, 1, H), jnp.float32)
    xp_ref[:, :, 0:1, :] = zrow
    xp_ref[:, :, W + 1:W + 2, :] = zrow
    xp_ref[:, :, 1:W + 1, :] = x_ref[...]

    # ---- stem: Conv2d (1,3) with BN scale folded into the taps, BN bias as init ----
    # Load the 12 shifted input slabs ONCE; reuse them for every output channel.
    xslc = [[xp_ref[:, i, k:k + W, :] for k in range(KW)] for i in range(S_c)]

    # planes[c][b, w, h] == BN(conv(x))[b, c, h, w]
    planes = []
    for c in range(C_stem):
        acc = jnp.zeros((B, W, H), jnp.float32) + bias_ref[c]
        for i in range(S_c):
            for k in range(KW):
                acc = acc + w_ref[(c * S_c + i) * KW + k] * xslc[i][k]
        planes.append(acc)
    # TODO(synk): self.cells (DARTS Cell stack, genotype-dependent) omitted -- identity.
    # TODO(synk): for large C_stem switch planes[] to a (C, B, W, H) scratch + fori_loop.

    # ---- AdaptiveMaxPool2d((P_H, P_C)) over the permuted (H, C_stem) dims ----
    # Results go straight into the lane-flat feature scratch; column order (j, i, w)
    # is folded into lmat on the host, so no in-kernel transpose/reshape is needed.
    for j in range(P_C):                       # adaptive windows over the channel axis
        c0 = (j * C_stem) // P_C
        c1 = -(-((j + 1) * C_stem) // P_C)     # ceil
        cp = planes[c0]
        for c in range(c0 + 1, c1):
            cp = jnp.maximum(cp, planes[c])
        for i2 in range(P_H):                  # adaptive windows over the electrode axis
            h0 = (i2 * H) // P_H
            h1 = -(-((i2 + 1) * H) // P_H)     # ceil
            col = (j * P_H + i2) * W
            pf_ref[:, col:col + W] = jnp.max(cp[:, :, h0:h1], axis=2)   # (B, W)

    # ---- flatten + Linear as a single MXU matmul, one dense (B, n_classes) store ----
    logits = jnp.dot(pf_ref[...], lmat_ref[...], preferred_element_type=jnp.float32)
    out_ref[...] = logits + blin_ref[...]


def fixcnn_forward(x, params, batch_tile=None):
    N, S_c, H, W = x.shape
    w_conv = params["stem_conv_w"]                 # (C_stem, S_c, 1, 3)
    C_stem = w_conv.shape[0]
    eps = 1e-5
    scale = params["bn_gamma"] / jnp.sqrt(params["bn_var"] + eps)
    bias = (params["bn_beta"] - params["bn_mean"] * scale).astype(jnp.float32)
    lin_w = params["lin_w"]                        # (n_classes, W*24*2)
    lin_b = params["lin_b"]                        # (n_classes,)
    n_classes = lin_w.shape[0]
    P_H, P_C = 24, 2
    F = W * P_H * P_C

    # batch tile: default = whole batch in one grid step.
    B = N if batch_tile is None else batch_tile
    assert N % B == 0 and (B == N or B % 8 == 0)

    # glue: put time (W) on sublanes and electrodes (H) on lanes
    xT = jnp.transpose(x.astype(jnp.float32), (0, 1, 3, 2))            # (N, S_c, W, H)
    # glue: fold BN scale into the conv taps; flatten (c, i, k) for SMEM scalar access
    wtaps = (w_conv[:, :, 0, :].astype(jnp.float32) * scale[:, None, None]).reshape(-1)
    # glue: fold the kernel's pooled-column order (j, i, w) into the Linear weight:
    #   lin_w columns are ordered (w, i, j)  [PyTorch flatten of (W, 24, 2)]
    lmat = (lin_w.astype(jnp.float32)
                 .reshape(n_classes, W, P_H, P_C)
                 .transpose(0, 3, 2, 1)            # -> (t, j, i, w)
                 .reshape(n_classes, F).T)         # (F, n_classes)
    blin = lin_b.astype(jnp.float32).reshape(1, n_classes)

    kernel = functools.partial(_fixcnn_kernel, S_c, C_stem, H, W, P_H, P_C, n_classes)
    smem = pl.BlockSpec(memory_space=pltpu.MemorySpace.SMEM)

    out = pl.pallas_call(
        kernel,
        out_shape=jax.ShapeDtypeStruct((N, n_classes), jnp.float32),
        grid=(N // B,),
        in_specs=[
            pl.BlockSpec((B, S_c, W, H), lambda n: (n, 0, 0, 0)),      # x batch tile
            smem,                                                      # conv taps
            smem,                                                      # BN bias
            pl.BlockSpec((F, n_classes), lambda n: (0, 0)),            # Linear weight
            pl.BlockSpec((1, n_classes), lambda n: (0, 0)),            # Linear bias
        ],
        out_specs=pl.BlockSpec((B, n_classes), lambda n: (n, 0)),
        scratch_shapes=[
            pltpu.VMEM((B, S_c, W + 2, H), jnp.float32),               # padded activations
            pltpu.VMEM((B, F), jnp.float32),                           # pooled features
        ],
        compiler_params=pltpu.CompilerParams(dimension_semantics=("parallel",)),
    )(xT, wtaps, bias, lmat, blin)
    return out


def fixcnn_reference(x, params):
    """Pure-JAX reference of the same forward (stem + identity cells + pool + linear)."""
    eps = 1e-5
    y = jax.lax.conv_general_dilated(
        x.astype(jnp.float32), params["stem_conv_w"], window_strides=(1, 1),
        padding=((0, 0), (1, 1)), dimension_numbers=("NCHW", "OIHW", "NCHW"))
    scale = params["bn_gamma"] / jnp.sqrt(params["bn_var"] + eps)
    bias = params["bn_beta"] - params["bn_mean"] * scale
    y = y * scale[None, :, None, None] + bias[None, :, None, None]
    s1 = jnp.transpose(y, (0, 3, 2, 1))                      # (N, W, H, C_stem)
    N, Cw, Hh, Cc = s1.shape
    pooled = s1.reshape(N, Cw, 24, Hh // 24, 2, Cc // 2).max(axis=(3, 5))
    flat = pooled.reshape(N, -1)
    return flat @ params["lin_w"].T + params["lin_b"]


if __name__ == "__main__":
    # FixCNN(C_in=4, C=4, S_c=4, n_classes=5, n_layers=4, n_nodes=2, stem_multiplier=1)
    # x: (N=2, S_c=4, H=48 electrodes, W=8 time steps).
    # W == C_in * n_nodes so Linear(C_p*24*2, n_classes) matches the constructor exactly.
    N, S_c, H, W = 2, 4, 48, 8
    C_in, n_nodes, stem_multiplier, C = 4, 2, 1, 4
    C_stem = stem_multiplier * C
    n_classes = 5

    key = jax.random.PRNGKey(0)
    ks = jax.random.split(key, 8)
    params = {
        "stem_conv_w": 0.3 * jax.random.normal(ks[0], (C_stem, S_c, 1, 3), jnp.float32),
        "bn_gamma": 1.0 + 0.1 * jax.random.normal(ks[1], (C_stem,), jnp.float32),
        "bn_beta": 0.1 * jax.random.normal(ks[2], (C_stem,), jnp.float32),
        "bn_mean": 0.1 * jax.random.normal(ks[3], (C_stem,), jnp.float32),
        "bn_var": jax.random.uniform(ks[4], (C_stem,), jnp.float32, 0.5, 1.5),
        "lin_w": 0.05 * jax.random.normal(ks[5], (n_classes, C_in * n_nodes * 24 * 2),
                                          jnp.float32),
        "lin_b": 0.05 * jax.random.normal(ks[6], (n_classes,), jnp.float32),
    }
    x = jax.random.normal(ks[7], (N, S_c, H, W), jnp.float32)

    logits = jax.block_until_ready(fixcnn_forward(x, params))
    ref = fixcnn_reference(x, params)
    assert logits.shape == (N, n_classes)
    assert bool(jnp.allclose(logits, ref, atol=1e-3, rtol=1e-3)), (logits, ref)
    print("KERNEL_OK")
</pallas_src>

<mosaic_0001>
module attributes {stable_mosaic.version = 11 : i64} {
  func.func @_fixcnn_kernel(%arg0: i32, %arg1: memref<2x4x8x48xf32, #tpu.memory_space<vmem>>, %arg2: memref<48xf32, #tpu.memory_space<smem>>, %arg3: memref<4xf32, #tpu.memory_space<smem>>, %arg4: memref<384x5xf32, #tpu.memory_space<vmem>>, %arg5: memref<1x5xf32, #tpu.memory_space<vmem>>, %arg6: memref<2x5xf32, #tpu.memory_space<vmem>>, %arg7: memref<2x4x10x48xf32, #tpu.memory_space<vmem>>, %arg8: memref<2x384xf32, #tpu.memory_space<vmem>>) attributes {dimension_semantics = [#tpu.dimension_semantics<parallel>], iteration_bounds = array<i64: 1>, scalar_prefetch = 0 : i64, scratch_operands = 2 : i64, tpu.core_type = #tpu.core_type<tc>, window_params = [{transform_indices = @transform_0, window_bounds = array<i64: 2, 4, 8, 48>}, {transform_indices = @transform_1, window_bounds = array<i64: 48>}, {transform_indices = @transform_2, window_bounds = array<i64: 4>}, {pipeline_mode = #tpu.pipeline_mode<synchronous>, transform_indices = @transform_3, window_bounds = array<i64: 384, 5>}, {pipeline_mode = #tpu.pipeline_mode<synchronous>, transform_indices = @transform_4, window_bounds = array<i64: 1, 5>}, {transform_indices = @transform_5, window_bounds = array<i64: 2, 5>}]} {
    %cst = arith.constant 0.000000e+00 : f32
    %0 = vector.broadcast %cst : f32 to vector<2x4x1x48xf32>
    %c0 = arith.constant 0 : index
    %c0_0 = arith.constant 0 : index
    %c0_1 = arith.constant 0 : index
    %c0_2 = arith.constant 0 : index
    %1 = vector.load %arg7[%c0, %c0_0, %c0_1, %c0_2] : memref<2x4x10x48xf32, #tpu.memory_space<vmem>>, vector<2x4x1x48xf32>
    tpu.vector_store %arg7[%c0, %c0_0, %c0_1, %c0_2], %0 {strides = array<i32>} : memref<2x4x10x48xf32, #tpu.memory_space<vmem>>, vector<2x4x1x48xf32>,
    %c0_3 = arith.constant 0 : index
    %c0_4 = arith.constant 0 : index
    %c9 = arith.constant 9 : index
    %c0_5 = arith.constant 0 : index
    %2 = vector.load %arg7[%c0_3, %c0_4, %c9, %c0_5] : memref<2x4x10x48xf32, #tpu.memory_space<vmem>>, vector<2x4x1x48xf32>
    tpu.vector_store %arg7[%c0_3, %c0_4, %c9, %c0_5], %0 {strides = array<i32>} : memref<2x4x10x48xf32, #tpu.memory_space<vmem>>, vector<2x4x1x48xf32>,
    %c0_6 = arith.constant 0 : index
    %c0_7 = arith.constant 0 : index
    %c0_8 = arith.constant 0 : index
    %c0_9 = arith.constant 0 : index
    %3 = vector.load %arg1[%c0_6, %c0_7, %c0_8, %c0_9] : memref<2x4x8x48xf32, #tpu.memory_space<vmem>>, vector<2x4x8x48xf32>
    %c0_10 = arith.constant 0 : index
    %c0_11 = arith.constant 0 : index
    %c1 = arith.constant 1 : index
    %c0_12 = arith.constant 0 : index
    %4 = vector.load %arg7[%c0_10, %c0_11, %c1, %c0_12] : memref<2x4x10x48xf32, #tpu.memory_space<vmem>>, vector<2x4x8x48xf32>
    tpu.vector_store %arg7[%c0_10, %c0_11, %c1, %c0_12], %3 {strides = array<i32>} : memref<2x4x10x48xf32, #tpu.memory_space<vmem>>, vector<2x4x8x48xf32>,
    %c0_13 = arith.constant 0 : index
    %c0_14 = arith.constant 0 : index
    %c0_15 = arith.constant 0 : index
    %c0_16 = arith.constant 0 : index
    %5 = vector.load %arg7[%c0_13, %c0_14, %c0_15, %c0_16] : memref<2x4x10x48xf32, #tpu.memory_space<vmem>>, vector<2x1x8x48xf32>
    %6 = vector.shape_cast %5 : vector<2x1x8x48xf32> to vector<2x8x48xf32>
    %c0_17 = arith.constant 0 : index
    %c0_18 = arith.constant 0 : index
    %c1_19 = arith.constant 1 : index
    %c0_20 = arith.constant 0 : index
    %7 = vector.load %arg7[%c0_17, %c0_18, %c1_19, %c0_20] : memref<2x4x10x48xf32, #tpu.memory_space<vmem>>, vector<2x1x8x48xf32>
    %8 = vector.shape_cast %7 : vector<2x1x8x48xf32> to vector<2x8x48xf32>
    %c0_21 = arith.constant 0 : index
    %c0_22 = arith.constant 0 : index
    %c2 = arith.constant 2 : index
    %c0_23 = arith.constant 0 : index
    %9 = vector.load %arg7[%c0_21, %c0_22, %c2, %c0_23] : memref<2x4x10x48xf32, #tpu.memory_space<vmem>>, vector<2x1x8x48xf32>
    %10 = vector.shape_cast %9 : vector<2x1x8x48xf32> to vector<2x8x48xf32>
    %c0_24 = arith.constant 0 : index
    %c1_25 = arith.constant 1 : index
    %c0_26 = arith.constant 0 : index
    %c0_27 = arith.constant 0 : index
    %11 = vector.load %arg7[%c0_24, %c1_25, %c0_26, %c0_27] : memref<2x4x10x48xf32, #tpu.memory_space<vmem>>, vector<2x1x8x48xf32>
    %12 = vector.shape_cast %11 : vector<2x1x8x48xf32> to vector<2x8x48xf32>
    %c0_28 = arith.constant 0 : index
    %c1_29 = arith.constant 1 : index
    %c1_30 = arith.constant 1 : index
    %c0_31 = arith.constant 0 : index
    %13 = vector.load %arg7[%c0_28, %c1_29, %c1_30, %c0_31] : memref<2x4x10x48xf32, #tpu.memory_space<vmem>>, vector<2x1x8x48xf32>
    %14 = vector.shape_cast %13 : vector<2x1x8x48xf32> to vector<2x8x48xf32>
    %c0_32 = arith.constant 0 : index
    %c1_33 = arith.constant 1 : index
    %c2_34 = arith.constant 2 : index
    %c0_35 = arith.constant 0 : index
    %15 = vector.load %arg7[%c0_32, %c1_33, %c2_34, %c0_35] : memref<2x4x10x48xf32, #tpu.memory_space<vmem>>, vector<2x1x8x48xf32>
    %16 = vector.shape_cast %15 : vector<2x1x8x48xf32> to vector<2x8x48xf32>
    %c0_36 = arith.constant 0 : index
    %c2_37 = arith.constant 2 : index
    %c0_38 = arith.constant 0 : index
    %c0_39 = arith.constant 0 : index
    %17 = vector.load %arg7[%c0_36, %c2_37, %c0_38, %c0_39] : memref<2x4x10x48xf32, #tpu.memory_space<vmem>>, vector<2x1x8x48xf32>
    %18 = vector.shape_cast %17 : vector<2x1x8x48xf32> to vector<2x8x48xf32>
    %c0_40 = arith.constant 0 : index
    %c2_41 = arith.constant 2 : index
    %c1_42 = arith.constant 1 : index
    %c0_43 = arith.constant 0 : index
    %19 = vector.load %arg7[%c0_40, %c2_41, %c1_42, %c0_43] : memref<2x4x10x48xf32, #tpu.memory_space<vmem>>, vector<2x1x8x48xf32>
    %20 = vector.shape_cast %19 : vector<2x1x8x48xf32> to vector<2x8x48xf32>
    %c0_44 = arith.constant 0 : index
    %c2_45 = arith.constant 2 : index
    %c2_46 = arith.constant 2 : index
    %c0_47 = arith.constant 0 : index
    %21 = vector.load %arg7[%c0_44, %c2_45, %c2_46, %c0_47] : memref<2x4x10x48xf32, #tpu.memory_space<vmem>>, vector<2x1x8x48xf32>
    %22 = vector.shape_cast %21 : vector<2x1x8x48xf32> to vector<2x8x48xf32>
    %c0_48 = arith.constant 0 : index
    %c3 = arith.constant 3 : index
    %c0_49 = arith.constant 0 : index
    %c0_50 = arith.constant 0 : index
    %23 = vector.load %arg7[%c0_48, %c3, %c0_49, %c0_50] : memref<2x4x10x48xf32, #tpu.memory_space<vmem>>, vector<2x1x8x48xf32>
    %24 = vector.shape_cast %23 : vector<2x1x8x48xf32> to vector<2x8x48xf32>
    %c0_51 = arith.constant 0 : index
    %c3_52 = arith.constant 3 : index
    %c1_53 = arith.constant 1 : index
    %c0_54 = arith.constant 0 : index
    %25 = vector.load %arg7[%c0_51, %c3_52, %c1_53, %c0_54] : memref<2x4x10x48xf32, #tpu.memory_space<vmem>>, vector<2x1x8x48xf32>
    %26 = vector.shape_cast %25 : vector<2x1x8x48xf32> to vector<2x8x48xf32>
    %c0_55 = arith.constant 0 : index
    %c3_56 = arith.constant 3 : index
    %c2_57 = arith.constant 2 : index
    %c0_58 = arith.constant 0 : index
    %27 = vector.load %arg7[%c0_55, %c3_56, %c2_57, %c0_58] : memref<2x4x10x48xf32, #tpu.memory_space<vmem>>, vector<2x1x8x48xf32>
    %28 = vector.shape_cast %27 : vector<2x1x8x48xf32> to vector<2x8x48xf32>
    %cst_59 = arith.constant 0.000000e+00 : f32
    %29 = vector.broadcast %cst_59 : f32 to vector<2x8x48xf32>
    %c0_60 = arith.constant 0 : index
    %30 = memref.load %arg3[%c0_60] : memref<4xf32, #tpu.memory_space<smem>>
    %31 = vector.broadcast %30 : f32 to vector<2x8x48xf32>
    %32 = arith.addf %29, %31 : vector<2x8x48xf32>
    %c0_61 = arith.constant 0 : index
    %33 = memref.load %arg2[%c0_61] : memref<48xf32, #tpu.memory_space<smem>>
    %34 = vector.broadcast %33 : f32 to vector<2x8x48xf32>
    %35 = arith.mulf %34, %6 : vector<2x8x48xf32>
    %36 = arith.addf %32, %35 : vector<2x8x48xf32>
    %c1_62 = arith.constant 1 : index
    %37 = memref.load %arg2[%c1_62] : memref<48xf32, #tpu.memory_space<smem>>
    %38 = vector.broadcast %37 : f32 to vector<2x8x48xf32>
    %39 = arith.mulf %38, %8 : vector<2x8x48xf32>
    %40 = arith.addf %36, %39 : vector<2x8x48xf32>
    %c2_63 = arith.constant 2 : index
    %41 = memref.load %arg2[%c2_63] : memref<48xf32, #tpu.memory_space<smem>>
    %42 = vector.broadcast %41 : f32 to vector<2x8x48xf32>
    %43 = arith.mulf %42, %10 : vector<2x8x48xf32>
    %44 = arith.addf %40, %43 : vector<2x8x48xf32>
    %c3_64 = arith.constant 3 : index
    %45 = memref.load %arg2[%c3_64] : memref<48xf32, #tpu.memory_space<smem>>
    %46 = vector.broadcast %45 : f32 to vector<2x8x48xf32>
    %47 = arith.mulf %46, %12 : vector<2x8x48xf32>
    %48 = arith.addf %44, %47 : vector<2x8x48xf32>
    %c4 = arith.constant 4 : index
    %49 = memref.load %arg2[%c4] : memref<48xf32, #tpu.memory_space<smem>>
    %50 = vector.broadcast %49 : f32 to vector<2x8x48xf32>
    %51 = arith.mulf %50, %14 : vector<2x8x48xf32>
    %52 = arith.addf %48, %51 : vector<2x8x48xf32>
    %c5 = arith.constant 5 : index
    %53 = memref.load %arg2[%c5] : memref<48xf32, #tpu.memory_space<smem>>
    %54 = vector.broadcast %53 : f32 to vector<2x8x48xf32>
    %55 = arith.mulf %54, %16 : vector<2x8x48xf32>
    %56 = arith.addf %52, %55 : vector<2x8x48xf32>
    %c6 = arith.constant 6 : index
    %57 = memref.load %arg2[%c6] : memref<48xf32, #tpu.memory_space<smem>>
    %58 = vector.broadcast %57 : f32 to vector<2x8x48xf32>
    %59 = arith.mulf %58, %18 : vector<2x8x48xf32>
    %60 = arith.addf %56, %59 : vector<2x8x48xf32>
    %c7 = arith.constant 7 : index
    %61 = memref.load %arg2[%c7] : memref<48xf32, #tpu.memory_space<smem>>
    %62 = vector.broadcast %61 : f32 to vector<2x8x48xf32>
    %63 = arith.mulf %62, %20 : vector<2x8x48xf32>
    %64 = arith.addf %60, %63 : vector<2x8x48xf32>
    %c8 = arith.constant 8 : index
    %65 = memref.load %arg2[%c8] : memref<48xf32, #tpu.memory_space<smem>>
    %66 = vector.broadcast %65 : f32 to vector<2x8x48xf32>
    %67 = arith.mulf %66, %22 : vector<2x8x48xf32>
    %68 = arith.addf %64, %67 : vector<2x8x48xf32>
    %c9_65 = arith.constant 9 : index
    %69 = memref.load %arg2[%c9_65] : memref<48xf32, #tpu.memory_space<smem>>
    %70 = vector.broadcast %69 : f32 to vector<2x8x48xf32>
    %71 = arith.mulf %70, %24 : vector<2x8x48xf32>
    %72 = arith.addf %68, %71 : vector<2x8x48xf32>
    %c10 = arith.constant 10 : index
    %73 = memref.load %arg2[%c10] : memref<48xf32, #tpu.memory_space<smem>>
    %74 = vector.broadcast %73 : f32 to vector<2x8x48xf32>
    %75 = arith.mulf %74, %26 : vector<2x8x48xf32>
    %76 = arith.addf %72, %75 : vector<2x8x48xf32>
    %c11 = arith.constant 11 : index
    %77 = memref.load %arg2[%c11] : memref<48xf32, #tpu.memory_space<smem>>
    %78 = vector.broadcast %77 : f32 to vector<2x8x48xf32>
    %79 = arith.mulf %78, %28 : vector<2x8x48xf32>
    %80 = arith.addf %76, %79 : vector<2x8x48xf32>
    %cst_66 = arith.constant 0.000000e+00 : f32
    %81 = vector.broadcast %cst_66 : f32 to vector<2x8x48xf32>
    %c1_67 = arith.constant 1 : index
    %82 = memref.load %arg3[%c1_67] : memref<4xf32, #tpu.memory_space<smem>>
    %83 = vector.broadcast %82 : f32 to vector<2x8x48xf32>
    %84 = arith.addf %81, %83 : vector<2x8x48xf32>
    %c12 = arith.constant 12 : index
    %85 = memref.load %arg2[%c12] : memref<48xf32, #tpu.memory_space<smem>>
    %86 = vector.broadcast %85 : f32 to vector<2x8x48xf32>
    %87 = arith.mulf %86, %6 : vector<2x8x48xf32>
    %88 = arith.addf %84, %87 : vector<2x8x48xf32>
    %c13 = arith.constant 13 : index
    %89 = memref.load %arg2[%c13] : memref<48xf32, #tpu.memory_space<smem>>
    %90 = vector.broadcast %89 : f32 to vector<2x8x48xf32>
    %91 = arith.mulf %90, %8 : vector<2x8x48xf32>
    %92 = arith.addf %88, %91 : vector<2x8x48xf32>
    %c14 = arith.constant 14 : index
    %93 = memref.load %arg2[%c14] : memref<48xf32, #tpu.memory_space<smem>>
    %94 = vector.broadcast %93 : f32 to vector<2x8x48xf32>
    %95 = arith.mulf %94, %10 : vector<2x8x48xf32>
    %96 = arith.addf %92, %95 : vector<2x8x48xf32>
    %c15 = arith.constant 15 : index
    %97 = memref.load %arg2[%c15] : memref<48xf32, #tpu.memory_space<smem>>
    %98 = vector.broadcast %97 : f32 to vector<2x8x48xf32>
    %99 = arith.mulf %98, %12 : vector<2x8x48xf32>
    %100 = arith.addf %96, %99 : vector<2x8x48xf32>
    %c16 = arith.constant 16 : index
    %101 = memref.load %arg2[%c16] : memref<48xf32, #tpu.memory_space<smem>>
    %102 = vector.broadcast %101 : f32 to vector<2x8x48xf32>
    %103 = arith.mulf %102, %14 : vector<2x8x48xf32>
    %104 = arith.addf %100, %103 : vector<2x8x48xf32>
    %c17 = arith.constant 17 : index
    %105 = memref.load %arg2[%c17] : memref<48xf32, #tpu.memory_space<smem>>
    %106 = vector.broadcast %105 : f32 to vector<2x8x48xf32>
    %107 = arith.mulf %106, %16 : vector<2x8x48xf32>
    %108 = arith.addf %104, %107 : vector<2x8x48xf32>
    %c18 = arith.constant 18 : index
    %109 = memref.load %arg2[%c18] : memref<48xf32, #tpu.memory_space<smem>>
    %110 = vector.broadcast %109 : f32 to vector<2x8x48xf32>
    %111 = arith.mulf %110, %18 : vector<2x8x48xf32>
    %112 = arith.addf %108, %111 : vector<2x8x48xf32>
    %c19 = arith.constant 19 : index
    %113 = memref.load %arg2[%c19] : memref<48xf32, #tpu.memory_space<smem>>
    %114 = vector.broadcast %113 : f32 to vector<2x8x48xf32>
    %115 = arith.mulf %114, %20 : vector<2x8x48xf32>
    %116 = arith.addf %112, %115 : vector<2x8x48xf32>
    %c20 = arith.constant 20 : index
    %117 = memref.load %arg2[%c20] : memref<48xf32, #tpu.memory_space<smem>>
    %118 = vector.broadcast %117 : f32 to vector<2x8x48xf32>
    %119 = arith.mulf %118, %22 : vector<2x8x48xf32>
    %120 = arith.addf %116, %119 : vector<2x8x48xf32>
    %c21 = arith.constant 21 : index
    %121 = memref.load %arg2[%c21] : memref<48xf32, #tpu.memory_space<smem>>
    %122 = vector.broadcast %121 : f32 to vector<2x8x48xf32>
    %123 = arith.mulf %122, %24 : vector<2x8x48xf32>
    %124 = arith.addf %120, %123 : vector<2x8x48xf32>
    %c22 = arith.constant 22 : index
    %125 = memref.load %arg2[%c22] : memref<48xf32, #tpu.memory_space<smem>>
    %126 = vector.broadcast %125 : f32 to vector<2x8x48xf32>
    %127 = arith.mulf %126, %26 : vector<2x8x48xf32>
    %128 = arith.addf %124, %127 : vector<2x8x48xf32>
    %c23 = arith.constant 23 : index
    %129 = memref.load %arg2[%c23] : memref<48xf32, #tpu.memory_space<smem>>
    %130 = vector.broadcast %129 : f32 to vector<2x8x48xf32>
    %131 = arith.mulf %130, %28 : vector<2x8x48xf32>
    %132 = arith.addf %128, %131 : vector<2x8x48xf32>
    %cst_68 = arith.constant 0.000000e+00 : f32
    %133 = vector.broadcast %cst_68 : f32 to vector<2x8x48xf32>
    %c2_69 = arith.constant 2 : index
    %134 = memref.load %arg3[%c2_69] : memref<4xf32, #tpu.memory_space<smem>>
    %135 = vector.broadcast %134 : f32 to vector<2x8x48xf32>
    %136 = arith.addf %133, %135 : vector<2x8x48xf32>
    %c24 = arith.constant 24 : index
    %137 = memref.load %arg2[%c24] : memref<48xf32, #tpu.memory_space<smem>>
    %138 = vector.broadcast %137 : f32 to vector<2x8x48xf32>
    %139 = arith.mulf %138, %6 : vector<2x8x48xf32>
    %140 = arith.addf %136, %139 : vector<2x8x48xf32>
    %c25 = arith.constant 25 : index
    %141 = memref.load %arg2[%c25] : memref<48xf32, #tpu.memory_space<smem>>
    %142 = vector.broadcast %141 : f32 to vector<2x8x48xf32>
    %143 = arith.mulf %142, %8 : vector<2x8x48xf32>
    %144 = arith.addf %140, %143 : vector<2x8x48xf32>
    %c26 = arith.constant 26 : index
    %145 = memref.load %arg2[%c26] : memref<48xf32, #tpu.memory_space<smem>>
    %146 = vector.broadcast %145 : f32 to vector<2x8x48xf32>
    %147 = arith.mulf %146, %10 : vector<2x8x48xf32>
    %148 = arith.addf %144, %147 : vector<2x8x48xf32>
    %c27 = arith.constant 27 : index
    %149 = memref.load %arg2[%c27] : memref<48xf32, #tpu.memory_space<smem>>
    %150 = vector.broadcast %149 : f32 to vector<2x8x48xf32>
    %151 = arith.mulf %150, %12 : vector<2x8x48xf32>
    %152 = arith.addf %148, %151 : vector<2x8x48xf32>
    %c28 = arith.constant 28 : index
    %153 = memref.load %arg2[%c28] : memref<48xf32, #tpu.memory_space<smem>>
    %154 = vector.broadcast %153 : f32 to vector<2x8x48xf32>
    %155 = arith.mulf %154, %14 : vector<2x8x48xf32>
    %156 = arith.addf %152, %155 : vector<2x8x48xf32>
    %c29 = arith.constant 29 : index
    %157 = memref.load %arg2[%c29] : memref<48xf32, #tpu.memory_space<smem>>
    %158 = vector.broadcast %157 : f32 to vector<2x8x48xf32>
    %159 = arith.mulf %158, %16 : vector<2x8x48xf32>
    %160 = arith.addf %156, %159 : vector<2x8x48xf32>
    %c30 = arith.constant 30 : index
    %161 = memref.load %arg2[%c30] : memref<48xf32, #tpu.memory_space<smem>>
    %162 = vector.broadcast %161 : f32 to vector<2x8x48xf32>
    %163 = arith.mulf %162, %18 : vector<2x8x48xf32>
    %164 = arith.addf %160, %163 : vector<2x8x48xf32>
    %c31 = arith.constant 31 : index
    %165 = memref.load %arg2[%c31] : memref<48xf32, #tpu.memory_space<smem>>
    %166 = vector.broadcast %165 : f32 to vector<2x8x48xf32>
    %167 = arith.mulf %166, %20 : vector<2x8x48xf32>
    %168 = arith.addf %164, %167 : vector<2x8x48xf32>
    %c32 = arith.constant 32 : index
    %169 = memref.load %arg2[%c32] : memref<48xf32, #tpu.memory_space<smem>>
    %170 = vector.broadcast %169 : f32 to vector<2x8x48xf32>
    %171 = arith.mulf %170, %22 : vector<2x8x48xf32>
    %172 = arith.addf %168, %171 : vector<2x8x48xf32>
    %c33 = arith.constant 33 : index
    %173 = memref.load %arg2[%c33] : memref<48xf32, #tpu.memory_space<smem>>
    %174 = vector.broadcast %173 : f32 to vector<2x8x48xf32>
    %175 = arith.mulf %174, %24 : vector<2x8x48xf32>
    %176 = arith.addf %172, %175 : vector<2x8x48xf32>
    %c34 = arith.constant 34 : index
    %177 = memref.load %arg2[%c34] : memref<48xf32, #tpu.memory_space<smem>>
    %178 = vector.broadcast %177 : f32 to vector<2x8x48xf32>
    %179 = arith.mulf %178, %26 : vector<2x8x48xf32>
    %180 = arith.addf %176, %179 : vector<2x8x48xf32>
    %c35 = arith.constant 35 : index
    %181 = memref.load %arg2[%c35] : memref<48xf32, #tpu.memory_space<smem>>
    %182 = vector.broadcast %181 : f32 to vector<2x8x48xf32>
    %183 = arith.mulf %182, %28 : vector<2x8x48xf32>
    %184 = arith.addf %180, %183 : vector<2x8x48xf32>
    %cst_70 = arith.constant 0.000000e+00 : f32
    %185 = vector.broadcast %cst_70 : f32 to vector<2x8x48xf32>
    %c3_71 = arith.constant 3 : index
    %186 = memref.load %arg3[%c3_71] : memref<4xf32, #tpu.memory_space<smem>>
    %187 = vector.broadcast %186 : f32 to vector<2x8x48xf32>
    %188 = arith.addf %185, %187 : vector<2x8x48xf32>
    %c36 = arith.constant 36 : index
    %189 = memref.load %arg2[%c36] : memref<48xf32, #tpu.memory_space<smem>>
    %190 = vector.broadcast %189 : f32 to vector<2x8x48xf32>
    %191 = arith.mulf %190, %6 : vector<2x8x48xf32>
    %192 = arith.addf %188, %191 : vector<2x8x48xf32>
    %c37 = arith.constant 37 : index
    %193 = memref.load %arg2[%c37] : memref<48xf32, #tpu.memory_space<smem>>
    %194 = vector.broadcast %193 : f32 to vector<2x8x48xf32>
    %195 = arith.mulf %194, %8 : vector<2x8x48xf32>
    %196 = arith.addf %192, %195 : vector<2x8x48xf32>
    %c38 = arith.constant 38 : index
    %197 = memref.load %arg2[%c38] : memref<48xf32, #tpu.memory_space<smem>>
    %198 = vector.broadcast %197 : f32 to vector<2x8x48xf32>
    %199 = arith.mulf %198, %10 : vector<2x8x48xf32>
    %200 = arith.addf %196, %199 : vector<2x8x48xf32>
    %c39 = arith.constant 39 : index
    %201 = memref.load %arg2[%c39] : memref<48xf32, #tpu.memory_space<smem>>
    %202 = vector.broadcast %201 : f32 to vector<2x8x48xf32>
    %203 = arith.mulf %202, %12 : vector<2x8x48xf32>
    %204 = arith.addf %200, %203 : vector<2x8x48xf32>
    %c40 = arith.constant 40 : index
    %205 = memref.load %arg2[%c40] : memref<48xf32, #tpu.memory_space<smem>>
    %206 = vector.broadcast %205 : f32 to vector<2x8x48xf32>
    %207 = arith.mulf %206, %14 : vector<2x8x48xf32>
    %208 = arith.addf %204, %207 : vector<2x8x48xf32>
    %c41 = arith.constant 41 : index
    %209 = memref.load %arg2[%c41] : memref<48xf32, #tpu.memory_space<smem>>
    %210 = vector.broadcast %209 : f32 to vector<2x8x48xf32>
    %211 = arith.mulf %210, %16 : vector<2x8x48xf32>
    %212 = arith.addf %208, %211 : vector<2x8x48xf32>
    %c42 = arith.constant 42 : index
    %213 = memref.load %arg2[%c42] : memref<48xf32, #tpu.memory_space<smem>>
    %214 = vector.broadcast %213 : f32 to vector<2x8x48xf32>
    %215 = arith.mulf %214, %18 : vector<2x8x48xf32>
    %216 = arith.addf %212, %215 : vector<2x8x48xf32>
    %c43 = arith.constant 43 : index
    %217 = memref.load %arg2[%c43] : memref<48xf32, #tpu.memory_space<smem>>
    %218 = vector.broadcast %217 : f32 to vector<2x8x48xf32>
    %219 = arith.mulf %218, %20 : vector<2x8x48xf32>
    %220 = arith.addf %216, %219 : vector<2x8x48xf32>
    %c44 = arith.constant 44 : index
    %221 = memref.load %arg2[%c44] : memref<48xf32, #tpu.memory_space<smem>>
    %222 = vector.broadcast %221 : f32 to vector<2x8x48xf32>
    %223 = arith.mulf %222, %22 : vector<2x8x48xf32>
    %224 = arith.addf %220, %223 : vector<2x8x48xf32>
    %c45 = arith.constant 45 : index
    %225 = memref.load %arg2[%c45] : memref<48xf32, #tpu.memory_space<smem>>
    %226 = vector.broadcast %225 : f32 to vector<2x8x48xf32>
    %227 = arith.mulf %226, %24 : vector<2x8x48xf32>
    %228 = arith.addf %224, %227 : vector<2x8x48xf32>
    %c46 = arith.constant 46 : index
    %229 = memref.load %arg2[%c46] : memref<48xf32, #tpu.memory_space<smem>>
    %230 = vector.broadcast %229 : f32 to vector<2x8x48xf32>
    %231 = arith.mulf %230, %26 : vector<2x8x48xf32>
    %232 = arith.addf %228, %231 : vector<2x8x48xf32>
    %c47 = arith.constant 47 : index
    %233 = memref.load %arg2[%c47] : memref<48xf32, #tpu.memory_space<smem>>
    %234 = vector.broadcast %233 : f32 to vector<2x8x48xf32>
    %235 = arith.mulf %234, %28 : vector<2x8x48xf32>
    %236 = arith.addf %232, %235 : vector<2x8x48xf32>
    %237 = arith.maximumf %80, %132 : vector<2x8x48xf32>
    %238 = vector.extract_strided_slice %237 {offsets = [0, 0, 0], sizes = [2, 8, 2], strides = [1, 1, 1]} : vector<2x8x48xf32> to vector<2x8x2xf32>
    %cst_72 = arith.constant dense<0xFF800000> : vector<2x8xf32>
    %239 = vector.multi_reduction <maximumf>, %238, %cst_72 [2] : vector<2x8x2xf32> to vector<2x8xf32>
    %c0_73 = arith.constant 0 : index
    %c0_74 = arith.constant 0 : index
    %240 = vector.load %arg8[%c0_73, %c0_74] : memref<2x384xf32, #tpu.memory_space<vmem>>, vector<2x8xf32>
    tpu.vector_store %arg8[%c0_73, %c0_74], %239 {strides = array<i32>} : memref<2x384xf32, #tpu.memory_space<vmem>>, vector<2x8xf32>,
    %241 = vector.extract_strided_slice %237 {offsets = [0, 0, 2], sizes = [2, 8, 2], strides = [1, 1, 1]} : vector<2x8x48xf32> to vector<2x8x2xf32>
    %cst_75 = arith.constant dense<0xFF800000> : vector<2x8xf32>
    %242 = vector.multi_reduction <maximumf>, %241, %cst_75 [2] : vector<2x8x2xf32> to vector<2x8xf32>
    %c0_76 = arith.constant 0 : index
    %c8_77 = arith.constant 8 : index
    %243 = vector.load %arg8[%c0_76, %c8_77] : memref<2x384xf32, #tpu.memory_space<vmem>>, vector<2x8xf32>
    tpu.vector_store %arg8[%c0_76, %c8_77], %242 {strides = array<i32>} : memref<2x384xf32, #tpu.memory_space<vmem>>, vector<2x8xf32>,
    %244 = vector.extract_strided_slice %237 {offsets = [0, 0, 4], sizes = [2, 8, 2], strides = [1, 1, 1]} : vector<2x8x48xf32> to vector<2x8x2xf32>
    %cst_78 = arith.constant dense<0xFF800000> : vector<2x8xf32>
    %245 = vector.multi_reduction <maximumf>, %244, %cst_78 [2] : vector<2x8x2xf32> to vector<2x8xf32>
    %c0_79 = arith.constant 0 : index
    %c16_80 = arith.constant 16 : index
    %246 = vector.load %arg8[%c0_79, %c16_80] : memref<2x384xf32, #tpu.memory_space<vmem>>, vector<2x8xf32>
    tpu.vector_store %arg8[%c0_79, %c16_80], %245 {strides = array<i32>} : memref<2x384xf32, #tpu.memory_space<vmem>>, vector<2x8xf32>,
    %247 = vector.extract_strided_slice %237 {offsets = [0, 0, 6], sizes = [2, 8, 2], strides = [1, 1, 1]} : vector<2x8x48xf32> to vector<2x8x2xf32>
    %cst_81 = arith.constant dense<0xFF800000> : vector<2x8xf32>
    %248 = vector.multi_reduction <maximumf>, %247, %cst_81 [2] : vector<2x8x2xf32> to vector<2x8xf32>
    %c0_82 = arith.constant 0 : index
    %c24_83 = arith.constant 24 : index
    %249 = vector.load %arg8[%c0_82, %c24_83] : memref<2x384xf32, #tpu.memory_space<vmem>>, vector<2x8xf32>
    tpu.vector_store %arg8[%c0_82, %c24_83], %248 {strides = array<i32>} : memref<2x384xf32, #tpu.memory_space<vmem>>, vector<2x8xf32>,
    %250 = vector.extract_strided_slice %237 {offsets = [0, 0, 8], sizes = [2, 8, 2], strides = [1, 1, 1]} : vector<2x8x48xf32> to vector<2x8x2xf32>
    %cst_84 = arith.constant dense<0xFF800000> : vector<2x8xf32>
    %251 = vector.multi_reduction <maximumf>, %250, %cst_84 [2] : vector<2x8x2xf32> to vector<2x8xf32>
    %c0_85 = arith.constant 0 : index
    %c32_86 = arith.constant 32 : index
    %252 = vector.load %arg8[%c0_85, %c32_86] : memref<2x384xf32, #tpu.memory_space<vmem>>, vector<2x8xf32>
    tpu.vector_store %arg8[%c0_85, %c32_86], %251 {strides = array<i32>} : memref<2x384xf32, #tpu.memory_space<vmem>>, vector<2x8xf32>,
    %253 = vector.extract_strided_slice %237 {offsets = [0, 0, 10], sizes = [2, 8, 2], strides = [1, 1, 1]} : vector<2x8x48xf32> to vector<2x8x2xf32>
    %cst_87 = arith.constant dense<0xFF800000> : vector<2x8xf32>
    %254 = vector.multi_reduction <maximumf>, %253, %cst_87 [2] : vector<2x8x2xf32> to vector<2x8xf32>
    %c0_88 = arith.constant 0 : index
    %c40_89 = arith.constant 40 : index
    %255 = vector.load %arg8[%c0_88, %c40_89] : memref<2x384xf32, #tpu.memory_space<vmem>>, vector<2x8xf32>
    tpu.vector_store %arg8[%c0_88, %c40_89], %254 {strides = array<i32>} : memref<2x384xf32, #tpu.memory_space<vmem>>, vector<2x8xf32>,
    %256 = vector.extract_strided_slice %237 {offsets = [0, 0, 12], sizes = [2, 8, 2], strides = [1, 1, 1]} : vector<2x8x48xf32> to vector<2x8x2xf32>
    %cst_90 = arith.constant dense<0xFF800000> : vector<2x8xf32>
    %257 = vector.multi_reduction <maximumf>, %256, %cst_90 [2] : vector<2x8x2xf32> to vector<2x8xf32>
    %c0_91 = arith.constant 0 : index
    %c48 = arith.constant 48 : index
    %258 = vector.load %arg8[%c0_91, %c48] : memref<2x384xf32, #tpu.memory_space<vmem>>, vector<2x8xf32>
    tpu.vector_store %arg8[%c0_91, %c48], %257 {strides = array<i32>} : memref<2x384xf32, #tpu.memory_space<vmem>>, vector<2x8xf32>,
    %259 = vector.extract_strided_slice %237 {offsets = [0, 0, 14], sizes = [2, 8, 2], strides = [1, 1, 1]} : vector<2x8x48xf32> to vector<2x8x2xf32>
    %cst_92 = arith.constant dense<0xFF800000> : vector<2x8xf32>
    %260 = vector.multi_reduction <maximumf>, %259, %cst_92 [2] : vector<2x8x2xf32> to vector<2x8xf32>
    %c0_93 = arith.constant 0 : index
    %c56 = arith.constant 56 : index
    %261 = vector.load %arg8[%c0_93, %c56] : memref<2x384xf32, #tpu.memory_space<vmem>>, vector<2x8xf32>
    tpu.vector_store %arg8[%c0_93, %c56], %260 {strides = array<i32>} : memref<2x384xf32, #tpu.memory_space<vmem>>, vector<2x8xf32>,
    %262 = vector.extract_strided_slice %237 {offsets = [0, 0, 16], sizes = [2, 8, 2], strides = [1, 1, 1]} : vector<2x8x48xf32> to vector<2x8x2xf32>
    %cst_94 = arith.constant dense<0xFF800000> : vector<2x8xf32>
    %263 = vector.multi_reduction <maximumf>, %262, %cst_94 [2] : vector<2x8x2xf32> to vector<2x8xf32>
    %c0_95 = arith.constant 0 : index
    %c64 = arith.constant 64 : index
    %264 = vector.load %arg8[%c0_95, %c64] : memref<2x384xf32, #tpu.memory_space<vmem>>, vector<2x8xf32>
    tpu.vector_store %arg8[%c0_95, %c64], %263 {strides = array<i32>} : memref<2x384xf32, #tpu.memory_space<vmem>>, vector<2x8xf32>,
    %265 = vector.extract_strided_slice %237 {offsets = [0, 0, 18], sizes = [2, 8, 2], strides = [1, 1, 1]} : vector<2x8x48xf32> to vector<2x8x2xf32>
    %cst_96 = arith.constant dense<0xFF800000> : vector<2x8xf32>
    %266 = vector.multi_reduction <maximumf>, %265, %cst_96 [2] : vector<2x8x2xf32> to vector<2x8xf32>
    %c0_97 = arith.constant 0 : index
    %c72 = arith.constant 72 : index
    %267 = vector.load %arg8[%c0_97, %c72] : memref<2x384xf32, #tpu.memory_space<vmem>>, vector<2x8xf32>
    tpu.vector_store %arg8[%c0_97, %c72], %266 {strides = array<i32>} : memref<2x384xf32, #tpu.memory_space<vmem>>, vector<2x8xf32>,
    %268 = vector.extract_strided_slice %237 {offsets = [0, 0, 20], sizes = [2, 8, 2], strides = [1, 1, 1]} : vector<2x8x48xf32> to vector<2x8x2xf32>
    %cst_98 = arith.constant dense<0xFF800000> : vector<2x8xf32>
    %269 = vector.multi_reduction <maximumf>, %268, %cst_98 [2] : vector<2x8x2xf32> to vector<2x8xf32>
    %c0_99 = arith.constant 0 : index
    %c80 = arith.constant 80 : index
    %270 = vector.load %arg8[%c0_99, %c80] : memref<2x384xf32, #tpu.memory_space<vmem>>, vector<2x8xf32>
    tpu.vector_store %arg8[%c0_99, %c80], %269 {strides = array<i32>} : memref<2x384xf32, #tpu.memory_space<vmem>>, vector<2x8xf32>,
    %271 = vector.extract_strided_slice %237 {offsets = [0, 0, 22], sizes = [2, 8, 2], strides = [1, 1, 1]} : vector<2x8x48xf32> to vector<2x8x2xf32>
    %cst_100 = arith.constant dense<0xFF800000> : vector<2x8xf32>
    %272 = vector.multi_reduction <maximumf>, %271, %cst_100 [2] : vector<2x8x2xf32> to vector<2x8xf32>
    %c0_101 = arith.constant 0 : index
    %c88 = arith.constant 88 : index
    %273 = vector.load %arg8[%c0_101, %c88] : memref<2x384xf32, #tpu.memory_space<vmem>>, vector<2x8xf32>
    tpu.vector_store %arg8[%c0_101, %c88], %272 {strides = array<i32>} : memref<2x384xf32, #tpu.memory_space<vmem>>, vector<2x8xf32>,
    %274 = vector.extract_strided_slice %237 {offsets = [0, 0, 24], sizes = [2, 8, 2], strides = [1, 1, 1]} : vector<2x8x48xf32> to vector<2x8x2xf32>
    %cst_102 = arith.constant dense<0xFF800000> : vector<2x8xf32>
    %275 = vector.multi_reduction <maximumf>, %274, %cst_102 [2] : vector<2x8x2xf32> to vector<2x8xf32>
    %c0_103 = arith.constant 0 : index
    %c96 = arith.constant 96 : index
    %276 = vector.load %arg8[%c0_103, %c96] : memref<2x384xf32, #tpu.memory_space<vmem>>, vector<2x8xf32>
    tpu.vector_store %arg8[%c0_103, %c96], %275 {strides = array<i32>} : memref<2x384xf32, #tpu.memory_space<vmem>>, vector<2x8xf32>,
    %277 = vector.extract_strided_slice %237 {offsets = [0, 0, 26], sizes = [2, 8, 2], strides = [1, 1, 1]} : vector<2x8x48xf32> to vector<2x8x2xf32>
    %cst_104 = arith.constant dense<0xFF800000> : vector<2x8xf32>
    %278 = vector.multi_reduction <maximumf>, %277, %cst_104 [2] : vector<2x8x2xf32> to vector<2x8xf32>
    %c0_105 = arith.constant 0 : index
    %c104 = arith.constant 104 : index
    %279 = vector.load %arg8[%c0_105, %c104] : memref<2x384xf32, #tpu.memory_space<vmem>>, vector<2x8xf32>
    tpu.vector_store %arg8[%c0_105, %c104], %278 {strides = array<i32>} : memref<2x384xf32, #tpu.memory_space<vmem>>, vector<2x8xf32>,
    %280 = vector.extract_strided_slice %237 {offsets = [0, 0, 28], sizes = [2, 8, 2], strides = [1, 1, 1]} : vector<2x8x48xf32> to vector<2x8x2xf32>
    %cst_106 = arith.constant dense<0xFF800000> : vector<2x8xf32>
    %281 = vector.multi_reduction <maximumf>, %280, %cst_106 [2] : vector<2x8x2xf32> to vector<2x8xf32>
    %c0_107 = arith.constant 0 : index
    %c112 = arith.constant 112 : index
    %282 = vector.load %arg8[%c0_107, %c112] : memref<2x384xf32, #tpu.memory_space<vmem>>, vector<2x8xf32>
    tpu.vector_store %arg8[%c0_107, %c112], %281 {strides = array<i32>} : memref<2x384xf32, #tpu.memory_space<vmem>>, vector<2x8xf32>,
    %283 = vector.extract_strided_slice %237 {offsets = [0, 0, 30], sizes = [2, 8, 2], strides = [1, 1, 1]} : vector<2x8x48xf32> to vector<2x8x2xf32>
    %cst_108 = arith.constant dense<0xFF800000> : vector<2x8xf32>
    %284 = vector.multi_reduction <maximumf>, %283, %cst_108 [2] : vector<2x8x2xf32> to vector<2x8xf32>
    %c0_109 = arith.constant 0 : index
    %c120 = arith.constant 120 : index
    %285 = vector.load %arg8[%c0_109, %c120] : memref<2x384xf32, #tpu.memory_space<vmem>>, vector<2x8xf32>
    tpu.vector_store %arg8[%c0_109, %c120], %284 {strides = array<i32>} : memref<2x384xf32, #tpu.memory_space<vmem>>, vector<2x8xf32>,
    %286 = vector.extract_strided_slice %237 {offsets = [0, 0, 32], sizes = [2, 8, 2], strides = [1, 1, 1]} : vector<2x8x48xf32> to vector<2x8x2xf32>
    %cst_110 = arith.constant dense<0xFF800000> : vector<2x8xf32>
    %287 = vector.multi_reduction <maximumf>, %286, %cst_110 [2] : vector<2x8x2xf32> to vector<2x8xf32>
    %c0_111 = arith.constant 0 : index
    %c128 = arith.constant 128 : index
    %288 = vector.load %arg8[%c0_111, %c128] : memref<2x384xf32, #tpu.memory_space<vmem>>, vector<2x8xf32>
    tpu.vector_store %arg8[%c0_111, %c128], %287 {strides = array<i32>} : memref<2x384xf32, #tpu.memory_space<vmem>>, vector<2x8xf32>,
    %289 = vector.extract_strided_slice %237 {offsets = [0, 0, 34], sizes = [2, 8, 2], strides = [1, 1, 1]} : vector<2x8x48xf32> to vector<2x8x2xf32>
    %cst_112 = arith.constant dense<0xFF800000> : vector<2x8xf32>
    %290 = vector.multi_reduction <maximumf>, %289, %cst_112 [2] : vector<2x8x2xf32> to vector<2x8xf32>
    %c0_113 = arith.constant 0 : index
    %c136 = arith.constant 136 : index
    %291 = vector.load %arg8[%c0_113, %c136] : memref<2x384xf32, #tpu.memory_space<vmem>>, vector<2x8xf32>
    tpu.vector_store %arg8[%c0_113, %c136], %290 {strides = array<i32>} : memref<2x384xf32, #tpu.memory_space<vmem>>, vector<2x8xf32>,
    %292 = vector.extract_strided_slice %237 {offsets = [0, 0, 36], sizes = [2, 8, 2], strides = [1, 1, 1]} : vector<2x8x48xf32> to vector<2x8x2xf32>
    %cst_114 = arith.constant dense<0xFF800000> : vector<2x8xf32>
    %293 = vector.multi_reduction <maximumf>, %292, %cst_114 [2] : vector<2x8x2xf32> to vector<2x8xf32>
    %c0_115 = arith.constant 0 : index
    %c144 = arith.constant 144 : index
    %294 = vector.load %arg8[%c0_115, %c144] : memref<2x384xf32, #tpu.memory_space<vmem>>, vector<2x8xf32>
    tpu.vector_store %arg8[%c0_115, %c144], %293 {strides = array<i32>} : memref<2x384xf32, #tpu.memory_space<vmem>>, vector<2x8xf32>,
    %295 = vector.extract_strided_slice %237 {offsets = [0, 0, 38], sizes = [2, 8, 2], strides = [1, 1, 1]} : vector<2x8x48xf32> to vector<2x8x2xf32>
    %cst_116 = arith.constant dense<0xFF800000> : vector<2x8xf32>
    %296 = vector.multi_reduction <maximumf>, %295, %cst_116 [2] : vector<2x8x2xf32> to vector<2x8xf32>
    %c0_117 = arith.constant 0 : index
    %c152 = arith.constant 152 : index
    %297 = vector.load %arg8[%c0_117, %c152] : memref<2x384xf32, #tpu.memory_space<vmem>>, vector<2x8xf32>
    tpu.vector_store %arg8[%c0_117, %c152], %296 {strides = array<i32>} : memref<2x384xf32, #tpu.memory_space<vmem>>, vector<2x8xf32>,
    %298 = vector.extract_strided_slice %237 {offsets = [0, 0, 40], sizes = [2, 8, 2], strides = [1, 1, 1]} : vector<2x8x48xf32> to vector<2x8x2xf32>
    %cst_118 = arith.constant dense<0xFF800000> : vector<2x8xf32>
    %299 = vector.multi_reduction <maximumf>, %298, %cst_118 [2] : vector<2x8x2xf32> to vector<2x8xf32>
    %c0_119 = arith.constant 0 : index
    %c160 = arith.constant 160 : index
    %300 = vector.load %arg8[%c0_119, %c160] : memref<2x384xf32, #tpu.memory_space<vmem>>, vector<2x8xf32>
    tpu.vector_store %arg8[%c0_119, %c160], %299 {strides = array<i32>} : memref<2x384xf32, #tpu.memory_space<vmem>>, vector<2x8xf32>,
    %301 = vector.extract_strided_slice %237 {offsets = [0, 0, 42], sizes = [2, 8, 2], strides = [1, 1, 1]} : vector<2x8x48xf32> to vector<2x8x2xf32>
    %cst_120 = arith.constant dense<0xFF800000> : vector<2x8xf32>
    %302 = vector.multi_reduction <maximumf>, %301, %cst_120 [2] : vector<2x8x2xf32> to vector<2x8xf32>
    %c0_121 = arith.constant 0 : index
    %c168 = arith.constant 168 : index
    %303 = vector.load %arg8[%c0_121, %c168] : memref<2x384xf32, #tpu.memory_space<vmem>>, vector<2x8xf32>
    tpu.vector_store %arg8[%c0_121, %c168], %302 {strides = array<i32>} : memref<2x384xf32, #tpu.memory_space<vmem>>, vector<2x8xf32>,
    %304 = vector.extract_strided_slice %237 {offsets = [0, 0, 44], sizes = [2, 8, 2], strides = [1, 1, 1]} : vector<2x8x48xf32> to vector<2x8x2xf32>
    %cst_122 = arith.constant dense<0xFF800000> : vector<2x8xf32>
    %305 = vector.multi_reduction <maximumf>, %304, %cst_122 [2] : vector<2x8x2xf32> to vector<2x8xf32>
    %c0_123 = arith.constant 0 : index
    %c176 = arith.constant 176 : index
    %306 = vector.load %arg8[%c0_123, %c176] : memref<2x384xf32, #tpu.memory_space<vmem>>, vector<2x8xf32>
    tpu.vector_store %arg8[%c0_123, %c176], %305 {strides = array<i32>} : memref<2x384xf32, #tpu.memory_space<vmem>>, vector<2x8xf32>,
    %307 = vector.extract_strided_slice %237 {offsets = [0, 0, 46], sizes = [2, 8, 2], strides = [1, 1, 1]} : vector<2x8x48xf32> to vector<2x8x2xf32>
    %cst_124 = arith.constant dense<0xFF800000> : vector<2x8xf32>
    %308 = vector.multi_reduction <maximumf>, %307, %cst_124 [2] : vector<2x8x2xf32> to vector<2x8xf32>
    %c0_125 = arith.constant 0 : index
    %c184 = arith.constant 184 : index
    %309 = vector.load %arg8[%c0_125, %c184] : memref<2x384xf32, #tpu.memory_space<vmem>>, vector<2x8xf32>
    tpu.vector_store %arg8[%c0_125, %c184], %308 {strides = array<i32>} : memref<2x384xf32, #tpu.memory_space<vmem>>, vector<2x8xf32>,
    %310 = arith.maximumf %184, %236 : vector<2x8x48xf32>
    %311 = vector.extract_strided_slice %310 {offsets = [0, 0, 0], sizes = [2, 8, 2], strides = [1, 1, 1]} : vector<2x8x48xf32> to vector<2x8x2xf32>
    %cst_126 = arith.constant dense<0xFF800000> : vector<2x8xf32>
    %312 = vector.multi_reduction <maximumf>, %311, %cst_126 [2] : vector<2x8x2xf32> to vector<2x8xf32>
    %c0_127 = arith.constant 0 : index
    %c192 = arith.constant 192 : index
    %313 = vector.load %arg8[%c0_127, %c192] : memref<2x384xf32, #tpu.memory_space<vmem>>, vector<2x8xf32>
    tpu.vector_store %arg8[%c0_127, %c192], %312 {strides = array<i32>} : memref<2x384xf32, #tpu.memory_space<vmem>>, vector<2x8xf32>,
    %314 = vector.extract_strided_slice %310 {offsets = [0, 0, 2], sizes = [2, 8, 2], strides = [1, 1, 1]} : vector<2x8x48xf32> to vector<2x8x2xf32>
    %cst_128 = arith.constant dense<0xFF800000> : vector<2x8xf32>
    %315 = vector.multi_reduction <maximumf>, %314, %cst_128 [2] : vector<2x8x2xf32> to vector<2x8xf32>
    %c0_129 = arith.constant 0 : index
    %c200 = arith.constant 200 : index
    %316 = vector.load %arg8[%c0_129, %c200] : memref<2x384xf32, #tpu.memory_space<vmem>>, vector<2x8xf32>
    tpu.vector_store %arg8[%c0_129, %c200], %315 {strides = array<i32>} : memref<2x384xf32, #tpu.memory_space<vmem>>, vector<2x8xf32>,
    %317 = vector.extract_strided_slice %310 {offsets = [0, 0, 4], sizes = [2, 8, 2], strides = [1, 1, 1]} : vector<2x8x48xf32> to vector<2x8x2xf32>
    %cst_130 = arith.constant dense<0xFF800000> : vector<2x8xf32>
    %318 = vector.multi_reduction <maximumf>, %317, %cst_130 [2] : vector<2x8x2xf32> to vector<2x8xf32>
    %c0_131 = arith.constant 0 : index
    %c208 = arith.constant 208 : index
    %319 = vector.load %arg8[%c0_131, %c208] : memref<2x384xf32, #tpu.memory_space<vmem>>, vector<2x8xf32>
    tpu.vector_store %arg8[%c0_131, %c208], %318 {strides = array<i32>} : memref<2x384xf32, #tpu.memory_space<vmem>>, vector<2x8xf32>,
    %320 = vector.extract_strided_slice %310 {offsets = [0, 0, 6], sizes = [2, 8, 2], strides = [1, 1, 1]} : vector<2x8x48xf32> to vector<2x8x2xf32>
    %cst_132 = arith.constant dense<0xFF800000> : vector<2x8xf32>
    %321 = vector.multi_reduction <maximumf>, %320, %cst_132 [2] : vector<2x8x2xf32> to vector<2x8xf32>
    %c0_133 = arith.constant 0 : index
    %c216 = arith.constant 216 : index
    %322 = vector.load %arg8[%c0_133, %c216] : memref<2x384xf32, #tpu.memory_space<vmem>>, vector<2x8xf32>
    tpu.vector_store %arg8[%c0_133, %c216], %321 {strides = array<i32>} : memref<2x384xf32, #tpu.memory_space<vmem>>, vector<2x8xf32>,
    %323 = vector.extract_strided_slice %310 {offsets = [0, 0, 8], sizes = [2, 8, 2], strides = [1, 1, 1]} : vector<2x8x48xf32> to vector<2x8x2xf32>
    %cst_134 = arith.constant dense<0xFF800000> : vector<2x8xf32>
    %324 = vector.multi_reduction <maximumf>, %323, %cst_134 [2] : vector<2x8x2xf32> to vector<2x8xf32>
    %c0_135 = arith.constant 0 : index
    %c224 = arith.constant 224 : index
    %325 = vector.load %arg8[%c0_135, %c224] : memref<2x384xf32, #tpu.memory_space<vmem>>, vector<2x8xf32>
    tpu.vector_store %arg8[%c0_135, %c224], %324 {strides = array<i32>} : memref<2x384xf32, #tpu.memory_space<vmem>>, vector<2x8xf32>,
    %326 = vector.extract_strided_slice %310 {offsets = [0, 0, 10], sizes = [2, 8, 2], strides = [1, 1, 1]} : vector<2x8x48xf32> to vector<2x8x2xf32>
    %cst_136 = arith.constant dense<0xFF800000> : vector<2x8xf32>
    %327 = vector.multi_reduction <maximumf>, %326, %cst_136 [2] : vector<2x8x2xf32> to vector<2x8xf32>
    %c0_137 = arith.constant 0 : index
    %c232 = arith.constant 232 : index
    %328 = vector.load %arg8[%c0_137, %c232] : memref<2x384xf32, #tpu.memory_space<vmem>>, vector<2x8xf32>
    tpu.vector_store %arg8[%c0_137, %c232], %327 {strides = array<i32>} : memref<2x384xf32, #tpu.memory_space<vmem>>, vector<2x8xf32>,
    %329 = vector.extract_strided_slice %310 {offsets = [0, 0, 12], sizes = [2, 8, 2], strides = [1, 1, 1]} : vector<2x8x48xf32> to vector<2x8x2xf32>
    %cst_138 = arith.constant dense<0xFF800000> : vector<2x8xf32>
    %330 = vector.multi_reduction <maximumf>, %329, %cst_138 [2] : vector<2x8x2xf32> to vector<2x8xf32>
    %c0_139 = arith.constant 0 : index
    %c240 = arith.constant 240 : index
    %331 = vector.load %arg8[%c0_139, %c240] : memref<2x384xf32, #tpu.memory_space<vmem>>, vector<2x8xf32>
    tpu.vector_store %arg8[%c0_139, %c240], %330 {strides = array<i32>} : memref<2x384xf32, #tpu.memory_space<vmem>>, vector<2x8xf32>,
    %332 = vector.extract_strided_slice %310 {offsets = [0, 0, 14], sizes = [2, 8, 2], strides = [1, 1, 1]} : vector<2x8x48xf32> to vector<2x8x2xf32>
    %cst_140 = arith.constant dense<0xFF800000> : vector<2x8xf32>
    %333 = vector.multi_reduction <maximumf>, %332, %cst_140 [2] : vector<2x8x2xf32> to vector<2x8xf32>
    %c0_141 = arith.constant 0 : index
    %c248 = arith.constant 248 : index
    %334 = vector.load %arg8[%c0_141, %c248] : memref<2x384xf32, #tpu.memory_space<vmem>>, vector<2x8xf32>
    tpu.vector_store %arg8[%c0_141, %c248], %333 {strides = array<i32>} : memref<2x384xf32, #tpu.memory_space<vmem>>, vector<2x8xf32>,
    %335 = vector.extract_strided_slice %310 {offsets = [0, 0, 16], sizes = [2, 8, 2], strides = [1, 1, 1]} : vector<2x8x48xf32> to vector<2x8x2xf32>
    %cst_142 = arith.constant dense<0xFF800000> : vector<2x8xf32>
    %336 = vector.multi_reduction <maximumf>, %335, %cst_142 [2] : vector<2x8x2xf32> to vector<2x8xf32>
    %c0_143 = arith.constant 0 : index
    %c256 = arith.constant 256 : index
    %337 = vector.load %arg8[%c0_143, %c256] : memref<2x384xf32, #tpu.memory_space<vmem>>, vector<2x8xf32>
    tpu.vector_store %arg8[%c0_143, %c256], %336 {strides = array<i32>} : memref<2x384xf32, #tpu.memory_space<vmem>>, vector<2x8xf32>,
    %338 = vector.extract_strided_slice %310 {offsets = [0, 0, 18], sizes = [2, 8, 2], strides = [1, 1, 1]} : vector<2x8x48xf32> to vector<2x8x2xf32>
    %cst_144 = arith.constant dense<0xFF800000> : vector<2x8xf32>
    %339 = vector.multi_reduction <maximumf>, %338, %cst_144 [2] : vector<2x8x2xf32> to vector<2x8xf32>
    %c0_145 = arith.constant 0 : index
    %c264 = arith.constant 264 : index
    %340 = vector.load %arg8[%c0_145, %c264] : memref<2x384xf32, #tpu.memory_space<vmem>>, vector<2x8xf32>
    tpu.vector_store %arg8[%c0_145, %c264], %339 {strides = array<i32>} : memref<2x384xf32, #tpu.memory_space<vmem>>, vector<2x8xf32>,
    %341 = vector.extract_strided_slice %310 {offsets = [0, 0, 20], sizes = [2, 8, 2], strides = [1, 1, 1]} : vector<2x8x48xf32> to vector<2x8x2xf32>
    %cst_146 = arith.constant dense<0xFF800000> : vector<2x8xf32>
    %342 = vector.multi_reduction <maximumf>, %341, %cst_146 [2] : vector<2x8x2xf32> to vector<2x8xf32>
    %c0_147 = arith.constant 0 : index
    %c272 = arith.constant 272 : index
    %343 = vector.load %arg8[%c0_147, %c272] : memref<2x384xf32, #tpu.memory_space<vmem>>, vector<2x8xf32>
    tpu.vector_store %arg8[%c0_147, %c272], %342 {strides = array<i32>} : memref<2x384xf32, #tpu.memory_space<vmem>>, vector<2x8xf32>,
    %344 = vector.extract_strided_slice %310 {offsets = [0, 0, 22], sizes = [2, 8, 2], strides = [1, 1, 1]} : vector<2x8x48xf32> to vector<2x8x2xf32>
    %cst_148 = arith.constant dense<0xFF800000> : vector<2x8xf32>
    %345 = vector.multi_reduction <maximumf>, %344, %cst_148 [2] : vector<2x8x2xf32> to vector<2x8xf32>
    %c0_149 = arith.constant 0 : index
    %c280 = arith.constant 280 : index
    %346 = vector.load %arg8[%c0_149, %c280] : memref<2x384xf32, #tpu.memory_space<vmem>>, vector<2x8xf32>
    tpu.vector_store %arg8[%c0_149, %c280], %345 {strides = array<i32>} : memref<2x384xf32, #tpu.memory_space<vmem>>, vector<2x8xf32>,
    %347 = vector.extract_strided_slice %310 {offsets = [0, 0, 24], sizes = [2, 8, 2], strides = [1, 1, 1]} : vector<2x8x48xf32> to vector<2x8x2xf32>
    %cst_150 = arith.constant dense<0xFF800000> : vector<2x8xf32>
    %348 = vector.multi_reduction <maximumf>, %347, %cst_150 [2] : vector<2x8x2xf32> to vector<2x8xf32>
    %c0_151 = arith.constant 0 : index
    %c288 = arith.constant 288 : index
    %349 = vector.load %arg8[%c0_151, %c288] : memref<2x384xf32, #tpu.memory_space<vmem>>, vector<2x8xf32>
    tpu.vector_store %arg8[%c0_151, %c288], %348 {strides = array<i32>} : memref<2x384xf32, #tpu.memory_space<vmem>>, vector<2x8xf32>,
    %350 = vector.extract_strided_slice %310 {offsets = [0, 0, 26], sizes = [2, 8, 2], strides = [1, 1, 1]} : vector<2x8x48xf32> to vector<2x8x2xf32>
    %cst_152 = arith.constant dense<0xFF800000> : vector<2x8xf32>
    %351 = vector.multi_reduction <maximumf>, %350, %cst_152 [2] : vector<2x8x2xf32> to vector<2x8xf32>
    %c0_153 = arith.constant 0 : index
    %c296 = arith.constant 296 : index
    %352 = vector.load %arg8[%c0_153, %c296] : memref<2x384xf32, #tpu.memory_space<vmem>>, vector<2x8xf32>
    tpu.vector_store %arg8[%c0_153, %c296], %351 {strides = array<i32>} : memref<2x384xf32, #tpu.memory_space<vmem>>, vector<2x8xf32>,
    %353 = vector.extract_strided_slice %310 {offsets = [0, 0, 28], sizes = [2, 8, 2], strides = [1, 1, 1]} : vector<2x8x48xf32> to vector<2x8x2xf32>
    %cst_154 = arith.constant dense<0xFF800000> : vector<2x8xf32>
    %354 = vector.multi_reduction <maximumf>, %353, %cst_154 [2] : vector<2x8x2xf32> to vector<2x8xf32>
    %c0_155 = arith.constant 0 : index
    %c304 = arith.constant 304 : index
    %355 = vector.load %arg8[%c0_155, %c304] : memref<2x384xf32, #tpu.memory_space<vmem>>, vector<2x8xf32>
    tpu.vector_store %arg8[%c0_155, %c304], %354 {strides = array<i32>} : memref<2x384xf32, #tpu.memory_space<vmem>>, vector<2x8xf32>,
    %356 = vector.extract_strided_slice %310 {offsets = [0, 0, 30], sizes = [2, 8, 2], strides = [1, 1, 1]} : vector<2x8x48xf32> to vector<2x8x2xf32>
    %cst_156 = arith.constant dense<0xFF800000> : vector<2x8xf32>
    %357 = vector.multi_reduction <maximumf>, %356, %cst_156 [2] : vector<2x8x2xf32> to vector<2x8xf32>
    %c0_157 = arith.constant 0 : index
    %c312 = arith.constant 312 : index
    %358 = vector.load %arg8[%c0_157, %c312] : memref<2x384xf32, #tpu.memory_space<vmem>>, vector<2x8xf32>
    tpu.vector_store %arg8[%c0_157, %c312], %357 {strides = array<i32>} : memref<2x384xf32, #tpu.memory_space<vmem>>, vector<2x8xf32>,
    %359 = vector.extract_strided_slice %310 {offsets = [0, 0, 32], sizes = [2, 8, 2], strides = [1, 1, 1]} : vector<2x8x48xf32> to vector<2x8x2xf32>
    %cst_158 = arith.constant dense<0xFF800000> : vector<2x8xf32>
    %360 = vector.multi_reduction <maximumf>, %359, %cst_158 [2] : vector<2x8x2xf32> to vector<2x8xf32>
    %c0_159 = arith.constant 0 : index
    %c320 = arith.constant 320 : index
    %361 = vector.load %arg8[%c0_159, %c320] : memref<2x384xf32, #tpu.memory_space<vmem>>, vector<2x8xf32>
    tpu.vector_store %arg8[%c0_159, %c320], %360 {strides = array<i32>} : memref<2x384xf32, #tpu.memory_space<vmem>>, vector<2x8xf32>,
    %362 = vector.extract_strided_slice %310 {offsets = [0, 0, 34], sizes = [2, 8, 2], strides = [1, 1, 1]} : vector<2x8x48xf32> to vector<2x8x2xf32>
    %cst_160 = arith.constant dense<0xFF800000> : vector<2x8xf32>
    %363 = vector.multi_reduction <maximumf>, %362, %cst_160 [2] : vector<2x8x2xf32> to vector<2x8xf32>
    %c0_161 = arith.constant 0 : index
    %c328 = arith.constant 328 : index
    %364 = vector.load %arg8[%c0_161, %c328] : memref<2x384xf32, #tpu.memory_space<vmem>>, vector<2x8xf32>
    tpu.vector_store %arg8[%c0_161, %c328], %363 {strides = array<i32>} : memref<2x384xf32, #tpu.memory_space<vmem>>, vector<2x8xf32>,
    %365 = vector.extract_strided_slice %310 {offsets = [0, 0, 36], sizes = [2, 8, 2], strides = [1, 1, 1]} : vector<2x8x48xf32> to vector<2x8x2xf32>
    %cst_162 = arith.constant dense<0xFF800000> : vector<2x8xf32>
    %366 = vector.multi_reduction <maximumf>, %365, %cst_162 [2] : vector<2x8x2xf32> to vector<2x8xf32>
    %c0_163 = arith.constant 0 : index
    %c336 = arith.constant 336 : index
    %367 = vector.load %arg8[%c0_163, %c336] : memref<2x384xf32, #tpu.memory_space<vmem>>, vector<2x8xf32>
    tpu.vector_store %arg8[%c0_163, %c336], %366 {strides = array<i32>} : memref<2x384xf32, #tpu.memory_space<vmem>>, vector<2x8xf32>,
    %368 = vector.extract_strided_slice %310 {offsets = [0, 0, 38], sizes = [2, 8, 2], strides = [1, 1, 1]} : vector<2x8x48xf32> to vector<2x8x2xf32>
    %cst_164 = arith.constant dense<0xFF800000> : vector<2x8xf32>
    %369 = vector.multi_reduction <maximumf>, %368, %cst_164 [2] : vector<2x8x2xf32> to vector<2x8xf32>
    %c0_165 = arith.constant 0 : index
    %c344 = arith.constant 344 : index
    %370 = vector.load %arg8[%c0_165, %c344] : memref<2x384xf32, #tpu.memory_space<vmem>>, vector<2x8xf32>
    tpu.vector_store %arg8[%c0_165, %c344], %369 {strides = array<i32>} : memref<2x384xf32, #tpu.memory_space<vmem>>, vector<2x8xf32>,
    %371 = vector.extract_strided_slice %310 {offsets = [0, 0, 40], sizes = [2, 8, 2], strides = [1, 1, 1]} : vector<2x8x48xf32> to vector<2x8x2xf32>
    %cst_166 = arith.constant dense<0xFF800000> : vector<2x8xf32>
    %372 = vector.multi_reduction <maximumf>, %371, %cst_166 [2] : vector<2x8x2xf32> to vector<2x8xf32>
    %c0_167 = arith.constant 0 : index
    %c352 = arith.constant 352 : index
    %373 = vector.load %arg8[%c0_167, %c352] : memref<2x384xf32, #tpu.memory_space<vmem>>, vector<2x8xf32>
    tpu.vector_store %arg8[%c0_167, %c352], %372 {strides = array<i32>} : memref<2x384xf32, #tpu.memory_space<vmem>>, vector<2x8xf32>,
    %374 = vector.extract_strided_slice %310 {offsets = [0, 0, 42], sizes = [2, 8, 2], strides = [1, 1, 1]} : vector<2x8x48xf32> to vector<2x8x2xf32>
    %cst_168 = arith.constant dense<0xFF800000> : vector<2x8xf32>
    %375 = vector.multi_reduction <maximumf>, %374, %cst_168 [2] : vector<2x8x2xf32> to vector<2x8xf32>
    %c0_169 = arith.constant 0 : index
    %c360 = arith.constant 360 : index
    %376 = vector.load %arg8[%c0_169, %c360] : memref<2x384xf32, #tpu.memory_space<vmem>>, vector<2x8xf32>
    tpu.vector_store %arg8[%c0_169, %c360], %375 {strides = array<i32>} : memref<2x384xf32, #tpu.memory_space<vmem>>, vector<2x8xf32>,
    %377 = vector.extract_strided_slice %310 {offsets = [0, 0, 44], sizes = [2, 8, 2], strides = [1, 1, 1]} : vector<2x8x48xf32> to vector<2x8x2xf32>
    %cst_170 = arith.constant dense<0xFF800000> : vector<2x8xf32>
    %378 = vector.multi_reduction <maximumf>, %377, %cst_170 [2] : vector<2x8x2xf32> to vector<2x8xf32>
    %c0_171 = arith.constant 0 : index
    %c368 = arith.constant 368 : index
    %379 = vector.load %arg8[%c0_171, %c368] : memref<2x384xf32, #tpu.memory_space<vmem>>, vector<2x8xf32>
    tpu.vector_store %arg8[%c0_171, %c368], %378 {strides = array<i32>} : memref<2x384xf32, #tpu.memory_space<vmem>>, vector<2x8xf32>,
    %380 = vector.extract_strided_slice %310 {offsets = [0, 0, 46], sizes = [2, 8, 2], strides = [1, 1, 1]} : vector<2x8x48xf32> to vector<2x8x2xf32>
    %cst_172 = arith.constant dense<0xFF800000> : vector<2x8xf32>
    %381 = vector.multi_reduction <maximumf>, %380, %cst_172 [2] : vector<2x8x2xf32> to vector<2x8xf32>
    %c0_173 = arith.constant 0 : index
    %c376 = arith.constant 376 : index
    %382 = vector.load %arg8[%c0_173, %c376] : memref<2x384xf32, #tpu.memory_space<vmem>>, vector<2x8xf32>
    tpu.vector_store %arg8[%c0_173, %c376], %381 {strides = array<i32>} : memref<2x384xf32, #tpu.memory_space<vmem>>, vector<2x8xf32>,
    %c0_174 = arith.constant 0 : index
    %c0_175 = arith.constant 0 : index
    %383 = vector.load %arg8[%c0_174, %c0_175] : memref<2x384xf32, #tpu.memory_space<vmem>>, vector<2x384xf32>
    %c0_176 = arith.constant 0 : index
    %c0_177 = arith.constant 0 : index
    %384 = vector.load %arg4[%c0_176, %c0_177] : memref<384x5xf32, #tpu.memory_space<vmem>>, vector<384x5xf32>
    %cst_178 = arith.constant dense<0.000000e+00> : vector<2x5xf32>
    %385 = tpu.matmul %383, %384, %cst_178 {dimension_numbers = #tpu.dot_dimension_numbers<[1], [0], [0], [1], [0, 0, 1, 1], [], []>} : vector<2x384xf32>, vector<384x5xf32>, vector<2x5xf32> -> vector<2x5xf32>
    %c0_179 = arith.constant 0 : index
    %c0_180 = arith.constant 0 : index
    %386 = vector.load %arg5[%c0_179, %c0_180] : memref<1x5xf32, #tpu.memory_space<vmem>>, vector<1x5xf32>
    %387 = vector.broadcast %386 : vector<1x5xf32> to vector<2x5xf32>
    %388 = arith.addf %385, %387 : vector<2x5xf32>
    %c0_181 = arith.constant 0 : index
    %c0_182 = arith.constant 0 : index
    %389 = vector.load %arg6[%c0_181, %c0_182] : memref<2x5xf32, #tpu.memory_space<vmem>>, vector<2x5xf32>
    tpu.vector_store %arg6[%c0_181, %c0_182], %388 {strides = array<i32>} : memref<2x5xf32, #tpu.memory_space<vmem>>, vector<2x5xf32>,
    return
  }
  func.func @transform_0(%arg0: i32) -> (i32, i32, i32, i32) {
    %c0_i32 = arith.constant 0 : i32
    %c0_i32_0 = arith.constant 0 : i32
    %c0_i32_1 = arith.constant 0 : i32
    %c0_i32_2 = arith.constant 0 : i32
    return %arg0, %c0_i32, %c0_i32_0, %c0_i32_1 : i32, i32, i32, i32
  }
  func.func @transform_1(%arg0: i32) -> i32 {
    %c0_i32 = arith.constant 0 : i32
    %c0_i32_0 = arith.constant 0 : i32
    return %c0_i32 : i32
  }
  func.func @transform_2(%arg0: i32) -> i32 {
    %c0_i32 = arith.constant 0 : i32
    %c0_i32_0 = arith.constant 0 : i32
    return %c0_i32 : i32
  }
  func.func @transform_3(%arg0: i32) -> (i32, i32) {
    %c0_i32 = arith.constant 0 : i32
    %c0_i32_0 = arith.constant 0 : i32
    %c0_i32_1 = arith.constant 0 : i32
    return %c0_i32, %c0_i32_0 : i32, i32
  }
  func.func @transform_4(%arg0: i32) -> (i32, i32) {
    %c0_i32 = arith.constant 0 : i32
    %c0_i32_0 = arith.constant 0 : i32
    %c0_i32_1 = arith.constant 0 : i32
    return %c0_i32, %c0_i32_0 : i32, i32
  }
  func.func @transform_5(%arg0: i32) -> (i32, i32) {
    %c0_i32 = arith.constant 0 : i32
    %c0_i32_0 = arith.constant 0 : i32
    return %arg0, %c0_i32 : i32, i32
  }
}

</mosaic_0001>

<bundles_post_ra>
// kernel: tpu_custom_call.1
= control target key start
LH: loop header
LB: loop body
LE: loop exit
PB: predicated region body
PF: predicated region fallthrough
CT: control target
= control target key end

     0   :  { %10 = vsyncpa [#allocation6], 0  ;;  %s9822_s0 = inlined_call_operand.vmem [shape: f32[2,4,8,48], index: 0, kind: input, shape index: {}]   ;;  %s9823_s1 = inlined_call_operand.vmem [shape: f32[48], index: 1, kind: input, shape index: {}]   ;;  %s9824_s2 = inlined_call_operand.vmem [shape: f32[4], index: 2, kind: input, shape index: {}]   ;;  %s9825_s3 = inlined_call_operand.vmem [shape: f32[384,5], index: 3, kind: input, shape index: {}]   ;;  %s9826_s4 = inlined_call_operand.vmem [shape: f32[1,5], index: 4, kind: input, shape index: {}]   ;;  %s9827_s5 = inlined_call_operand.hbm [shape: f32[2,5], index: 5, kind: output, shape index: {}]  }
   0x1   :  { %11 = vsyncpa [#allocation8], 0 }
   0x2   :  { %12 = vsyncpa [#allocation5], 0  ;;  %s21_s20 = sshll.u32 %s9823_s1, 4  ;;  %s31_s23 = sshll.u32 %s9824_s2, 4  ;;  %s22_s20 = int_to_ptr.vmem [resolvable:$true] %s21_s20  ;;  %s32_s23 = int_to_ptr.vmem [resolvable:$true] %s31_s23 }
   0x3   :  { %s6711_s24 = scalar_lea.vmem %s22_s20, 16  ;;  %p6716_p1 = scmp.lt.s32.totalorder %s22_s20, %s22_s20 }
   0x4   :  { %p6712_p0 = scmp.ne.s32.totalorder %s22_s20, %s6711_s24  ;;  %p6717_p2 = scmp.lt.s32.totalorder %s6711_s24, %s6711_s24 }
   0x6   :  { %p6718_p3 = por %p6717_p2, %p6716_p1 }
   0x8   :  { %p6719_p4 = pnand %p6718_p3, %p6712_p0 }
   0xa   :  { %6722 = shalt.err (!%p6719_p4)
}
   0xb   :  { %s6761_s25 = smov [#allocation4]   ;;  %s6723_s26 = scalar_lea.vmem %s32_s23, 16 }
   0xc   :  { %24 = dma.vmem_to_smem %s22_s20, 16, %s6761_s25, [#allocation6]  }
   0xd   :  { %p6724_p5 = scmp.ne.s32.totalorder %s32_s23, %s6723_s26  ;;  %p6728_p6 = scmp.lt.s32.totalorder %s32_s23, %s32_s23 }
   0xe   :  { %p6729_p7 = scmp.lt.s32.totalorder %s6723_s26, %s6723_s26 }
  0x10   :  { %p6730_p8 = por %p6729_p7, %p6728_p6 }
  0x12   :  { %p6731_p9 = pnand %p6730_p8, %p6724_p5 }
  0x14   :  { %6734 = shalt.err (!%p6731_p9)
}
  0x15   :  { %s6762_s1 = smov [#allocation7]  }
  0x16   :  { %34 = dma.vmem_to_smem %s32_s23, 16, %s6762_s1, [#allocation8]  }
  0x17   :  { %6755 = dma.done.wait [#allocation6], 16  }
  0x18   :  { %6756 = vsyncadd [#allocation6], 4294967280 }
  0x19   :  { %6757 = dma.done.wait [#allocation8], 16  }
  0x1a   :  { %6758 = vsyncadd [#allocation8], 4294967280 }
  0x1b   :  { %45 = sfence }
  0x1c   :  { %vm46_vm0 = vcmask 385024   ;;  %v67_v0 = vld [vmem:[%s9822_s0 + $0x20] sm:$0xff]  ;;  %v68_v1 = vld [vmem:[%s9822_s0 + $0x28] sm:$0xff]  ;;  %v69_v2 = vld [vmem:[%s9822_s0 + $0x30] sm:$0xff]  ;;  %vm71_vm1 = vcmask 392192   ;;  %v9834_v3 = vmov 0.0  }
  0x1d   :  { %51 = vst.msk [vmem:[#allocation2 + $0x40] sm:$0x1] %vm46_vm0, %v9834_v3  ;;  %52 = vst.msk [vmem:[#allocation2 + $0x50] sm:$0x1] %vm46_vm0, %v9834_v3  ;;  %v70_v4 = vld [vmem:[%s9822_s0 + $0x38] sm:$0xff]  ;;  %s6839_s9 = sld [smem:[#allocation7]]  ;;  %6662 = vmatprep.subr.mxu1 %v9834_v3 }
  0x1e   :  { %53 = vst.msk [vmem:[#allocation2 + $0x60] sm:$0x1] %vm46_vm0, %v9834_v3  ;;  %54 = vst.msk [vmem:[#allocation2 + $0x70] sm:$0x1] %vm46_vm0, %v9834_v3  ;;  %v63_v5 = vld [vmem:[%s9822_s0] sm:$0xff]  ;;  %v64_v6 = vld [vmem:[%s9822_s0 + $0x8] sm:$0xff] }
  0x1f   :  { %59 = vst.msk [vmem:[#allocation2 + $0x49] sm:$0x1] %vm46_vm0, %v9834_v3  ;;  %60 = vst.msk [vmem:[#allocation2 + $0x59] sm:$0x1] %vm46_vm0, %v9834_v3  ;;  %s6865_s14 = sld [smem:[#allocation4]]  ;;  %v65_v7 = vld [vmem:[%s9822_s0 + $0x10] sm:$0xff] }
  0x20   :  { %61 = vst.msk [vmem:[#allocation2 + $0x69] sm:$0x1] %vm46_vm0, %v9834_v3  ;;  %62 = vst.msk [vmem:[#allocation2 + $0x79] sm:$0x1] %vm46_vm0, %v9834_v3  ;;  %v66_v8 = vld [vmem:[%s9822_s0 + $0x18] sm:$0xff]  ;;  %s6875_s19 = sld [smem:[#allocation4 + $0x1]] }
  0x21   :  { %76 = vst.msk [vmem:[#allocation2 + $0x41] sm:$0xff] %vm71_vm1, %v67_v0  ;;  %77 = vst.msk [vmem:[#allocation2 + $0x51] sm:$0xff] %vm71_vm1, %v68_v1  ;;  %s6879_s20 = sld [smem:[#allocation4 + $0x2]]  ;;  %vm9830_vm2 = vcmask 31760   ;;  %vm661_vm3 = vcmask 48160   ;;  %vm409_vm4 = vcmask 15360  }
  0x22   :  { %78 = vst.msk [vmem:[#allocation2 + $0x61] sm:$0xff] %vm71_vm1, %v69_v2  ;;  %79 = vst.msk [vmem:[#allocation2 + $0x71] sm:$0xff] %vm71_vm1, %v70_v4  ;;  %s6881_s21 = sld [smem:[#allocation4 + $0x3]]  ;;  %vm786_vm5 = vcmask 64560   ;;  %vm9831_vm6 = vcmask 80960   ;;  %vm1036_vm7 = vcmask 97360  }
  0x23   :  { %47 = vst.msk [vmem:[#allocation2] sm:$0x1] %vm46_vm0, %v9834_v3  ;;  %48 = vst.msk [vmem:[#allocation2 + $0x10] sm:$0x1] %vm46_vm0, %v9834_v3  ;;  %s6883_s22 = sld [smem:[#allocation4 + $0x4]]  ;;  %v108_v12 = vstv %s6839_s9  ;;  %vm9829_vm8 = vcmask 113760  }
  0x24   :  { %49 = vst.msk [vmem:[#allocation2 + $0x20] sm:$0x1] %vm46_vm0, %v9834_v3  ;;  %50 = vst.msk [vmem:[#allocation2 + $0x30] sm:$0x1] %vm46_vm0, %v9834_v3  ;;  %s6885_s23 = sld [smem:[#allocation4 + $0x5]]  ;;  %vm1286_vm9 = vcmask 130160  }
  0x25   :  { %55 = vst.msk [vmem:[#allocation2 + $0x9] sm:$0x1] %vm46_vm0, %v9834_v3  ;;  %56 = vst.msk [vmem:[#allocation2 + $0x19] sm:$0x1] %vm46_vm0, %v9834_v3  ;;  %v111_v13 = vstv %s6865_s14  ;;  %s6895_s0 = sld [smem:[#allocation4 + $0x6]]  ;;  %vm1411_vm10 = vcmask 146560  }
  0x26   :  { %57 = vst.msk [vmem:[#allocation2 + $0x29] sm:$0x1] %vm46_vm0, %v9834_v3  ;;  %58 = vst.msk [vmem:[#allocation2 + $0x39] sm:$0x1] %vm46_vm0, %v9834_v3  ;;  %v117_v15 = vstv %s6875_s19  ;;  %s6899_s24 = sld [smem:[#allocation4 + $0x7]]  ;;  %vm9828_vm11 = vcmask 162960  }
  0x27   :  { %72 = vst.msk [vmem:[#allocation2 + $0x1] sm:$0xff] %vm71_vm1, %v63_v5  ;;  %73 = vst.msk [vmem:[#allocation2 + $0x11] sm:$0xff] %vm71_vm1, %v64_v6  ;;  %v123_v18 = vstv %s6879_s20  ;;  %s6905_s25 = sld [smem:[#allocation4 + $0x8]]  ;;  %vm1661_vm12 = vcmask 179360   ;;  %vm1786_vm13 = vcmask 195760   ;;  %vm1911_vm14 = vcmask 212160  }
  0x28   :  { %74 = vst.msk [vmem:[#allocation2 + $0x21] sm:$0xff] %vm71_vm1, %v65_v7  ;;  %75 = vst.msk [vmem:[#allocation2 + $0x31] sm:$0xff] %vm71_vm1, %v66_v8  ;;  %v6887_v9 = vld [vmem:[#allocation2 + $0x40] sm:$0xff]  ;;  %v6901_v16 = vld [vmem:[#allocation2 + $0x50] sm:$0xff]  ;;  %v129_v22 = vstv %s6881_s21  ;;  %s6911_s26 = sld [smem:[#allocation4 + $0x9]]  ;;  %vm2036_vm15 = vcmask 228560  }
  0x29   :  { %v6889_v10 = vld [vmem:[#allocation2 + $0x41] sm:$0xff]  ;;  %v113_v14 = vmul.f32 %v111_v13, %v6887_v9  ;;  %v6907_v19 = vld [vmem:[#allocation2 + $0x51] sm:$0xff]  ;;  %v135_v23 = vstv %s6883_s22  ;;  %s6914_s1 = sld [smem:[#allocation4 + $0xa]]  ;;  %v131_v29 = vmul.f32 %v129_v22, %v6901_v16  ;;  %vm2161_vm0 = vcmask 244960  }
  0x2a   :  { %v6891_v11 = vld [vmem:[#allocation2 + $0x42] sm:$0xff]  ;;  %v119_v17 = vmul.f32 %v117_v15, %v6889_v10  ;;  %v6922_v27 = vld [vmem:[#allocation2 + $0x52] sm:$0xff]  ;;  %v141_v30 = vstv %s6885_s23  ;;  %s6926_s2 = sld [smem:[#allocation4 + $0xb]]  ;;  %v137_v32 = vmul.f32 %v135_v23, %v6907_v19  ;;  %vm2286_vm1 = vcmask 261360  }
  0x2b   :  { %v115_v20 = vadd.f32 %v113_v14, %v108_v12  ;;  %v125_v21 = vmul.f32 %v123_v18, %v6891_v11  ;;  %s6930_s27 = sld [smem:[#allocation7 + $0x1]]  ;;  %v6935_v35 = vld [vmem:[#allocation2 + $0x60] sm:$0xff]  ;;  %v147_v37 = vstv %s6895_s0  ;;  %v143_v40 = vmul.f32 %v141_v30, %v6922_v27  ;;  %v6981_v1 = vld [vmem:[#allocation2 + $0x70] sm:$0xff] }
  0x2c   :  { %s6938_s28 = sld [smem:[#allocation4 + $0xc]]  ;;  %v6946_v42 = vld [vmem:[#allocation2 + $0x61] sm:$0xff]  ;;  %v153_v44 = vstv %s6899_s24  ;;  %v149_v48 = vmul.f32 %v147_v37, %v6935_v35 }
  0x2d   :  { %v121_v28 = vadd.f32 %v119_v17, %v115_v20  ;;  %s6942_s29 = sld [smem:[#allocation4 + $0xd]]  ;;  %v6957_v49 = vld [vmem:[#allocation2 + $0x62] sm:$0xff]  ;;  %v159_v51 = vstv %s6905_s25  ;;  %v155_v54 = vmul.f32 %v153_v44, %v6946_v42 }
  0x2e   :  { %v6916_v24 = vld [vmem:[#allocation2] sm:$0xff]  ;;  %v6932_v33 = vld [vmem:[#allocation2 + $0x10] sm:$0xff]  ;;  %s6949_s30 = sld [smem:[#allocation4 + $0xe]]  ;;  %v161_v60 = vmul.f32 %v159_v51, %v6957_v49  ;;  %v165_v61 = vstv %s6911_s26 }
  0x2f   :  { %v6918_v25 = vld [vmem:[#allocation2 + $0x1] sm:$0xff]  ;;  %v112_v31 = vmul.f32 %v111_v13, %v6916_v24  ;;  %v127_v36 = vadd.f32 %v125_v21, %v121_v28  ;;  %v6944_v41 = vld [vmem:[#allocation2 + $0x11] sm:$0xff]  ;;  %v130_v47 = vmul.f32 %v129_v22, %v6932_v33  ;;  %s6955_s6 = sld [smem:[#allocation4 + $0xf]]  ;;  %v167_v20 = vmul.f32 %v165_v61, %v6981_v1 }
  0x30   :  { %v6920_v26 = vld [vmem:[#allocation2 + $0x2] sm:$0xff]  ;;  %v118_v34 = vmul.f32 %v117_v15, %v6918_v25  ;;  %v6951_v45 = vld [vmem:[#allocation2 + $0x12] sm:$0xff]  ;;  %s6960_s7 = sld [smem:[#allocation4 + $0x10]]  ;;  %v136_v53 = vmul.f32 %v135_v23, %v6944_v41 }
  0x31   :  { %v114_v38 = vadd.f32 %v112_v31, %v108_v12  ;;  %v124_v39 = vmul.f32 %v123_v18, %v6920_v26  ;;  %v133_v43 = vadd.f32 %v131_v29, %v127_v36  ;;  %s6964_s8 = sld [smem:[#allocation4 + $0x11]]  ;;  %v142_v55 = vmul.f32 %v141_v30, %v6951_v45  ;;  %v6979_v0 = vld [vmem:[#allocation2 + $0x20] sm:$0xff]  ;;  %v7000_v29 = vld [vmem:[#allocation2 + $0x71] sm:$0xff] }
  0x32   :  { %v183_v57 = vstv %s6930_s27  ;;  %v186_v58 = vstv %s6938_s28  ;;  %s6969_s9 = sld [smem:[#allocation4 + $0x12]]  ;;  %v148_v18 = vmul.f32 %v147_v37, %v6979_v0  ;;  %v6998_v23 = vld [vmem:[#allocation2 + $0x21] sm:$0xff]  ;;  %v171_v31 = vstv %s6914_s1  ;;  %v7007_v36 = vld [vmem:[#allocation2 + $0x72] sm:$0xff] }
  0x33   :  { %v120_v46 = vadd.f32 %v118_v34, %v114_v38  ;;  %v139_v50 = vadd.f32 %v137_v32, %v133_v43  ;;  %v188_v62 = vmul.f32 %v186_v58, %v6887_v9  ;;  %v192_v63 = vstv %s6942_s29  ;;  %s6977_s10 = sld [smem:[#allocation4 + $0x13]] }
  0x34   :  { %v194_v4 = vmul.f32 %v192_v63, %v6889_v10  ;;  %v198_v5 = vstv %s6949_s30  ;;  %s6985_s11 = sld [smem:[#allocation4 + $0x14]]  ;;  %v187_v13 = vmul.f32 %v186_v58, %v6916_v24  ;;  %v177_v32 = vstv %s6926_s2 }
  0x35   :  { %v126_v52 = vadd.f32 %v124_v39, %v120_v46  ;;  %v145_v56 = vadd.f32 %v143_v40, %v139_v50  ;;  %v190_v7 = vadd.f32 %v188_v62, %v183_v57  ;;  %v200_v8 = vmul.f32 %v198_v5, %v6891_v11  ;;  %s6989_s12 = sld [smem:[#allocation4 + $0x15]]  ;;  %v7034_v62 = vld [vmem:[#allocation2 + $0x31] sm:$0xff] }
  0x36   :  { %v204_v12 = vstv %s6955_s6  ;;  %v210_v15 = vstv %s6960_s7  ;;  %s6996_s13 = sld [smem:[#allocation4 + $0x16]]  ;;  %v189_v28 = vadd.f32 %v187_v13, %v183_v57  ;;  %v193_v40 = vmul.f32 %v192_v63, %v6918_v25 }
  0x37   :  { %v132_v59 = vadd.f32 %v130_v47, %v126_v52  ;;  %v151_v2 = vadd.f32 %v149_v48, %v145_v56  ;;  %v196_v21 = vadd.f32 %v194_v4, %v190_v7  ;;  %v206_v22 = vmul.f32 %v204_v12, %v6901_v16  ;;  %s7005_s14 = sld [smem:[#allocation4 + $0x17]]  ;;  %v7019_v52 = vld [vmem:[#allocation2 + $0x22] sm:$0xff] }
  0x38   :  { %v216_v34 = vstv %s6964_s8  ;;  %v212_v38 = vmul.f32 %v210_v15, %v6907_v19  ;;  %v222_v39 = vstv %s6969_s9  ;;  %s7012_s15 = sld [smem:[#allocation7 + $0x2]]  ;;  %v154_v46 = vmul.f32 %v153_v44, %v6998_v23 }
  0x39   :  { %v138_v6 = vadd.f32 %v136_v53, %v132_v59  ;;  %v157_v14 = vadd.f32 %v155_v54, %v151_v2  ;;  %v202_v37 = vadd.f32 %v200_v8, %v196_v21  ;;  %s7015_s16 = sld [smem:[#allocation4 + $0x18]]  ;;  %v173_v47 = vmul.f32 %v171_v31, %v7000_v29  ;;  %v7021_v53 = vld [vmem:[#allocation2 + $0x30] sm:$0xff] }
  0x3a   :  { %v218_v50 = vmul.f32 %v216_v34, %v6922_v27  ;;  %v195_v54 = vadd.f32 %v193_v40, %v189_v28  ;;  %s7023_s17 = sld [smem:[#allocation4 + $0x19]]  ;;  %v179_v44 = vmul.f32 %v177_v32, %v7007_v36  ;;  %v224_v56 = vmul.f32 %v222_v39, %v6935_v35 }
  0x3b   :  { %v144_v17 = vadd.f32 %v142_v55, %v138_v6  ;;  %v163_v30 = vadd.f32 %v161_v60, %v157_v14  ;;  %v208_v48 = vadd.f32 %v206_v22, %v202_v37  ;;  %v228_v57 = vstv %s6977_s10  ;;  %s7030_s18 = sld [smem:[#allocation4 + $0x1a]] }
  0x3c   :  { %v234_v59 = vstv %s6985_s11  ;;  %v240_v60 = vstv %s6989_s12  ;;  %v199_v63 = vmul.f32 %v198_v5, %v6920_v26  ;;  %s7037_s19 = sld [smem:[#allocation4 + $0x1b]]  ;;  %v160_v4 = vmul.f32 %v159_v51, %v7019_v52 }
  0x3d   :  { %v150_v43 = vadd.f32 %v148_v18, %v144_v17  ;;  %v169_v55 = vadd.f32 %v167_v20, %v163_v30  ;;  %v214_v58 = vadd.f32 %v212_v38, %v208_v48  ;;  %v166_v6 = vmul.f32 %v165_v61, %v7021_v53  ;;  %s7046_s20 = sld [smem:[#allocation4 + $0x1c]] }
  0x3e   :  { %v205_v7 = vmul.f32 %v204_v12, %v6932_v33  ;;  %v230_v13 = vmul.f32 %v228_v57, %v6946_v42  ;;  %v201_v14 = vadd.f32 %v199_v63, %v195_v54  ;;  %v211_v17 = vmul.f32 %v210_v15, %v6944_v41  ;;  %s7081_s21 = sld [smem:[#allocation4 + $0x1d]] }
  0x3f   :  { %v156_v2 = vadd.f32 %v154_v46, %v150_v43  ;;  %v220_v8 = vadd.f32 %v218_v50, %v214_v58  ;;  %v175_v5 = vadd.f32 %v173_v47, %v169_v55  ;;  %v236_v18 = vmul.f32 %v234_v59, %v6957_v49  ;;  %s7084_s22 = sld [smem:[#allocation4 + $0x1e]] }
  0x40   :  { %v242_v51 = vmul.f32 %v240_v60, %v6981_v1  ;;  %v172_v61 = vmul.f32 %v171_v31, %v7034_v62  ;;  %v246_v20 = vstv %s6996_s13  ;;  %v207_v21 = vadd.f32 %v205_v7, %v201_v14  ;;  %v7074_v7 = vld [vmem:[#allocation2 + $0x32] sm:$0xff]  ;;  %s7092_s23 = sld [smem:[#allocation4 + $0x1f]] }
  0x41   :  { %v226_v12 = vadd.f32 %v224_v56, %v220_v8  ;;  %v217_v22 = vmul.f32 %v216_v34, %v6951_v45  ;;  %v252_v15 = vstv %s7005_s14  ;;  %v162_v28 = vadd.f32 %v160_v4, %v156_v2  ;;  %s7095_s0 = sld [smem:[#allocation4 + $0x20]] }
  0x42   :  { %v223_v30 = vmul.f32 %v222_v39, %v6979_v0  ;;  %v258_v37 = vstv %s7012_s15  ;;  %v213_v40 = vadd.f32 %v211_v17, %v207_v21  ;;  %v261_v43 = vstv %s7015_s16  ;;  %s7097_s24 = sld [smem:[#allocation4 + $0x24]] }
  0x43   :  { %v232_v38 = vadd.f32 %v230_v13, %v226_v12  ;;  %v267_v46 = vstv %s7023_s17  ;;  %v248_v31 = vmul.f32 %v246_v20, %v7000_v29  ;;  %v263_v47 = vmul.f32 %v261_v43, %v6887_v9  ;;  %s7102_s25 = sld [smem:[#allocation4 + $0x21]] }
  0x44   :  { %v269_v34 = vmul.f32 %v267_v46, %v6889_v10  ;;  %v273_v48 = vstv %s7030_s18  ;;  %v219_v39 = vadd.f32 %v217_v22, %v213_v40  ;;  %v229_v54 = vmul.f32 %v228_v57, %v6998_v23  ;;  %s7104_s26 = sld [smem:[#allocation4 + $0x25]] }
  0x45   :  { %v238_v50 = vadd.f32 %v236_v18, %v232_v38  ;;  %v279_v55 = vstv %s7037_s19  ;;  %v254_v56 = vmul.f32 %v252_v15, %v7007_v36  ;;  %v168_v58 = vadd.f32 %v166_v6, %v162_v28  ;;  %s7108_s1 = sld [smem:[#allocation7 + $0x3]] }
  0x46   :  { %v265_v63 = vadd.f32 %v263_v47, %v258_v37  ;;  %v275_v2 = vmul.f32 %v273_v48, %v6891_v11  ;;  %v225_v8 = vadd.f32 %v223_v30, %v219_v39  ;;  %v235_v13 = vmul.f32 %v234_v59, %v7019_v52  ;;  %s7110_s2 = sld [smem:[#allocation4 + $0x26]] }
  0x47   :  { %v244_v4 = vadd.f32 %v242_v51, %v238_v50  ;;  %v285_v14 = vstv %s7046_s20  ;;  %v281_v57 = vmul.f32 %v279_v55, %v6901_v16  ;;  %v181_v6 = vadd.f32 %v179_v44, %v175_v5  ;;  %s7114_s27 = sld [smem:[#allocation4 + $0x22]] }
  0x48   :  { %v271_v17 = vadd.f32 %v269_v34, %v265_v63  ;;  %v231_v12 = vadd.f32 %v229_v54, %v225_v8  ;;  %v241_v21 = vmul.f32 %v240_v60, %v7021_v53  ;;  %v178_v51 = vmul.f32 %v177_v32, %v7074_v7  ;;  %s7116_s28 = sld [smem:[#allocation4 + $0x23]] }
  0x49   :  { %v250_v18 = vadd.f32 %v248_v31, %v244_v4  ;;  %v287_v59 = vmul.f32 %v285_v14, %v6907_v19  ;;  %v174_v30 = vadd.f32 %v172_v61, %v168_v58  ;;  %v247_v44 = vmul.f32 %v246_v20, %v7034_v62  ;;  %s7121_s29 = sld [smem:[#allocation4 + $0x27]] }
  0x4a   :  { %v277_v22 = vadd.f32 %v275_v2, %v271_v17  ;;  %v237_v38 = vadd.f32 %v235_v13, %v231_v12  ;;  %v253_v40 = vmul.f32 %v252_v15, %v7074_v7  ;;  %v291_v39 = vstv %s7081_s21  ;;  %s7124_s30 = sld [smem:[#allocation4 + $0x28]] }
  0x4b   :  { %v256_v28 = vadd.f32 %v254_v56, %v250_v18  ;;  %v180_v20 = vadd.f32 %v178_v51, %v174_v30  ;;  %v336_v54 = vstv %s7097_s24  ;;  %v293_v63 = vmul.f32 %v291_v39, %v6922_v27  ;;  %s7135_s6 = sld [smem:[#allocation4 + $0x29]] }
  0x4c   :  { %v283_v60 = vadd.f32 %v281_v57, %v277_v22  ;;  %v243_v32 = vadd.f32 %v241_v21, %v237_v38  ;;  %v297_v2 = vstv %s7084_s22  ;;  %v342_v4 = vstv %s7104_s26  ;;  %s7144_s7 = sld [smem:[#allocation4 + $0x2a]] }
  0x4d   :  { %v7099_v5 = vmax.f32 %v181_v6, %v256_v28  ;;  %v303_v13 = vstv %s7092_s23  ;;  %v309_v17 = vstv %s7095_s0  ;;  %v338_v57 = vmul.f32 %v336_v54, %v6887_v9  ;;  %s7163_s8 = sld [smem:[#allocation4 + $0x2b]] }
  0x4e   :  { %v289_v31 = vadd.f32 %v287_v59, %v283_v60  ;;  %v249_v47 = vadd.f32 %v247_v44, %v243_v32  ;;  %v333_v6 = vstv %s7108_s1  ;;  %v348_v18 = vstv %s7110_s2  ;;  %s7172_s9 = sld [smem:[#allocation4 + $0x2c]] }
  0x4f   :  { %v540_v61 = vsel %vm9830_vm2, %v7099_v5, -inf  ;;  %v665_v15 = vsel %vm661_vm3, %v7099_v5, -inf  ;;  %v790_v58 = vsel %vm786_vm5, %v7099_v5, -inf  ;;  %v413_v8 = vsel %vm409_vm4, %v7099_v5, -inf  ;;  %s7189_s10 = sld [smem:[#allocation4 + $0x2d]] }
  0x50   :  { %541 = vmax.xlane.f32.xlu1 %v540_v61  ;;  %v255_v34 = vadd.f32 %v253_v40, %v249_v47  ;;  %v915_v12 = vsel %vm9831_vm6, %v7099_v5, -inf  ;;  %v299_v21 = vmul.f32 %v297_v2, %v6935_v35  ;;  %v344_v9 = vmul.f32 %v342_v4, %v6889_v10  ;;  %s7206_s11 = sld [smem:[#allocation4 + $0x2e]] }
  0x51   :  { %v305_v51 = vmul.f32 %v303_v13, %v6946_v42  ;;  %v311_v22 = vmul.f32 %v309_v17, %v6957_v49  ;;  %v315_v59 = vstv %s7102_s25  ;;  %v295_v30 = vadd.f32 %v293_v63, %v289_v31  ;;  %s7217_s12 = sld [smem:[#allocation4 + $0x2f]]  ;;  %s6771_s25 = smov [#allocation9]  }
  0x52   :  { %v7118_v50 = vmax.f32 %v180_v20, %v255_v34  ;;  %v340_v10 = vadd.f32 %v338_v57, %v333_v6  ;;  %v350_v38 = vmul.f32 %v348_v18, %v6891_v11  ;;  %v321_v44 = vstv %s7114_s27  ;;  %s6549_s26 = sshll.u32 %s6771_s25, 4  ;;  %s6550_s26 = int_to_ptr.vmem [resolvable:$true] %s6549_s26 }
  0x53   :  { %v327_v60 = vstv %s7116_s28  ;;  %v354_v32 = vstv %s7121_s29  ;;  %v360_v40 = vstv %s7124_s30  ;;  %v1040_v61 = vsel %vm1036_vm7, %v7099_v5, -inf  ;;  %s6735_s1 = scalar_lea.vmem %s6550_s26, 32  ;;  %p6740_p11 = scmp.lt.s32.totalorder %s6550_s26, %s6550_s26 }
  0x54   :  { %666 = vmax.xlane.f32.xlu1 %v665_v15  ;;  %v410_v56 = vsel %vm409_vm4, %v7118_v50, -inf  ;;  %v537_v28 = vsel %vm9830_vm2, %v7118_v50, -inf  ;;  %v301_v31 = vadd.f32 %v299_v21, %v295_v30  ;;  %v346_v20 = vadd.f32 %v344_v9, %v340_v10  ;;  %p6736_p10 = scmp.ne.s32.totalorder %s6550_s26, %s6735_s1  ;;  %p6741_p12 = scmp.lt.s32.totalorder %s6735_s1, %s6735_s1 }
  0x55   :  { %411 = vmax.xlane.f32.xlu0 %v410_v56  ;;  %v356_v11 = vmul.f32 %v354_v32, %v6901_v16  ;;  %v662_v47 = vsel %vm661_vm3, %v7118_v50, -inf  ;;  %v317_v34 = vmul.f32 %v315_v59, %v6981_v1  ;;  %v366_v15 = vstv %s7135_s6 }
  0x56   :  { %v262_v56 = vmul.f32 %v261_v43, %v6916_v24  ;;  %v352_v63 = vadd.f32 %v350_v38, %v346_v20  ;;  %v362_v16 = vmul.f32 %v360_v40, %v6907_v19  ;;  %v1165_v57 = vsel %vm9829_vm8, %v7099_v5, -inf  ;;  %p6742_p13 = por %p6741_p12, %p6740_p11 }
  0x57   :  { %v329_v43 = vmul.f32 %v327_v60, %v7007_v36  ;;  %v787_v19 = vsel %vm786_vm5, %v7118_v50, -inf  ;;  %v378_v30 = vstv %s7163_s8  ;;  %v268_v38 = vmul.f32 %v267_v46, %v6918_v25 }
  0x58   :  { %791 = vmax.xlane.f32.xlu1 %v790_v58  ;;  %v307_v58 = vadd.f32 %v305_v51, %v301_v31  ;;  %v358_v9 = vadd.f32 %v356_v11, %v352_v63  ;;  %v368_v51 = vmul.f32 %v366_v15, %v6922_v27  ;;  %v264_v10 = vadd.f32 %v262_v56, %v258_v37  ;;  %p6743_p0 = pnand %p6742_p13, %p6736_p10 }
  0x59   :  { %414 = vmax.xlane.f32.xlu0 %v413_v8  ;;  %v372_v8 = vstv %s7144_s7  ;;  %v384_v31 = vstv %s7172_s9  ;;  %v274_v27 = vmul.f32 %v273_v48, %v6920_v26  ;;  %v280_v46 = vmul.f32 %v279_v55, %v6932_v33 }
  0x5a   :  { %v313_v21 = vadd.f32 %v311_v22, %v307_v58  ;;  %v270_v37 = vadd.f32 %v268_v38, %v264_v10  ;;  %v912_v20 = vsel %vm9831_vm6, %v7118_v50, -inf  ;;  %v380_v48 = vmul.f32 %v378_v30, %v6946_v42 }
  0x5b   :  { %v390_v56 = vstv %s7189_s10  ;;  %v286_v58 = vmul.f32 %v285_v14, %v6944_v41  ;;  %v343_v42 = vmul.f32 %v342_v4, %v6918_v25  ;;  %v292_v14 = vmul.f32 %v291_v39, %v6951_v45 }
  0x5c   :  { %916 = vmax.xlane.f32.xlu1 %v915_v12  ;;  %v323_v12 = vmul.f32 %v321_v44, %v7000_v29  ;;  %v319_v22 = vadd.f32 %v317_v34, %v313_v21  ;;  %v386_v34 = vmul.f32 %v384_v31, %v6957_v49  ;;  %v276_v55 = vadd.f32 %v274_v27, %v270_v37 }
  0x5d   :  { %538 = vmax.xlane.f32.xlu0 %v537_v28  ;;  %v374_v28 = vmul.f32 %v372_v8, %v6935_v35  ;;  %v1290_v35 = vsel %vm1286_vm9, %v7099_v5, -inf  ;;  %v1415_v49 = vsel %vm1411_vm10, %v7099_v5, -inf  ;;  %v349_v25 = vmul.f32 %v348_v18, %v6920_v26 }
  0x5e   :  { %v325_v11 = vadd.f32 %v323_v12, %v319_v22  ;;  %v396_v12 = vstv %s7206_s11  ;;  %v402_v4 = vstv %s7217_s12  ;;  %v298_v39 = vmul.f32 %v297_v2, %v6979_v0 }
  0x5f   :  { %v1540_v26 = vsel %vm9828_vm11, %v7099_v5, -inf  ;;  %v304_v10 = vmul.f32 %v303_v13, %v6998_v23  ;;  %v404_v2 = vmul.f32 %v402_v4, %v7007_v36  ;;  %v367_v36 = vmul.f32 %v366_v15, %v6951_v45 }
  0x60   :  { %1041 = vmax.xlane.f32.xlu1 %v1040_v61  ;;  %v364_v61 = vadd.f32 %v362_v16, %v358_v9  ;;  %v331_v63 = vadd.f32 %v329_v43, %v325_v11  ;;  %v392_v43 = vmul.f32 %v390_v56, %v6981_v1  ;;  %v398_v1 = vmul.f32 %v396_v12, %v7000_v29 }
  0x61   :  { %663 = vmax.xlane.f32.xlu0 %v662_v47  ;;  %v361_v29 = vmul.f32 %v360_v40, %v6944_v41  ;;  %v1790_v41 = vsel %vm1786_vm13, %v7099_v5, -inf  ;;  %v316_v40 = vmul.f32 %v315_v59, %v7021_v53  ;;  %v1915_v37 = vsel %vm1911_vm14, %v7099_v5, -inf }
  0x62   :  { %v370_v47 = vadd.f32 %v368_v51, %v364_v61  ;;  %v1162_v61 = vsel %vm9829_vm8, %v7118_v50, -inf  ;;  %vm2411_vm11 = vcmask 277760   ;;  %vm9833_vm8 = vcmask 294160  }
  0x63   :  { %v1412_v59 = vsel %vm1411_vm10, %v7118_v50, -inf }
  0x64   :  { %1166 = vmax.xlane.f32.xlu1 %v1165_v57  ;;  %v376_v16 = vadd.f32 %v374_v28, %v370_v47  ;;  %v337_v57 = vmul.f32 %v336_v54, %v6916_v24  ;;  %v1037_v54 = vsel %vm1036_vm7, %v7118_v50, -inf  ;;  %v322_v47 = vmul.f32 %v321_v44, %v7034_v62 }
  0x65   :  { %788 = vmax.xlane.f32.xlu0 %v787_v19  ;;  %v282_v19 = vadd.f32 %v280_v46, %v276_v55  ;;  %v373_v46 = vmul.f32 %v372_v8, %v6979_v0  ;;  %v379_v0 = vmul.f32 %v378_v30, %v6998_v23 }
  0x66   :  { %v382_v21 = vadd.f32 %v380_v48, %v376_v16  ;;  %v339_v24 = vadd.f32 %v337_v57, %v333_v6  ;;  %v355_v6 = vmul.f32 %v354_v32, %v6932_v33  ;;  %v310_v32 = vmul.f32 %v309_v17, %v7019_v52 }
  0x67   :  { %v288_v9 = vadd.f32 %v286_v58, %v282_v19  ;;  %v385_v58 = vmul.f32 %v384_v31, %v7019_v52  ;;  %v391_v16 = vmul.f32 %v390_v56, %v7021_v53  ;;  %v397_v57 = vmul.f32 %v396_v12, %v7034_v62 }
  0x68   :  { %1291 = vmax.xlane.f32.xlu1 %v1290_v35  ;;  %v388_v51 = vadd.f32 %v386_v34, %v382_v21  ;;  %v345_v28 = vadd.f32 %v343_v42, %v339_v24  ;;  %v1665_v35 = vsel %vm1661_vm12, %v7099_v5, -inf  ;;  %v328_v34 = vmul.f32 %v327_v60, %v7074_v7 }
  0x69   :  { %913 = vmax.xlane.f32.xlu0 %v912_v20  ;;  %v294_v18 = vadd.f32 %v292_v14, %v288_v9  ;;  %v1287_v20 = vsel %vm1286_vm9, %v7118_v50, -inf }
  0x6a   :  { %v394_v38 = vadd.f32 %v392_v43, %v388_v51  ;;  %v351_v22 = vadd.f32 %v349_v25, %v345_v28 }
  0x6b   :  { %v300_v33 = vadd.f32 %v298_v39, %v294_v18 }
  0x6c   :  { %1416 = vmax.xlane.f32.xlu1 %v1415_v49  ;;  %v400_v27 = vadd.f32 %v398_v1, %v394_v38  ;;  %v357_v13 = vadd.f32 %v355_v6, %v351_v22  ;;  %v403_v6 = vmul.f32 %v402_v4, %v7074_v7  ;;  %v2165_v22 = vsel %vm2161_vm0, %v7099_v5, -inf }
  0x6d   :  { %1038 = vmax.xlane.f32.xlu0 %v1037_v54  ;;  %v306_v17 = vadd.f32 %v304_v10, %v300_v33  ;;  %v1662_v10 = vsel %vm1661_vm12, %v7118_v50, -inf  ;;  %v1787_v4 = vsel %vm1786_vm13, %v7118_v50, -inf }
  0x6e   :  { %v406_v45 = vadd.f32 %v404_v2, %v400_v27  ;;  %v363_v15 = vadd.f32 %v361_v29, %v357_v13  ;;  %v2290_v29 = vsel %vm2286_vm1, %v7099_v5, -inf }
  0x6f   :  { %v312_v11 = vadd.f32 %v310_v32, %v306_v17 }
  0x70   :  { %1541 = vmax.xlane.f32.xlu1 %v1540_v26  ;;  %v7313_v48 = vmax.f32 %v331_v63, %v406_v45  ;;  %v369_v55 = vadd.f32 %v367_v36, %v363_v15  ;;  %v2040_v26 = vsel %vm2036_vm15, %v7099_v5, -inf }
  0x71   :  { %1163 = vmax.xlane.f32.xlu0 %v1162_v61  ;;  %v318_v8 = vadd.f32 %v316_v40, %v312_v11  ;;  %v1912_v11 = vsel %vm1911_vm14, %v7118_v50, -inf }
  0x72   :  { %v7330_v44 = vsel %vm409_vm4, %v7313_v48, -inf  ;;  %v7334_v60 = vsel %vm9830_vm2, %v7313_v48, -inf  ;;  %v7338_v23 = vsel %vm661_vm3, %v7313_v48, -inf  ;;  %v375_v30 = vadd.f32 %v373_v46, %v369_v55 }
  0x73   :  { %v324_v52 = vadd.f32 %v322_v47, %v318_v8  ;;  %v7342_v53 = vsel %vm786_vm5, %v7313_v48, -inf  ;;  %v7346_v62 = vsel %vm9831_vm6, %v7313_v48, -inf  ;;  %v7350_v31 = vsel %vm1036_vm7, %v7313_v48, -inf }
  0x74   :  { %1666 = vmax.xlane.f32.xlu1 %v1665_v35  ;;  %v381_v56 = vadd.f32 %v379_v0, %v375_v30  ;;  %vm9844_vm2 = vcmask 113760   ;;  %v7358_v42 = vsel %vm1286_vm9, %v7313_v48, -inf  ;;  %v7362_v49 = vsel %vm1411_vm10, %v7313_v48, -inf }
  0x75   :  { %1288 = vmax.xlane.f32.xlu0 %v1287_v20  ;;  %v7354_v63 = vsel %vm9844_vm2, %v7313_v48, -inf  ;;  %v330_v12 = vadd.f32 %v328_v34, %v324_v52  ;;  %vm9845_vm6 = vcmask 162960   ;;  %v7370_v14 = vsel %vm1661_vm12, %v7313_v48, -inf }
  0x76   :  { %v7366_v19 = vsel %vm9845_vm6, %v7313_v48, -inf  ;;  %v7374_v21 = vsel %vm1786_vm13, %v7313_v48, -inf  ;;  %v387_v43 = vadd.f32 %v385_v58, %v381_v56  ;;  %v7378_v24 = vsel %vm1911_vm14, %v7313_v48, -inf  ;;  %vm9846_vm2 = vmmov %vm9845_vm6 }
  0x77   :  { %v7382_v25 = vsel %vm2036_vm15, %v7313_v48, -inf  ;;  %v7386_v54 = vsel %vm2161_vm0, %v7313_v48, -inf  ;;  %v7390_v9 = vsel %vm2286_vm1, %v7313_v48, -inf  ;;  %v7394_v39 = vsel %vm2411_vm11, %v7313_v48, -inf }
  0x78   :  { %1791 = vmax.xlane.f32.xlu1 %v1790_v41  ;;  %v7398_v51 = vsel %vm9833_vm8, %v7313_v48, -inf  ;;  %v1537_v1 = vsel %vm9846_vm2, %v7118_v50, -inf  ;;  %v393_v28 = vadd.f32 %v391_v16, %v387_v43  ;;  %vm9832_vm6 = vcmask 310560  }
  0x79   :  { %1413 = vmax.xlane.f32.xlu0 %v1412_v59  ;;  %v7411_v2 = vsel %vm9832_vm6, %v7313_v48, -inf  ;;  %vm2780_vm2 = vcmask 326960   ;;  %vm9847_vm6 = vcmask 31760   ;;  %vm9848_vm8 = vcmask 80960  }
  0x7a   :  { %v399_v18 = vadd.f32 %v397_v57, %v393_v28  ;;  %v7505_v8 = vsel %vm2780_vm2, %v7313_v48, -inf  ;;  %v2415_v58 = vsel %vm2411_vm11, %v7099_v5, -inf  ;;  %v2037_v16 = vsel %vm2036_vm15, %v7118_v50, -inf }
  0x7b   :  { %v2162_v52 = vsel %vm2161_vm0, %v7118_v50, -inf  ;;  %v2287_v43 = vsel %vm2286_vm1, %v7118_v50, -inf  ;;  %v6764_v28 = vmov 0  }
  0x7c   :  { %1916 = vmax.xlane.f32.xlu1 %v1915_v37  ;;  %v405_v38 = vadd.f32 %v403_v6, %v399_v18  ;;  %6708 = vset.pattern.permute.xlu0 %v6764_v28  ;;  %v2784_v6 = vsel %vm2780_vm2, %v7099_v5, -inf }
  0x7d   :  { %1538 = vmax.xlane.f32.xlu0 %v1537_v1  ;;  %6709 = vset.pattern.permute.xlu1 %v6764_v28 }
  0x7e   :  { %v7415_v7 = vmax.f32 %v330_v12, %v405_v38 }
  0x80   :  { %2041 = vmax.xlane.f32.xlu1 %v2040_v26  ;;  %v7423_v33 = vsel %vm409_vm4, %v7415_v7, -inf  ;;  %v7427_v32 = vsel %vm9847_vm6, %v7415_v7, -inf  ;;  %v7431_v61 = vsel %vm661_vm3, %v7415_v7, -inf  ;;  %v7435_v27 = vsel %vm786_vm5, %v7415_v7, -inf }
  0x81   :  { %1663 = vmax.xlane.f32.xlu0 %v1662_v10  ;;  %v7439_v13 = vsel %vm9848_vm8, %v7415_v7, -inf  ;;  %v7443_v36 = vsel %vm1036_vm7, %v7415_v7, -inf  ;;  %vm9849_vm4 = vcmask 113760   ;;  %v7451_v41 = vsel %vm1286_vm9, %v7415_v7, -inf }
  0x82   :  { %v7447_v35 = vsel %vm9849_vm4, %v7415_v7, -inf  ;;  %v7455_v17 = vsel %vm1411_vm10, %v7415_v7, -inf  ;;  %vm9850_vm3 = vcmask 162960   ;;  %v7463_v37 = vsel %vm1661_vm12, %v7415_v7, -inf }
  0x83   :  { %v7459_v40 = vsel %vm9850_vm3, %v7415_v7, -inf  ;;  %v7467_v45 = vsel %vm1786_vm13, %v7415_v7, -inf  ;;  %v7471_v15 = vsel %vm1911_vm14, %v7415_v7, -inf  ;;  %v7475_v46 = vsel %vm2036_vm15, %v7415_v7, -inf }
  0x84   :  { %2166 = vmax.xlane.f32.xlu1 %v2165_v22  ;;  %v7479_v20 = vsel %vm2411_vm11, %v7415_v7, -inf  ;;  %v7483_v59 = vsel %vm2161_vm0, %v7415_v7, -inf  ;;  %v7489_v47 = vsel %vm2286_vm1, %v7415_v7, -inf  ;;  %vm9851_vm5 = vcmask 294160  }
  0x85   :  { %1788 = vmax.xlane.f32.xlu0 %v1787_v4  ;;  %v7493_v34 = vsel %vm9851_vm5, %v7415_v7, -inf  ;;  %vm9852_vm7 = vcmask 310560   ;;  %v7501_v0 = vsel %vm2780_vm2, %v7415_v7, -inf  ;;  %vm2903_vm8 = vcmask 343360   ;;  %vm9853_vm9 = vmmov %vm9851_vm5 }
  0x86   :  { %v7497_v55 = vsel %vm9852_vm7, %v7415_v7, -inf  ;;  %v7513_v57 = vsel %vm2903_vm8, %v7415_v7, -inf  ;;  %v2538_v30 = vsel %vm9853_vm9, %v7099_v5, -inf  ;;  %v7521_v56 = vsel %vm2903_vm8, %v7313_v48, -inf  ;;  %vm9854_vm10 = vmmov %vm9852_vm7 }
  0x87   :  { %v2661_v12 = vsel %vm9854_vm10, %v7099_v5, -inf  ;;  %vm3026_vm12 = vcmask 359760   ;;  %v2412_v26 = vsel %vm2411_vm11, %v7118_v50, -inf  ;;  %v2907_v10 = vsel %vm2903_vm8, %v7099_v5, -inf  ;;  %vm9855_vm13 = vmmov %vm9851_vm5 }
  0x88   :  { %2291 = vmax.xlane.f32.xlu1 %v2290_v29  ;;  %v7529_v1 = vsel %vm3026_vm12, %v7415_v7, -inf  ;;  %v7537_v18 = vsel %vm3026_vm12, %v7313_v48, -inf  ;;  %v2535_v38 = vsel %vm9855_vm13, %v7118_v50, -inf  ;;  %v3030_v22 = vsel %vm3026_vm12, %v7099_v5, -inf  ;;  %vm9856_vm11 = vmmov %vm9852_vm7 }
  0x89   :  { %1913 = vmax.xlane.f32.xlu0 %v1912_v11  ;;  %vm3149_vm14 = vcmask 376160   ;;  %v2658_v4 = vsel %vm9856_vm11, %v7118_v50, -inf  ;;  %vm3272_vm15 = vcmask 392560   ;;  %v2781_v11 = vsel %vm2780_vm2, %v7118_v50, -inf }
  0x8a   :  { %v3153_v29 = vsel %vm3149_vm14, %v7099_v5, -inf  ;;  %vm524_vm0 = vcmask 1041409   ;;  %vm534_vm1 = vcmask 58368   ;;  %vm659_vm6 = vcmask 123968  }
  0x8b   :  { %vm784_vm2 = vcmask 189568   ;;  %vm9843_vm4 = vcmask 255168   ;;  %vm1034_vm3 = vcmask 320768   ;;  %vm1159_vm5 = vcmask 386368  }
  0x8c   :  { %2416 = vmax.xlane.f32.xlu1 %v2415_v58  ;;  %v3276_v58 = vsel %vm3272_vm15, %v7099_v5, -inf  ;;  %v3273_v5 = vsel %vm3272_vm15, %v7118_v50, -inf  ;;  %vm1284_vm7 = vcmask 451968   ;;  %vm1534_vm9 = vcmask 583168  }
  0x8d   :  { %2038 = vmax.xlane.f32.xlu0 %v2037_v16  ;;  %v2904_v16 = vsel %vm2903_vm8, %v7118_v50, -inf  ;;  %vm1409_vm8 = vcmask 517568   ;;  %vm1659_vm10 = vcmask 648768   ;;  %vm1909_vm13 = vcmask 779968  }
  0x8e   :  { %vm9842_vm11 = vcmask 911168  }
  0x90   :  { %2539 = vmax.xlane.f32.xlu1 %v2538_v30  ;;  %v3027_v30 = vsel %vm3026_vm12, %v7118_v50, -inf  ;;  %vm1784_vm12 = vcmask 714368  }
  0x91   :  { %2163 = vmax.xlane.f32.xlu0 %v2162_v52  ;;  %v3150_v52 = vsel %vm3149_vm14, %v7118_v50, -inf }
  0x94   :  { %2662 = vmax.xlane.f32.xlu1 %v2661_v12 }
  0x95   :  { %2288 = vmax.xlane.f32.xlu0 %v2287_v43 }
  0x98   :  { %2785 = vmax.xlane.f32.xlu1 %v2784_v6 }
  0x99   :  { %2413 = vmax.xlane.f32.xlu0 %v2412_v26 }
  0x9c   :  { %2908 = vmax.xlane.f32.xlu1 %v2907_v10 }
  0x9d   :  { %2536 = vmax.xlane.f32.xlu0 %v2535_v38 }
  0xa0   :  { %3031 = vmax.xlane.f32.xlu1 %v3030_v22 }
  0xa1   :  { %2659 = vmax.xlane.f32.xlu0 %v2658_v4 }
  0xa4   :  { %3154 = vmax.xlane.f32.xlu1 %v3153_v29 }
  0xa5   :  { %2782 = vmax.xlane.f32.xlu0 %v2781_v11 }
  0xa8   :  { %3277 = vmax.xlane.f32.xlu1 %v3276_v58 }
  0xa9   :  { %2905 = vmax.xlane.f32.xlu0 %v2904_v16 }
  0xac   :  { %3401 = vmax.xlane.f32.xlu1 %v7330_v44 }
  0xad   :  { %3028 = vmax.xlane.f32.xlu0 %v3027_v30 }
  0xb0   :  { %3523 = vmax.xlane.f32.xlu1 %v7334_v60 }
  0xb1   :  { %3151 = vmax.xlane.f32.xlu0 %v3150_v52 }
  0xb4   :  { %3645 = vmax.xlane.f32.xlu1 %v7338_v23  ;;  %v6765_v23 = vmov 269488144  }
  0xb5   :  { %3274 = vmax.xlane.f32.xlu0 %v3273_v5 }
  0xb8   :  { %3767 = vmax.xlane.f32.xlu1 %v7342_v53  ;;  %v419_v53 = vunpack.c.l.s4 %v6765_v23 }
  0xb9   :  { %3398 = vmax.xlane.f32.xlu0 %v7423_v33 }
  0xba   :  { %v420_v33 = vunpack.c.0.s8 %v419_v53 }
  0xbc   :  { %3889 = vmax.xlane.f32.xlu1 %v7346_v62  ;;  %v9836_v62 = vlaneseq }
  0xbd   :  { %3520 = vmax.xlane.f32.xlu0 %v7427_v32 }
  0xc0   :  { %4011 = vmax.xlane.f32.xlu1 %v7350_v31 }
  0xc1   :  { %3642 = vmax.xlane.f32.xlu0 %v7431_v61 }
  0xc4   :  { %4133 = vmax.xlane.f32.xlu1 %v7354_v63  ;;  %v6766_v63 = vmov 842150450  }
  0xc5   :  { %3764 = vmax.xlane.f32.xlu0 %v7435_v27 }
  0xc8   :  { %4255 = vmax.xlane.f32.xlu1 %v7358_v42  ;;  %v426_v42 = vunpack.c.l.s4 %v6766_v63 }
  0xc9   :  { %3886 = vmax.xlane.f32.xlu0 %v7439_v13 }
  0xca   :  { %v427_v61 = vunpack.c.0.s8 %v426_v42 }
  0xcc   :  { %4377 = vmax.xlane.f32.xlu1 %v7362_v49  ;;  %v6767_v49 = vmov 1414812756  }
  0xcd   :  { %4008 = vmax.xlane.f32.xlu0 %v7443_v36 }
  0xd0   :  { %4499 = vmax.xlane.f32.xlu1 %v7366_v19  ;;  %v433_v19 = vunpack.c.l.s4 %v6767_v49 }
  0xd1   :  { %4130 = vmax.xlane.f32.xlu0 %v7447_v35 }
  0xd2   :  { %v434_v27 = vunpack.c.0.s8 %v433_v19 }
  0xd4   :  { %4621 = vmax.xlane.f32.xlu1 %v7370_v14  ;;  %v6768_v14 = vmov 1987475062  }
  0xd5   :  { %4252 = vmax.xlane.f32.xlu0 %v7451_v41  ;;  %v6769_v41 = vmov 1983009808  }
  0xd8   :  { %4743 = vmax.xlane.f32.xlu1 %v7374_v21  ;;  %v440_v21 = vunpack.c.l.s4 %v6768_v14 }
  0xd9   :  { %v542_v50 = vpop.xlane.xlu1 %541  ;;  %4374 = vmax.xlane.f32.xlu0 %v7455_v17  ;;  %v477_v17 = vunpack.c.l.s4 %v6769_v41 }
  0xda   :  { %v441_v13 = vunpack.c.0.s8 %v440_v21 }
  0xdb   :  { %v478_v43 = vunpack.c.0.s8 %v477_v17  ;;  %v6081_v17 = vsel %vm3149_vm14, %v7415_v7, -inf }
  0xdc   :  { %4865 = vmax.xlane.f32.xlu1 %v7378_v24 }
  0xdd   :  { %v7583_v44 = vpop.xlane.xlu1 %666  ;;  %4496 = vmax.xlane.f32.xlu0 %v7459_v40 }
  0xde   :  { %v7586_v60 = vpop.xlane.xlu0 %411 }
  0xe0   :  { %4987 = vmax.xlane.f32.xlu1 %v7382_v25  ;;  %v7596_v25 = vshrl.u32 %v9836_v62, 7 }
  0xe1   :  { %v7589_v31 = vpop.xlane.xlu1 %791  ;;  %4618 = vmax.xlane.f32.xlu0 %v7463_v37 }
  0xe2   :  { %v7592_v24 = vpop.xlane.xlu0 %414  ;;  %9857 = vst [vmem:[#allocation13_spill] sm:$0xff] %v7596_v25  ;;  %v7610_v40 = vsub.s32 %v427_v61, %v7596_v25  ;;  %v7613_v37 = vsub.s32 %v434_v27, %v7596_v25  ;;  %v7616_v12 = vsub.s32 %v441_v13, %v7596_v25 }
  0xe4   :  { %5109 = vmax.xlane.f32.xlu1 %v7386_v54  ;;  %v7607_v54 = vsub.s32 %v420_v33, %v7596_v25  ;;  %v586_v6 = vrot.slane %v542_v50, %v7610_v40  ;;  %v593_v26 = vrot.slane %v542_v50, %v7613_v37  ;;  %v600_v10 = vrot.slane %v542_v50, %v7616_v12 }
  0xe5   :  { %v7598_v32 = vpop.xlane.xlu1 %916  ;;  %4740 = vmax.xlane.f32.xlu0 %v7467_v45  ;;  %v711_v11 = vrot.slane %v7583_v44, %v7610_v40  ;;  %v431_v16 = vrot.slane %v7586_v60, %v7610_v40  ;;  %v438_v52 = vrot.slane %v7586_v60, %v7613_v37  ;;  %v466_v49 = vrot.slane %v7592_v24, %v7613_v37 }
  0xe6   :  { %v7601_v36 = vpop.xlane.xlu0 %538  ;;  %v579_v28 = vrot.slane %v542_v50, %v7607_v54  ;;  %v619_v4 = vcombine.low %v593_v26, %v600_v10  ;;  %v704_v29 = vrot.slane %v7583_v44, %v7607_v54  ;;  %v424_v58 = vrot.slane %v7586_v60, %v7607_v54 }
  0xe7   :  { %v473_v19 = vrot.slane %v7592_v24, %v7616_v12  ;;  %v836_v21 = vrot.slane %v7589_v31, %v7610_v40  ;;  %v843_v33 = vrot.slane %v7589_v31, %v7613_v37  ;;  %v850_v61 = vrot.slane %v7589_v31, %v7616_v12 }
  0xe8   :  { %5231 = vmax.xlane.f32.xlu1 %v7390_v9  ;;  %v618_v22 = vcombine.low %v579_v28, %v586_v6  ;;  %v7662_v23 = vcombine.low %v704_v29, %v711_v11  ;;  %v7666_v63 = vcombine.low %v424_v58, %v431_v16  ;;  %v551_v13 = vrot.slane %v7601_v36, %v7607_v54 }
  0xe9   :  { %v7604_v35 = vpop.xlane.xlu1 %1041  ;;  %4862 = vmax.xlane.f32.xlu0 %v7471_v15  ;;  %v572_v41 = vrot.slane %v7601_v36, %v7616_v12  ;;  %v7708_v28 = vsel %vm3149_vm14, %v7313_v48, -inf  ;;  %v492_v26 = vcombine.low %v466_v49, %v473_v19  ;;  %v961_v58 = vrot.slane %v7598_v32, %v7610_v40 }
  0xea   :  { %v7619_v45 = vpop.xlane.xlu0 %663  ;;  %v968_v16 = vrot.slane %v7598_v32, %v7613_v37  ;;  %v1100_v49 = vrot.slane %v7604_v35, %v7616_v12  ;;  %vm2034_vm14 = vcmask 845568  }
  0xec   :  { %5350 = vmax.xlane.f32.xlu1 %v7479_v20  ;;  %v7635_v20 = vsub.s32 %v478_v43, %v7596_v25  ;;  %v6203_v43 = vsel %vm3272_vm15, %v7415_v7, -inf }
  0xed   :  { %v7622_v9 = vpop.xlane.xlu1 %1166  ;;  %4984 = vmax.xlane.f32.xlu0 %v7475_v46  ;;  %v718_v46 = vrot.slane %v7583_v44, %v7613_v37 }
  0xee   :  { %v7629_v38 = vpop.xlane.xlu0 %788  ;;  %v626_v50 = vrot.slane %v618_v22, %v7635_v20  ;;  %v7719_v22 = vcombine.low %v843_v33, %v850_v61  ;;  %v751_v7 = vrot.slane %v7662_v23, %v7635_v20 }
  0xef   :  { %v808_v33 = vrot.slane %v7629_v38, %v7610_v40  ;;  %v822_v61 = vrot.slane %v7629_v38, %v7616_v12 }
  0xf0   :  { %5353 = vmax.xlane.f32.xlu1 %v7394_v39  ;;  %v725_v39 = vrot.slane %v7583_v44, %v7616_v12  ;;  %v633_v44 = vrot.slane %v619_v4, %v7635_v20 }
  0xf1   :  { %v7632_v15 = vpop.xlane.xlu1 %1291  ;;  %5106 = vmax.xlane.f32.xlu0 %v7483_v59  ;;  %v445_v59 = vrot.slane %v7586_v60, %v7616_v12  ;;  %v452_v60 = vrot.slane %v7592_v24, %v7607_v54 }
  0xf2   :  { %v7650_v30 = vpop.xlane.xlu0 %913  ;;  %v7664_v53 = vcombine.low %v718_v46, %v725_v39  ;;  %v954_v39 = vrot.slane %v7598_v32, %v7607_v54 }
  0xf3   :  { %v7681_v14 = vcombine.low %v438_v52, %v445_v59  ;;  %v975_v52 = vrot.slane %v7598_v32, %v7616_v12  ;;  %v683_v32 = vrot.slane %v7619_v45, %v7610_v40 }
  0xf4   :  { %5472 = vmax.xlane.f32.xlu1 %v7493_v34  ;;  %v829_v34 = vrot.slane %v7589_v31, %v7607_v54  ;;  %v758_v29 = vrot.slane %v7664_v53, %v7635_v20  ;;  %v506_v53 = vrot.slane %v492_v26, %v7635_v20 }
  0xf5   :  { %v7657_v5 = vpop.xlane.xlu1 %1416  ;;  %5228 = vmax.xlane.f32.xlu0 %v7489_v47  ;;  %v459_v47 = vrot.slane %v7592_v24, %v7610_v40  ;;  %v558_v24 = vrot.slane %v7601_v36, %v7610_v40  ;;  %v489_v46 = vrot.slane %v7681_v14, %v7635_v20 }
  0xf6   :  { %v7670_v42 = vpop.xlane.xlu0 %1038  ;;  %v7717_v10 = vcombine.low %v829_v34, %v836_v21  ;;  %v690_v34 = vrot.slane %v7619_v45, %v7613_v37  ;;  %v801_v21 = vrot.slane %v7629_v38, %v7607_v54  ;;  %v7787_v26 = vcombine.low %v751_v7, %v758_v29 }
  0xf7   :  { %v491_v6 = vcombine.low %v452_v60, %v459_v47  ;;  %v697_v60 = vrot.slane %v7619_v45, %v7616_v12 }
  0xf8   :  { %5594 = vmax.xlane.f32.xlu1 %v7497_v55  ;;  %v565_v55 = vrot.slane %v7601_v36, %v7613_v37  ;;  %v7713_v36 = vsel %vm3272_vm15, %v7313_v48, -inf  ;;  %v482_v48 = vrot.slane %v7666_v63, %v7635_v20  ;;  %v676_v63 = vrot.slane %v7619_v45, %v7607_v54  ;;  %9858 = vst [vmem:[#allocation14_spill] sm:$0xff] %v7787_v26 }
  0xf9   :  { %v7689_v27 = vpop.xlane.xlu1 %1541  ;;  %5475 = vmax.xlane.f32.xlu0 %v7398_v51  ;;  %v7715_v51 = vcombine.low %v626_v50, %v633_v44  ;;  %v1079_v50 = vrot.slane %v7604_v35, %v7607_v54  ;;  %v1086_v44 = vrot.slane %v7604_v35, %v7610_v40  ;;  %v499_v23 = vrot.slane %v491_v6, %v7635_v20 }
  0xfa   :  { %v7702_v31 = vpop.xlane.xlu0 %1163  ;;  %v602_v11 = vcombine.low %v565_v55, %v572_v41  ;;  %v815_v45 = vrot.slane %v7629_v38, %v7613_v37  ;;  %v1218_v55 = vrot.slane %v7622_v9, %v7613_v37  ;;  %v1225_v41 = vrot.slane %v7622_v9, %v7616_v12 }
  0xfb   :  { %v727_v38 = vcombine.low %v690_v34, %v697_v60  ;;  %v7785_v6 = vcombine.low %v482_v48, %v489_v46  ;;  %v7793_v3 = vcombine.low %v499_v23, %v506_v53  ;;  %v876_v62 = vrot.slane %v7717_v10, %v7635_v20 }
  0xfc   :  { %5597 = vmax.xlane.f32.xlu1 %v7411_v2  ;;  %v601_v2 = vcombine.low %v551_v13, %v558_v24  ;;  %v616_v14 = vrot.slane %v602_v11, %v7635_v20  ;;  %v1211_v24 = vrot.slane %v7622_v9, %v7610_v40  ;;  %v7791_v11 = vcombine.low %v968_v16, %v975_v52 }
  0xfd   :  { %v7721_v4 = vpop.xlane.xlu1 %1666  ;;  %6082 = vmax.xlane.f32.xlu0 %v6081_v17  ;;  %v852_v48 = vcombine.low %v815_v45, %v822_v61  ;;  %v7805_v7 = vcombine.low %v1218_v55, %v1225_v41  ;;  %v1329_v10 = vrot.slane %v7632_v15, %v7607_v54  ;;  %v947_v23 = vrot.slane %v7650_v30, %v7616_v12 }
  0xfe   :  { %v7739_v59 = vpop.xlane.xlu0 %1288  ;;  %v609_v19 = vrot.slane %v601_v2, %v7635_v20  ;;  %v7789_v2 = vcombine.low %v954_v39, %v961_v58  ;;  %v883_v39 = vrot.slane %v7719_v22, %v7635_v20  ;;  %v1336_v58 = vrot.slane %v7632_v15, %v7610_v40 }
  0xff   :  { %v940_v22 = vrot.slane %v7650_v30, %v7613_v37  ;;  %v1343_v53 = vrot.slane %v7632_v15, %v7613_v37  ;;  %v1072_v45 = vrot.slane %v7670_v42, %v7616_v12  ;;  %vm2284_vm15 = vcmask 976768  }
 0x100   :  { %5716 = vmax.xlane.f32.xlu1 %v7501_v0  ;;  %v1093_v0 = vrot.slane %v7604_v35, %v7613_v37  ;;  %v1204_v35 = vrot.slane %v7622_v9, %v7607_v54  ;;  %v7797_v9 = vcombine.low %v1079_v50, %v1086_v44  ;;  %v7808_v29 = vcombine.low %v609_v19, %v616_v14 }
 0x101   :  { %v7756_v47 = vpop.xlane.xlu1 %1791  ;;  %6204 = vmax.xlane.f32.xlu0 %v6203_v43  ;;  %v726_v43 = vcombine.low %v676_v63, %v683_v32  ;;  %v851_v63 = vcombine.low %v801_v21, %v808_v33  ;;  %v741_v50 = vrot.slane %v727_v38, %v7635_v20  ;;  %v933_v44 = vrot.slane %v7650_v30, %v7610_v40 }
 0x102   :  { %v7772_v13 = vpop.xlane.xlu0 %1413  ;;  %v7803_v46 = vcombine.low %v1204_v35, %v1211_v24  ;;  %v1350_v32 = vrot.slane %v7632_v15, %v7616_v12  ;;  %v1461_v19 = vrot.slane %v7657_v5, %v7610_v40  ;;  %v1058_v14 = vrot.slane %v7670_v42, %v7610_v40 }
 0x103   :  { %v734_v52 = vrot.slane %v726_v43, %v7635_v20  ;;  %v859_v60 = vrot.slane %v851_v63, %v7635_v20  ;;  %v1468_v15 = vrot.slane %v7657_v5, %v7613_v37  ;;  %v1475_v21 = vrot.slane %v7657_v5, %v7616_v12 }
 0x104   :  { %5719 = vmax.xlane.f32.xlu1 %v7505_v8  ;;  %v7799_v8 = vcombine.low %v1093_v0, %v1100_v49  ;;  %v866_v0 = vrot.slane %v852_v48, %v7635_v20  ;;  %v1454_v49 = vrot.slane %v7657_v5, %v7607_v54  ;;  %v1065_v33 = vrot.slane %v7670_v42, %v7613_v37 }
 0x105   :  { %v7783_v17 = vpop.xlane.xlu1 %1916  ;;  %v1176_v35 = vrot.slane %v7702_v31, %v7607_v54  ;;  %v977_v55 = vcombine.low %v940_v22, %v947_v23  ;;  %v7859_v41 = vcombine.low %v1329_v10, %v1336_v58  ;;  %v7861_v43 = vcombine.low %v1343_v53, %v1350_v32 }
 0x106   :  { %v7801_v25 = vpop.xlane.xlu0 %1538  ;;  %v742_v38 = vcombine.low %v734_v52, %v741_v50  ;;  %v7865_v63 = vcombine.low %v876_v62, %v883_v39  ;;  %v1197_v48 = vrot.slane %v7702_v31, %v7616_v12  ;;  %v7872_v26 = vcombine.low %v859_v60, %v866_v0 }
 0x107   :  { %9859 = vst [vmem:[#allocation15_spill] sm:$0xff] %v7861_v43  ;;  %v7874_v10 = vcombine.low %v1454_v49, %v1461_v19  ;;  %v7876_v58 = vcombine.low %v1468_v15, %v1475_v21  ;;  %v1102_v52 = vcombine.low %v1065_v33, %v1072_v45  ;;  %v1001_v62 = vrot.slane %v7789_v2, %v7635_v20 }
 0x108   :  { %5838 = vmax.xlane.f32.xlu1 %v7513_v57  ;;  %v926_v57 = vrot.slane %v7650_v30, %v7607_v54  ;;  %v1051_v30 = vrot.slane %v7670_v42, %v7607_v54  ;;  %9860 = vst [vmem:[#allocation16_spill] sm:$0xff] %v7865_v63  ;;  %v1190_v42 = vrot.slane %v7702_v31, %v7613_v37 }
 0x109   :  { %v7816_v16 = vpop.xlane.xlu1 %2041  ;;  %9861 = vst [vmem:[#allocation17_spill] sm:$0xff] %v7874_v10  ;;  %9862 = vst [vmem:[#allocation18_spill] sm:$0xff] %v7876_v58  ;;  %v1579_v39 = vrot.slane %v7689_v27, %v7607_v54  ;;  %v1586_v22 = vrot.slane %v7689_v27, %v7610_v40  ;;  %v1593_v23 = vrot.slane %v7689_v27, %v7613_v37 }
 0x10a   :  { %v7832_v34 = vpop.xlane.xlu0 %1663  ;;  %v976_v24 = vcombine.low %v926_v57, %v933_v44  ;;  %v1101_v57 = vcombine.low %v1051_v30, %v1058_v14  ;;  %v1600_v53 = vrot.slane %v7689_v27, %v7616_v12  ;;  %v1008_v2 = vrot.slane %v7791_v11, %v7635_v20 }
 0x10b   :  { %v1227_v60 = vcombine.low %v1190_v42, %v1197_v48  ;;  %v1301_v0 = vrot.slane %v7739_v59, %v7607_v54  ;;  %v1308_v49 = vrot.slane %v7739_v59, %v7610_v40  ;;  %v1704_v30 = vrot.slane %v7721_v4, %v7607_v54 }
 0x10c   :  { %5841 = vmax.xlane.f32.xlu1 %v7521_v56  ;;  %v1183_v56 = vrot.slane %v7702_v31, %v7610_v40  ;;  %v984_v31 = vrot.slane %v976_v24, %v7635_v20  ;;  %v1109_v19 = vrot.slane %v1101_v57, %v7635_v20  ;;  %v1315_v27 = vrot.slane %v7739_v59, %v7613_v37 }
 0x10d   :  { %v7853_v61 = vpop.xlane.xlu1 %2166  ;;  %v1322_v11 = vrot.slane %v7739_v59, %v7616_v12  ;;  %v1116_v15 = vrot.slane %v1102_v52, %v7635_v20  ;;  %v1711_v21 = vrot.slane %v7721_v4, %v7610_v40  ;;  %v1725_v33 = vrot.slane %v7721_v4, %v7616_v12 }
 0x10e   :  { %v7863_v5 = vpop.xlane.xlu0 %1788  ;;  %v1226_v50 = vcombine.low %v1176_v35, %v1183_v56  ;;  %v1426_v35 = vrot.slane %v7772_v13, %v7607_v54  ;;  %v1433_v59 = vrot.slane %v7772_v13, %v7610_v40  ;;  %v1440_v56 = vrot.slane %v7772_v13, %v7613_v37 }
 0x10f   :  { %v1447_v24 = vrot.slane %v7772_v13, %v7616_v12  ;;  %v1351_v42 = vcombine.low %v1301_v0, %v1308_v49  ;;  %v1836_v48 = vrot.slane %v7756_v47, %v7610_v40  ;;  %v1241_v57 = vrot.slane %v1227_v60, %v7635_v20 }
 0x110   :  { %5960 = vmax.xlane.f32.xlu1 %v7529_v1  ;;  %v991_v1 = vrot.slane %v977_v55, %v7635_v20  ;;  %v1234_v45 = vrot.slane %v1226_v50, %v7635_v20  ;;  %v7934_v52 = vcombine.low %v1579_v39, %v1586_v22  ;;  %v7936_v50 = vcombine.low %v1593_v23, %v1600_v53 }
 0x111   :  { %v7878_v44 = vpop.xlane.xlu1 %2291  ;;  %v1352_v58 = vcombine.low %v1315_v27, %v1322_v11  ;;  %v7941_v49 = vcombine.low %v1704_v30, %v1711_v21  ;;  %v7945_v63 = vcombine.low %v1109_v19, %v1116_v15  ;;  %v7947_v43 = vcombine.low %v1001_v62, %v1008_v2 }
 0x112   :  { %v7892_v32 = vpop.xlane.xlu0 %1913  ;;  %v992_v0 = vcombine.low %v984_v31, %v991_v1  ;;  %v1850_v39 = vrot.slane %v7756_v47, %v7616_v12  ;;  %v1476_v22 = vcombine.low %v1426_v35, %v1433_v59  ;;  %v1477_v23 = vcombine.low %v1440_v56, %v1447_v24 }
 0x113   :  { %9863 = vst [vmem:[#allocation19_spill] sm:$0xff] %v7941_v49  ;;  %v7957_v31 = vcombine.low %v1234_v45, %v1241_v57  ;;  %v1359_v1 = vrot.slane %v1351_v42, %v7635_v20  ;;  %v1126_v62 = vrot.slane %v7797_v9, %v7635_v20  ;;  %v1954_v2 = vrot.slane %v7783_v17, %v7607_v54 }
 0x114   :  { %5963 = vmax.xlane.f32.xlu1 %v7537_v18  ;;  %v1718_v18 = vrot.slane %v7721_v4, %v7613_v37  ;;  %v1829_v4 = vrot.slane %v7756_v47, %v7607_v54  ;;  %v1968_v60 = vrot.slane %v7783_v17, %v7613_v37  ;;  %v1551_v30 = vrot.slane %v7801_v25, %v7607_v54 }
 0x115   :  { %v7908_v14 = vpop.xlane.xlu1 %2416  ;;  %v1558_v9 = vrot.slane %v7801_v25, %v7610_v40  ;;  %v1565_v27 = vrot.slane %v7801_v25, %v7613_v37  ;;  %v1572_v11 = vrot.slane %v7801_v25, %v7616_v12  ;;  %v1975_v15 = vrot.slane %v7783_v17, %v7616_v12 }
 0x116   :  { %v7926_v55 = vpop.xlane.xlu0 %2038  ;;  %v7943_v10 = vcombine.low %v1718_v18, %v1725_v33  ;;  %v7955_v53 = vcombine.low %v1829_v4, %v1836_v48  ;;  %v1484_v21 = vrot.slane %v1476_v22, %v7635_v20  ;;  %v1133_v18 = vrot.slane %v7799_v8, %v7635_v20 }
 0x117   :  { %636 = vperm.xlu0 %6708, %v7808_v29   ;;  %v1843_v29 = vrot.slane %v7756_v47, %v7613_v37  ;;  %v1961_v47 = vrot.slane %v7783_v17, %v7610_v40  ;;  %v2079_v33 = vrot.slane %v7816_v16, %v7607_v54  ;;  %v2086_v45 = vrot.slane %v7816_v16, %v7610_v40 }
 0x118   :  { %6085 = vmax.xlane.f32.xlu1 %v7708_v28  ;;  %9864 = vst [vmem:[#allocation20_spill] sm:$0xff] %v7943_v10  ;;  %9865 = vst [vmem:[#allocation21_spill] sm:$0xff] %v7955_v53  ;;  %v2093_v25 = vrot.slane %v7816_v16, %v7613_v37  ;;  %v2100_v17 = vrot.slane %v7816_v16, %v7616_v12  ;;  %v1676_v35 = vrot.slane %v7832_v34, %v7607_v54 }
 0x119   :  { %v7939_v13 = vpop.xlane.xlu1 %2539  ;;  %v1683_v8 = vrot.slane %v7832_v34, %v7610_v40  ;;  %v1690_v59 = vrot.slane %v7832_v34, %v7613_v37  ;;  %v1697_v56 = vrot.slane %v7832_v34, %v7616_v12  ;;  %v8007_v42 = vcombine.low %v1843_v29, %v1850_v39 }
 0x11a   :  { %v7953_v28 = vpop.xlane.xlu0 %2163  ;;  %v8009_v4 = vcombine.low %v1551_v30, %v1558_v9  ;;  %v8011_v16 = vcombine.low %v1565_v27, %v1572_v11  ;;  %v1801_v48 = vrot.slane %v7863_v5, %v7607_v54  ;;  %v1808_v57 = vrot.slane %v7863_v5, %v7610_v40 }
 0x11b   :  { %761 = vperm.xlu0 %6708, %v742_v38   ;;  %v1366_v38 = vrot.slane %v1352_v58, %v7635_v20  ;;  %v1491_v58 = vrot.slane %v1477_v23, %v7635_v20  ;;  %9866 = vst [vmem:[#allocation22_spill] sm:$0xff] %v8007_v42  ;;  %v1815_v22 = vrot.slane %v7863_v5, %v7613_v37 }
 0x11c   :  { %6207 = vmax.xlane.f32.xlu1 %v7713_v36  ;;  %v1822_v34 = vrot.slane %v7863_v5, %v7616_v12  ;;  %v8025_v39 = vcombine.low %v1954_v2, %v1961_v47  ;;  %v8027_v23 = vcombine.low %v1968_v60, %v1975_v15  ;;  %v8033_v30 = vcombine.low %v2079_v33, %v2086_v45 }
 0x11d   :  { %v7969_v19 = vpop.xlane.xlu1 %2662  ;;  %v8035_v9 = vcombine.low %v2093_v25, %v2100_v17  ;;  %v1726_v27 = vcombine.low %v1676_v35, %v1683_v8  ;;  %v1727_v11 = vcombine.low %v1690_v59, %v1697_v56  ;;  %v2204_v5 = vrot.slane %v7853_v61, %v7607_v54 }
 0x11e   :  { %v7982_v36 = vpop.xlane.xlu0 %2288  ;;  %9867 = vst [vmem:[#allocation23_spill] sm:$0xff] %v8025_v39  ;;  %9868 = vst [vmem:[#allocation24_spill] sm:$0xff] %v8027_v23  ;;  %v2211_v2 = vrot.slane %v7853_v61, %v7610_v40  ;;  %v1851_v47 = vcombine.low %v1801_v48, %v1808_v57  ;;  %v1852_v60 = vcombine.low %v1815_v22, %v1822_v34 }
 0x11f   :  { %886 = vperm.xlu0 %6708, %v7872_v26   ;;  %v8013_v26 = vcombine.low %v1359_v1, %v1366_v38  ;;  %v8029_v1 = vcombine.low %v1484_v21, %v1491_v58  ;;  %v8031_v38 = vcombine.low %v1126_v62, %v1133_v18  ;;  %9869 = vst [vmem:[#allocation25_spill] sm:$0xff] %v8033_v30  ;;  %9870 = vst [vmem:[#allocation26_spill] sm:$0xff] %v8035_v9 }
 0x120   :  { %v1616_v62 = vrot.slane %v8011_v16, %v7635_v20  ;;  %v1926_v15 = vrot.slane %v7892_v32, %v7607_v54  ;;  %v1933_v21 = vrot.slane %v7892_v32, %v7610_v40  ;;  %v2218_v18 = vrot.slane %v7853_v61, %v7613_v37 }
 0x121   :  { %v8005_v24 = vpop.xlane.xlu1 %2785  ;;  %v2225_v33 = vrot.slane %v7853_v61, %v7616_v12  ;;  %v1940_v45 = vrot.slane %v7892_v32, %v7613_v37  ;;  %v1947_v25 = vrot.slane %v7892_v32, %v7616_v12  ;;  %v2329_v17 = vrot.slane %v7878_v44, %v7607_v54 }
 0x122   :  { %v8023_v29 = vpop.xlane.xlu0 %2413  ;;  %v1734_v8 = vrot.slane %v1726_v27, %v7635_v20  ;;  %v1741_v59 = vrot.slane %v1727_v11, %v7635_v20  ;;  %v1251_v61 = vrot.slane %v7803_v46, %v7635_v20  ;;  %v2336_v56 = vrot.slane %v7878_v44, %v7610_v40 }
 0x123   :  { %1011 = vperm.xlu0 %6708, %v992_v0   ;;  %v1609_v0 = vrot.slane %v8009_v4, %v7635_v20  ;;  %v2343_v32 = vrot.slane %v7878_v44, %v7613_v37  ;;  %v1258_v4 = vrot.slane %v7805_v7, %v7635_v20  ;;  %v8078_v16 = vcombine.low %v1926_v15, %v1933_v21 }
 0x124   :  { %v2454_v48 = vrot.slane %v7908_v14, %v7607_v54  ;;  %v1859_v46 = vrot.slane %v1851_v47, %v7635_v20  ;;  %v1866_v22 = vrot.slane %v1852_v60, %v7635_v20  ;;  %v8086_v34 = vcombine.low %v1940_v45, %v1947_v25 }
 0x125   :  { %v8037_v42 = vpop.xlane.xlu1 %2908  ;;  %v2461_v27 = vrot.slane %v7908_v14, %v7610_v40  ;;  %v2475_v7 = vrot.slane %v7908_v14, %v7616_v12  ;;  %v2051_v11 = vrot.slane %v7926_v55, %v7607_v54  ;;  %v2058_v47 = vrot.slane %v7926_v55, %v7610_v40 }
 0x126   :  { %v8051_v58 = vpop.xlane.xlu0 %2536  ;;  %v2065_v60 = vrot.slane %v7926_v55, %v7613_v37  ;;  %v2072_v15 = vrot.slane %v7926_v55, %v7616_v12  ;;  %v2176_v45 = vrot.slane %v7953_v28, %v7607_v54  ;;  %v2197_v25 = vrot.slane %v7953_v28, %v7616_v12 }
 0x127   :  { %1136 = vperm.xlu0 %6708, %v7945_v63   ;;  %v2350_v63 = vrot.slane %v7878_v44, %v7616_v12  ;;  %v2468_v44 = vrot.slane %v7908_v14, %v7613_v37  ;;  %v2183_v14 = vrot.slane %v7953_v28, %v7610_v40  ;;  %v8114_v9 = vcombine.low %v2204_v5, %v2211_v2 }
 0x128   :  { %v8116_v30 = vcombine.low %v2218_v18, %v2225_v33  ;;  %v1617_v23 = vcombine.low %v1609_v0, %v1616_v62  ;;  %v8120_v39 = vcombine.low %v1734_v8, %v1741_v59  ;;  %v8122_v53 = vcombine.low %v2329_v17, %v2336_v56 }
 0x129   :  { %v8064_v35 = vpop.xlane.xlu1 %3031  ;;  %v8124_v10 = vcombine.low %v2343_v32, %v2350_v63  ;;  %v8127_v49 = vcombine.low %v1859_v46, %v1866_v22  ;;  %v8133_v5 = vcombine.low %v2468_v44, %v2475_v7  ;;  %v2101_v2 = vcombine.low %v2051_v11, %v2058_v47  ;;  %v9873_v44 = vld [vmem:[#allocation15_spill] sm:$0xff] }
 0x12a   :  { %v8082_v57 = vpop.xlane.xlu0 %2659  ;;  %v2102_v18 = vcombine.low %v2065_v60, %v2072_v15  ;;  %v2226_v0 = vcombine.low %v2176_v45, %v2183_v14  ;;  %v1984_v17 = vrot.slane %v8078_v16, %v7635_v20  ;;  %v2301_v8 = vrot.slane %v7982_v36, %v7607_v54 }
 0x12b   :  { %1261 = vperm.xlu0 %6708, %v7957_v31   ;;  %v2190_v31 = vrot.slane %v7953_v28, %v7613_v37  ;;  %v8129_v28 = vcombine.low %v1251_v61, %v1258_v4  ;;  %9872 = vst [vmem:[#allocation28_spill] sm:$0xff] %v8133_v5  ;;  %v2308_v59 = vrot.slane %v7982_v36, %v7610_v40 }
 0x12c   :  { %v2315_v61 = vrot.slane %v7982_v36, %v7613_v37  ;;  %v2322_v56 = vrot.slane %v7982_v36, %v7616_v12  ;;  %v2584_v63 = vrot.slane %v7939_v13, %v7610_v40  ;;  %v2591_v4 = vrot.slane %v7939_v13, %v7613_v37 }
 0x12d   :  { %v8103_v21 = vpop.xlane.xlu1 %3154  ;;  %509 = vperm.xlu1 %6709, %v7785_v6   ;;  %v8131_v6 = vcombine.low %v2454_v48, %v2461_v27  ;;  %v2227_v62 = vcombine.low %v2190_v31, %v2197_v25  ;;  %v2598_v16 = vrot.slane %v7939_v13, %v7616_v12  ;;  %v2700_v48 = vrot.slane %v7969_v19, %v7607_v54 }
 0x12e   :  { %v8118_v55 = vpop.xlane.xlu0 %2782  ;;  %v2109_v46 = vrot.slane %v2101_v2, %v7635_v20  ;;  %v2116_v22 = vrot.slane %v2102_v18, %v7635_v20  ;;  %v2707_v27 = vrot.slane %v7969_v19, %v7610_v40  ;;  %v1383_v7 = vrot.slane %v9873_v44, %v7635_v20 }
 0x12f   :  { %1386 = vperm.xlu0 %6708, %v8013_v26   ;;  %9871 = vst [vmem:[#allocation27_spill] sm:$0xff] %v8131_v6  ;;  %v1991_v26 = vrot.slane %v8086_v34, %v7635_v20  ;;  %v1376_v34 = vrot.slane %v7859_v41, %v7635_v20  ;;  %v2351_v11 = vcombine.low %v2301_v8, %v2308_v59 }
 0x130   :  { %v2352_v47 = vcombine.low %v2315_v61, %v2322_v56  ;;  %v2234_v41 = vrot.slane %v2226_v0, %v7635_v20  ;;  %v2241_v15 = vrot.slane %v2227_v62, %v7635_v20  ;;  %v2426_v45 = vrot.slane %v8023_v29, %v7607_v54 }
 0x131   :  { %v8135_v33 = vpop.xlane.xlu1 %3277  ;;  %512 = vperm.xlu1 %6709, %v7793_v3   ;;  %v2577_v3 = vrot.slane %v7939_v13, %v7607_v54  ;;  %v2714_v13 = vrot.slane %v7969_v19, %v7613_v37  ;;  %v2433_v14 = vrot.slane %v8023_v29, %v7610_v40  ;;  %v2823_v31 = vrot.slane %v8005_v24, %v7607_v54 }
 0x132   :  { %v8150_v32 = vpop.xlane.xlu0 %2905  ;;  %v2830_v25 = vrot.slane %v8005_v24, %v7610_v40  ;;  %v2837_v2 = vrot.slane %v8005_v24, %v7613_v37  ;;  %v2844_v18 = vrot.slane %v8005_v24, %v7616_v12  ;;  %v8202_v8 = vcombine.low %v2591_v4, %v2598_v16 }
 0x133   :  { %1511 = vperm.xlu0 %6708, %v8029_v1   ;;  %v2721_v1 = vrot.slane %v7969_v19, %v7616_v12  ;;  %v2447_v19 = vrot.slane %v8023_v29, %v7616_v12  ;;  %v8200_v62 = vcombine.low %v2577_v3, %v2584_v63  ;;  %v8205_v59 = vcombine.low %v2109_v46, %v2116_v22 }
 0x134   :  { %v8207_v61 = vcombine.low %v2700_v48, %v2707_v27  ;;  %v2359_v5 = vrot.slane %v2351_v11, %v7635_v20  ;;  %v2366_v24 = vrot.slane %v2352_v47, %v7635_v20  ;;  %v2476_v6 = vcombine.low %v2426_v45, %v2433_v14 }
 0x135   :  { %v8163_v36 = vpop.xlane.xlu1 %3401  ;;  %639 = vperm.xlu1 %6709, %v7715_v51   ;;  %v2440_v51 = vrot.slane %v8023_v29, %v7613_v37  ;;  %v9874_v29 = vld [vmem:[#allocation14_spill] sm:$0xff]  ;;  %v8209_v56 = vcombine.low %v2714_v13, %v2721_v1  ;;  %v2549_v63 = vrot.slane %v8051_v58, %v7607_v54  ;;  %v8222_v4 = vcombine.low %v2837_v2, %v2844_v18  ;;  %v9878_v1 = vld [vmem:[#allocation16_spill] sm:$0xff] }
 0x136   :  { %v8178_v60 = vpop.xlane.xlu0 %3028  ;;  %v8226_v48 = vcombine.low %v2234_v41, %v2241_v15  ;;  %v8228_v46 = vcombine.low %v1376_v34, %v1383_v7  ;;  %v2946_v22 = vrot.slane %v8037_v42, %v7607_v54  ;;  %v2953_v27 = vrot.slane %v8037_v42, %v7610_v40  ;;  %v9879_v41 = vld [vmem:[#allocation17_spill] sm:$0xff] }
 0x137   :  { %1636 = vperm.xlu0 %6708, %v1617_v23   ;;  %v1992_v23 = vcombine.low %v1984_v17, %v1991_v26  ;;  %9875 = vst [vmem:[#allocation15_spill] sm:$0xff] %v8209_v56  ;;  %v2477_v3 = vcombine.low %v2440_v51, %v2447_v19  ;;  %v2556_v17 = vrot.slane %v8051_v58, %v7610_v40  ;;  %9877 = vst [vmem:[#allocation29_spill] sm:$0xff] %v8222_v4 }
 0x138   :  { %v8220_v26 = vcombine.low %v2823_v31, %v2830_v25  ;;  %v2960_v13 = vrot.slane %v8037_v42, %v7613_v37  ;;  %v2563_v11 = vrot.slane %v8051_v58, %v7613_v37  ;;  %v2570_v34 = vrot.slane %v8051_v58, %v7616_v12  ;;  %v9880_v25 = vld [vmem:[#allocation18_spill] sm:$0xff] }
 0x139   :  { %v8198_v0 = vpop.xlane.xlu1 %3523  ;;  %764 = vperm.xlu1 %6709, %v9874_v29   ;;  %v8245_v47 = vcombine.low %v2359_v5, %v2366_v24  ;;  %v1501_v15 = vrot.slane %v9879_v41, %v7635_v20  ;;  %v8249_v45 = vcombine.low %v2549_v63, %v2556_v17  ;;  %v2484_v14 = vrot.slane %v2476_v6, %v7635_v20 }
 0x13a   :  { %v8211_v44 = vpop.xlane.xlu0 %3151  ;;  %9876 = vst [vmem:[#allocation14_spill] sm:$0xff] %v8220_v26  ;;  %v2491_v51 = vrot.slane %v2477_v3, %v7635_v20  ;;  %v3076_v58 = vrot.slane %v8064_v35, %v7610_v40  ;;  %v3083_v5 = vrot.slane %v8064_v35, %v7613_v37  ;;  %v3090_v19 = vrot.slane %v8064_v35, %v7616_v12 }
 0x13b   :  { %1761 = vperm.xlu0 %6708, %v8120_v39   ;;  %v2967_v39 = vrot.slane %v8037_v42, %v7616_v12  ;;  %v3069_v42 = vrot.slane %v8064_v35, %v7607_v54  ;;  %v1508_v2 = vrot.slane %v9880_v25, %v7635_v20  ;;  %v2679_v6 = vrot.slane %v8082_v57, %v7610_v40 }
 0x13c   :  { %v2686_v18 = vrot.slane %v8082_v57, %v7613_v37  ;;  %v2693_v29 = vrot.slane %v8082_v57, %v7616_v12  ;;  %v8275_v35 = vcombine.low %v2946_v22, %v2953_v27  ;;  %v2600_v24 = vcombine.low %v2563_v11, %v2570_v34 }
 0x13d   :  { %v8224_v16 = vpop.xlane.xlu1 %3645  ;;  %889 = vperm.xlu1 %6709, %v9878_v1   ;;  %v3192_v3 = vrot.slane %v8103_v21, %v7607_v54  ;;  %v3199_v63 = vrot.slane %v8103_v21, %v7610_v40  ;;  %v3206_v1 = vrot.slane %v8103_v21, %v7613_v37  ;;  %v3213_v41 = vrot.slane %v8103_v21, %v7616_v12 }
 0x13e   :  { %v8243_v7 = vpop.xlane.xlu0 %3274  ;;  %9881 = vst [vmem:[#allocation16_spill] sm:$0xff] %v8275_v35  ;;  %v8291_v22 = vcombine.low %v2960_v13, %v2967_v39  ;;  %v8293_v27 = vcombine.low %v3069_v42, %v3076_v58  ;;  %v8295_v11 = vcombine.low %v3083_v5, %v3090_v19  ;;  %v8299_v25 = vcombine.low %v2484_v14, %v2491_v51 }
 0x13f   :  { %1886 = vperm.xlu0 %6708, %v8127_v49   ;;  %v2672_v49 = vrot.slane %v8082_v57, %v7607_v54  ;;  %v2802_v57 = vrot.slane %v8118_v55, %v7610_v40  ;;  %v2723_v4 = vcombine.low %v2686_v18, %v2693_v29  ;;  %v1509_v21 = vcombine.low %v1501_v15, %v1508_v2 }
 0x140   :  { %9882 = vst [vmem:[#allocation17_spill] sm:$0xff] %v8293_v27  ;;  %9883 = vst [vmem:[#allocation18_spill] sm:$0xff] %v8295_v11  ;;  %v2607_v26 = vrot.slane %v8249_v45, %v7635_v20  ;;  %v8304_v56 = vcombine.low %v3192_v3, %v3199_v63  ;;  %v2614_v39 = vrot.slane %v2600_v24, %v7635_v20  ;;  %v9887_v3 = vld [vmem:[#allocation20_spill] sm:$0xff] }
 0x141   :  { %v8262_v31 = vpop.xlane.xlu1 %3767  ;;  %1014 = vperm.xlu1 %6709, %v7947_v43   ;;  %v2795_v43 = vrot.slane %v8118_v55, %v7607_v54  ;;  %v2722_v35 = vcombine.low %v2672_v49, %v2679_v6  ;;  %v1626_v42 = vrot.slane %v7934_v52, %v7635_v20  ;;  %v8313_v14 = vcombine.low %v3206_v1, %v3213_v41 }
 0x142   :  { %v8281_v17 = vpop.xlane.xlu0 %3398  ;;  %9884 = vst [vmem:[#allocation30_spill] sm:$0xff] %v8304_v56  ;;  %v1633_v45 = vrot.slane %v7936_v50, %v7635_v20  ;;  %v3315_v51 = vrot.slane %v8135_v33, %v7607_v54  ;;  %v3322_v58 = vrot.slane %v8135_v33, %v7610_v40  ;;  %v3329_v52 = vrot.slane %v8135_v33, %v7613_v37 }
 0x143   :  { %2011 = vperm.xlu0 %6708, %v1992_v23   ;;  %v2809_v23 = vrot.slane %v8118_v55, %v7613_v37  ;;  %9885 = vst [vmem:[#allocation31_spill] sm:$0xff] %v8313_v14  ;;  %v8317_v15 = vcombine.low %v2795_v43, %v2802_v57  ;;  %v3336_v5 = vrot.slane %v8135_v33, %v7616_v12 }
 0x144   :  { %v2925_v50 = vrot.slane %v8150_v32, %v7610_v40  ;;  %v2932_v19 = vrot.slane %v8150_v32, %v7613_v37  ;;  %v2730_v2 = vrot.slane %v2722_v35, %v7635_v20  ;;  %v2939_v49 = vrot.slane %v8150_v32, %v7616_v12 }
 0x145   :  { %v8297_v34 = vpop.xlane.xlu1 %3889  ;;  %1139 = vperm.xlu1 %6709, %v8031_v38   ;;  %v2816_v38 = vrot.slane %v8118_v55, %v7616_v12  ;;  %v3439_v33 = vrot.slane %v8163_v36, %v7607_v54  ;;  %v3446_v6 = vrot.slane %v8163_v36, %v7610_v40  ;;  %v2737_v29 = vrot.slane %v2723_v4, %v7635_v20 }
 0x146   :  { %v8308_v13 = vpop.xlane.xlu0 %3520  ;;  %v3453_v24 = vrot.slane %v8163_v36, %v7613_v37  ;;  %v1758_v63 = vrot.slane %v9887_v3, %v7635_v20  ;;  %v3041_v41 = vrot.slane %v8178_v60, %v7607_v54  ;;  %v3048_v4 = vrot.slane %v8178_v60, %v7610_v40 }
 0x147   :  { %2136 = vperm.xlu0 %6708, %v8205_v59   ;;  %v2918_v59 = vrot.slane %v8150_v32, %v7607_v54  ;;  %v9886_v32 = vld [vmem:[#allocation19_spill] sm:$0xff]  ;;  %v2846_v1 = vcombine.low %v2809_v23, %v2816_v38  ;;  %v2615_v57 = vcombine.low %v2607_v26, %v2614_v39  ;;  %v8364_v14 = vcombine.low %v3315_v51, %v3322_v58 }
 0x148   :  { %v1751_v35 = vrot.slane %v9886_v32, %v7635_v20  ;;  %v1634_v32 = vcombine.low %v1626_v42, %v1633_v45  ;;  %v2969_v56 = vcombine.low %v2932_v19, %v2939_v49  ;;  %v8369_v3 = vcombine.low %v3439_v33, %v3446_v6 }
 0x149   :  { %v8330_v55 = vpop.xlane.xlu1 %4011  ;;  %1264 = vperm.xlu1 %6709, %v8129_v28   ;;  %v3460_v28 = vrot.slane %v8163_v36, %v7616_v12  ;;  %v8366_v36 = vcombine.low %v3329_v52, %v3336_v5  ;;  %v3055_v23 = vrot.slane %v8178_v60, %v7613_v37  ;;  %v8375_v11 = vcombine.low %v2730_v2, %v2737_v29  ;;  %v9889_v5 = vld [vmem:[#allocation21_spill] sm:$0xff] }
 0x14a   :  { %v8346_v18 = vpop.xlane.xlu0 %3642  ;;  %v3062_v26 = vrot.slane %v8178_v60, %v7616_v12  ;;  %v1759_v39 = vcombine.low %v1751_v35, %v1758_v63  ;;  %v8384_v42 = vcombine.low %v3041_v41, %v3048_v4  ;;  %v3561_v45 = vrot.slane %v8198_v0, %v7607_v54 }
 0x14b   :  { %2261 = vperm.xlu0 %6708, %v8226_v48   ;;  %v2968_v48 = vcombine.low %v2918_v59, %v2925_v50  ;;  %v8377_v27 = vcombine.low %v3453_v24, %v3460_v28  ;;  %v3568_v51 = vrot.slane %v8198_v0, %v7610_v40  ;;  %v3575_v58 = vrot.slane %v8198_v0, %v7613_v37 }
 0x14c   :  { %v3582_v60 = vrot.slane %v8198_v0, %v7616_v12  ;;  %v1876_v59 = vrot.slane %v9889_v5, %v7635_v20  ;;  %v3171_v50 = vrot.slane %v8211_v44, %v7610_v40  ;;  %v3178_v19 = vrot.slane %v8211_v44, %v7613_v37  ;;  %v9890_v0 = vld [vmem:[#allocation22_spill] sm:$0xff] }
 0x14d   :  { %v8362_v43 = vpop.xlane.xlu1 %4133  ;;  %1389 = vperm.xlu1 %6709, %v8228_v46   ;;  %9888 = vst [vmem:[#allocation19_spill] sm:$0xff] %v8377_v27  ;;  %v2853_v46 = vrot.slane %v8317_v15, %v7635_v20  ;;  %v2860_v15 = vrot.slane %v2846_v1, %v7635_v20  ;;  %v3185_v2 = vrot.slane %v8211_v44, %v7616_v12 }
 0x14e   :  { %v8373_v38 = vpop.xlane.xlu0 %3764  ;;  %v1883_v33 = vrot.slane %v9890_v0, %v7635_v20  ;;  %v3690_v6 = vrot.slane %v8224_v16, %v7610_v40  ;;  %v3697_v29 = vrot.slane %v8224_v16, %v7613_v37  ;;  %v3704_v24 = vrot.slane %v8224_v16, %v7616_v12 }
 0x14f   :  { %2386 = vperm.xlu0 %6708, %v8245_v47   ;;  %v3164_v47 = vrot.slane %v8211_v44, %v7607_v54  ;;  %v8420_v44 = vcombine.low %v3055_v23, %v3062_v26  ;;  %v8422_v28 = vcombine.low %v3561_v45, %v3568_v51  ;;  %v3287_v35 = vrot.slane %v8243_v7, %v7607_v54 }
 0x150   :  { %v3294_v63 = vrot.slane %v8243_v7, %v7610_v40  ;;  %v3301_v41 = vrot.slane %v8243_v7, %v7613_v37  ;;  %v2983_v4 = vrot.slane %v2969_v56, %v7635_v20  ;;  %v8436_v23 = vcombine.low %v3575_v58, %v3582_v60 }
 0x151   :  { %v8392_v52 = vpop.xlane.xlu1 %4255  ;;  %1514 = vperm.xlu1 %6709, %v1509_v21   ;;  %v3683_v21 = vrot.slane %v8224_v16, %v7607_v54  ;;  %9891 = vst [vmem:[#allocation20_spill] sm:$0xff] %v8422_v28  ;;  %v3308_v16 = vrot.slane %v8243_v7, %v7616_v12  ;;  %v8438_v26 = vcombine.low %v3164_v47, %v3171_v50 }
 0x152   :  { %v8407_v49 = vpop.xlane.xlu0 %3886  ;;  %9892 = vst [vmem:[#allocation21_spill] sm:$0xff] %v8436_v23  ;;  %v8440_v45 = vcombine.low %v3178_v19, %v3185_v2  ;;  %v2861_v5 = vcombine.low %v2853_v46, %v2860_v15  ;;  %v8446_v28 = vcombine.low %v3697_v29, %v3704_v24  ;;  %v1884_v7 = vcombine.low %v1876_v59, %v1883_v33  ;;  %v9896_v59 = vld [vmem:[#allocation24_spill] sm:$0xff] }
 0x153   :  { %2511 = vperm.xlu0 %6708, %v8299_v25   ;;  %v2976_v25 = vrot.slane %v2968_v48, %v7635_v20  ;;  %v8444_v0 = vcombine.low %v3683_v21, %v3690_v6  ;;  %v8450_v27 = vcombine.low %v3287_v35, %v3294_v63  ;;  %v3805_v56 = vrot.slane %v8262_v31, %v7607_v54 }
 0x154   :  { %9894 = vst [vmem:[#allocation32_spill] sm:$0xff] %v8446_v28  ;;  %v3812_v58 = vrot.slane %v8262_v31, %v7610_v40  ;;  %v3819_v46 = vrot.slane %v8262_v31, %v7613_v37  ;;  %v8460_v47 = vcombine.low %v3301_v41, %v3308_v16  ;;  %v2008_v50 = vrot.slane %v9896_v59, %v7635_v20  ;;  %v9897_v16 = vld [vmem:[#allocation25_spill] sm:$0xff] }
 0x155   :  { %v8428_v1 = vpop.xlane.xlu1 %4377  ;;  %1639 = vperm.xlu1 %6709, %v1634_v32   ;;  %9893 = vst [vmem:[#allocation22_spill] sm:$0xff] %v8444_v0  ;;  %v9895_v32 = vld [vmem:[#allocation23_spill] sm:$0xff]  ;;  %v2984_v15 = vcombine.low %v2976_v25, %v2983_v4  ;;  %v3411_v19 = vrot.slane %v8281_v17, %v7607_v54  ;;  %v3418_v2 = vrot.slane %v8281_v17, %v7610_v40  ;;  %v9898_v4 = vld [vmem:[#allocation26_spill] sm:$0xff] }
 0x156   :  { %v8442_v51 = vpop.xlane.xlu0 %4008  ;;  %v2001_v48 = vrot.slane %v9895_v32, %v7635_v20  ;;  %v3425_v33 = vrot.slane %v8281_v17, %v7613_v37  ;;  %v3432_v21 = vrot.slane %v8281_v17, %v7616_v12  ;;  %v3941_v29 = vrot.slane %v8297_v34, %v7613_v37 }
 0x157   :  { %2634 = vperm.xlu0 %6708, %v2615_v57   ;;  %v3826_v57 = vrot.slane %v8262_v31, %v7616_v12  ;;  %v3927_v31 = vrot.slane %v8297_v34, %v7607_v54  ;;  %v3099_v24 = vrot.slane %v8384_v42, %v7635_v20  ;;  %v3948_v35 = vrot.slane %v8297_v34, %v7616_v12 }
 0x158   :  { %v3533_v17 = vrot.slane %v8308_v13, %v7607_v54  ;;  %v3106_v41 = vrot.slane %v8420_v44, %v7635_v20  ;;  %v2126_v25 = vrot.slane %v9897_v16, %v7635_v20  ;;  %v3547_v42 = vrot.slane %v8308_v13, %v7613_v37 }
 0x159   :  { %v8458_v60 = vpop.xlane.xlu1 %4499  ;;  %1764 = vperm.xlu1 %6709, %v1759_v39   ;;  %v3934_v39 = vrot.slane %v8297_v34, %v7610_v40  ;;  %v3554_v34 = vrot.slane %v8308_v13, %v7616_v12  ;;  %v2133_v32 = vrot.slane %v9898_v4, %v7635_v20  ;;  %v8503_v59 = vcombine.low %v3805_v56, %v3812_v58 }
 0x15a   :  { %v8474_v6 = vpop.xlane.xlu0 %4130  ;;  %v8505_v28 = vcombine.low %v3819_v46, %v3826_v57  ;;  %v4049_v44 = vrot.slane %v8330_v55, %v7607_v54  ;;  %v4056_v16 = vrot.slane %v8330_v55, %v7610_v40  ;;  %v8513_v23 = vcombine.low %v3411_v19, %v3418_v2 }
 0x15b   :  { %2757 = vperm.xlu0 %6708, %v8375_v11   ;;  %v3540_v11 = vrot.slane %v8308_v13, %v7610_v40  ;;  %9899 = vst [vmem:[#allocation23_spill] sm:$0xff] %v8503_v59  ;;  %v4063_v13 = vrot.slane %v8330_v55, %v7613_v37  ;;  %v2009_v56 = vcombine.low %v2001_v48, %v2008_v50 }
 0x15c   :  { %9900 = vst [vmem:[#allocation24_spill] sm:$0xff] %v8505_v28  ;;  %v8519_v58 = vcombine.low %v3425_v33, %v3432_v21  ;;  %v8521_v46 = vcombine.low %v3927_v31, %v3934_v39  ;;  %v8523_v57 = vcombine.low %v3941_v29, %v3948_v35  ;;  %v3107_v28 = vcombine.low %v3099_v24, %v3106_v41 }
 0x15d   :  { %v8489_v63 = vpop.xlane.xlu1 %4621  ;;  %1889 = vperm.xlu1 %6709, %v1884_v7   ;;  %v4070_v7 = vrot.slane %v8330_v55, %v7616_v12  ;;  %v8527_v59 = vcombine.low %v3533_v17, %v3540_v11  ;;  %v8529_v19 = vcombine.low %v3547_v42, %v3554_v34  ;;  %v2134_v2 = vcombine.low %v2126_v25, %v2133_v32 }
 0x15e   :  { %v8511_v0 = vpop.xlane.xlu0 %4252  ;;  %9901 = vst [vmem:[#allocation25_spill] sm:$0xff] %v8523_v57  ;;  %v3222_v55 = vrot.slane %v8438_v26, %v7635_v20  ;;  %v3655_v48 = vrot.slane %v8346_v18, %v7607_v54  ;;  %v2251_v33 = vrot.slane %v8114_v9, %v7635_v20  ;;  %v2258_v21 = vrot.slane %v8116_v30, %v7635_v20 }
 0x15f   :  { %2880 = vperm.xlu0 %6708, %v2861_v5   ;;  %v8533_v5 = vcombine.low %v4049_v44, %v4056_v16  ;;  %v8543_v31 = vcombine.low %v4063_v13, %v4070_v7  ;;  %v3662_v39 = vrot.slane %v8346_v18, %v7610_v40  ;;  %v3669_v26 = vrot.slane %v8346_v18, %v7613_v37 }
 0x160   :  { %v3676_v29 = vrot.slane %v8346_v18, %v7616_v12  ;;  %v4171_v24 = vrot.slane %v8362_v43, %v7607_v54  ;;  %v4178_v9 = vrot.slane %v8362_v43, %v7610_v40  ;;  %v4185_v30 = vrot.slane %v8362_v43, %v7613_v37 }
 0x161   :  { %v8525_v4 = vpop.xlane.xlu1 %4743  ;;  %2014 = vperm.xlu1 %6709, %v2009_v56   ;;  %9902 = vst [vmem:[#allocation26_spill] sm:$0xff] %v8533_v5  ;;  %9903 = vst [vmem:[#allocation33_spill] sm:$0xff] %v8543_v31  ;;  %v3229_v17 = vrot.slane %v8440_v45, %v7635_v20  ;;  %v4192_v41 = vrot.slane %v8362_v43, %v7616_v12  ;;  %v3777_v18 = vrot.slane %v8373_v38, %v7607_v54 }
 0x162   :  { %v8537_v50 = vpop.xlane.xlu0 %4374  ;;  %v3791_v25 = vrot.slane %v8373_v38, %v7613_v37  ;;  %v3798_v11 = vrot.slane %v8373_v38, %v7616_v12  ;;  %v4293_v42 = vrot.slane %v8392_v52, %v7607_v54  ;;  %v4300_v45 = vrot.slane %v8392_v52, %v7610_v40 }
 0x163   :  { %3003 = vperm.xlu0 %6708, %v2984_v15   ;;  %v3784_v15 = vrot.slane %v8373_v38, %v7610_v40  ;;  %v2259_v34 = vcombine.low %v2251_v33, %v2258_v21  ;;  %v4307_v32 = vrot.slane %v8392_v52, %v7613_v37  ;;  %v3345_v44 = vrot.slane %v8450_v27, %v7635_v20 }
 0x164   :  { %v2376_v16 = vrot.slane %v8122_v53, %v7635_v20  ;;  %v2383_v38 = vrot.slane %v8124_v10, %v7635_v20  ;;  %v4314_v13 = vrot.slane %v8392_v52, %v7616_v12  ;;  %v3899_v7 = vrot.slane %v8407_v49, %v7607_v54 }
 0x165   :  { %v8557_v35 = vpop.xlane.xlu1 %4865  ;;  %2139 = vperm.xlu1 %6709, %v2134_v2   ;;  %v3906_v56 = vrot.slane %v8407_v49, %v7610_v40  ;;  %v3352_v27 = vrot.slane %v8460_v47, %v7635_v20  ;;  %v8597_v53 = vcombine.low %v3669_v26, %v3676_v29  ;;  %v8599_v33 = vcombine.low %v4171_v24, %v4178_v9 }
 0x166   :  { %v8575_v43 = vpop.xlane.xlu0 %4496  ;;  %v3230_v10 = vcombine.low %v3222_v55, %v3229_v17  ;;  %v8601_v52 = vcombine.low %v4185_v30, %v4192_v41  ;;  %v8603_v21 = vcombine.low %v3777_v18, %v3784_v15  ;;  %v8605_v31 = vcombine.low %v3791_v25, %v3798_v11  ;;  %v9905_v55 = vld [vmem:[#allocation28_spill] sm:$0xff] }
 0x167   :  { %3126 = vperm.xlu0 %6708, %v3107_v28   ;;  %v8595_v28 = vcombine.low %v3655_v48, %v3662_v39  ;;  %v8607_v5 = vcombine.low %v4293_v42, %v4300_v45  ;;  %v3913_v47 = vrot.slane %v8407_v49, %v7613_v37  ;;  %v2384_v48 = vcombine.low %v2376_v16, %v2383_v38  ;;  %v9904_v39 = vld [vmem:[#allocation27_spill] sm:$0xff] }
 0x168   :  { %v2501_v26 = vrot.slane %v9904_v39, %v7635_v20  ;;  %v2508_v29 = vrot.slane %v9905_v55, %v7635_v20  ;;  %v8617_v24 = vcombine.low %v4307_v32, %v4314_v13  ;;  %v3920_v9 = vrot.slane %v8407_v49, %v7616_v12 }
 0x169   :  { %v8591_v2 = vpop.xlane.xlu1 %4987  ;;  %2264 = vperm.xlu1 %6709, %v2259_v34   ;;  %v8621_v30 = vcombine.low %v3899_v7, %v3906_v56  ;;  %v3353_v17 = vcombine.low %v3345_v44, %v3352_v27  ;;  %v4415_v18 = vrot.slane %v8428_v1, %v7607_v54  ;;  %v4422_v15 = vrot.slane %v8428_v1, %v7610_v40 }
 0x16a   :  { %v8609_v57 = vpop.xlane.xlu0 %4618  ;;  %v3469_v25 = vrot.slane %v8513_v23, %v7635_v20  ;;  %v3476_v11 = vrot.slane %v8519_v58, %v7635_v20  ;;  %v4429_v49 = vrot.slane %v8428_v1, %v7613_v37  ;;  %v4436_v42 = vrot.slane %v8428_v1, %v7616_v12 }
 0x16b   :  { %3249 = vperm.xlu0 %6708, %v3230_v10   ;;  %v4021_v45 = vrot.slane %v8442_v51, %v7607_v54  ;;  %v4028_v34 = vrot.slane %v8442_v51, %v7610_v40  ;;  %v4035_v23 = vrot.slane %v8442_v51, %v7613_v37  ;;  %v2509_v44 = vcombine.low %v2501_v26, %v2508_v29 }
 0x16c   :  { %v2624_v58 = vrot.slane %v8200_v62, %v7635_v20  ;;  %v2631_v16 = vrot.slane %v8202_v8, %v7635_v20  ;;  %v4042_v1 = vrot.slane %v8442_v51, %v7616_v12  ;;  %v4537_v38 = vrot.slane %v8458_v60, %v7607_v54 }
 0x16d   :  { %v8623_v41 = vpop.xlane.xlu1 %5109  ;;  %2389 = vperm.xlu1 %6709, %v2384_v48   ;;  %v4544_v13 = vrot.slane %v8458_v60, %v7610_v40  ;;  %v4551_v7 = vrot.slane %v8458_v60, %v7613_v37  ;;  %v4558_v62 = vrot.slane %v8458_v60, %v7616_v12  ;;  %v3477_v27 = vcombine.low %v3469_v25, %v3476_v11 }
 0x16e   :  { %v8641_v32 = vpop.xlane.xlu0 %4740  ;;  %v3591_v8 = vrot.slane %v8527_v59, %v7635_v20  ;;  %v3598_v51 = vrot.slane %v8529_v19, %v7635_v20  ;;  %v8665_v10 = vcombine.low %v3913_v47, %v3920_v9  ;;  %v8667_v48 = vcombine.low %v4415_v18, %v4422_v15  ;;  %v9906_v19 = vld [vmem:[#allocation15_spill] sm:$0xff] }
 0x16f   :  { %3372 = vperm.xlu0 %6708, %v3353_v17   ;;  %v4143_v39 = vrot.slane %v8474_v6, %v7607_v54  ;;  %v4150_v26 = vrot.slane %v8474_v6, %v7610_v40  ;;  %v8675_v60 = vcombine.low %v4429_v49, %v4436_v42  ;;  %v2632_v29 = vcombine.low %v2624_v58, %v2631_v16 }
 0x170   :  { %v2747_v59 = vrot.slane %v8207_v61, %v7635_v20  ;;  %v2754_v47 = vrot.slane %v9906_v19, %v7635_v20  ;;  %v8681_v9 = vcombine.low %v4021_v45, %v4028_v34  ;;  %v8683_v17 = vcombine.low %v4035_v23, %v4042_v1 }
 0x171   :  { %v8657_v56 = vpop.xlane.xlu1 %5231  ;;  %2514 = vperm.xlu1 %6709, %v2509_v44   ;;  %v8685_v18 = vcombine.low %v4537_v38, %v4544_v13  ;;  %v4157_v15 = vrot.slane %v8474_v6, %v7613_v37  ;;  %v8691_v11 = vcombine.low %v4551_v7, %v4558_v62  ;;  %v3599_v49 = vcombine.low %v3591_v8, %v3598_v51 }
 0x172   :  { %v8673_v55 = vpop.xlane.xlu0 %4862  ;;  %v3713_v61 = vrot.slane %v8595_v28, %v7635_v20  ;;  %v3720_v42 = vrot.slane %v8597_v53, %v7635_v20  ;;  %v4164_v45 = vrot.slane %v8474_v6, %v7616_v12  ;;  %v8699_v34 = vcombine.low %v4143_v39, %v4150_v26  ;;  %v9909_v53 = vld [vmem:[#allocation14_spill] sm:$0xff]  ;;  %v9910_v6 = vld [vmem:[#allocation29_spill] sm:$0xff] }
 0x173   :  { %3496 = vperm.xlu0 %6708, %v3477_v27   ;;  %9907 = vst [vmem:[#allocation27_spill] sm:$0xff] %v8685_v18  ;;  %9908 = vst [vmem:[#allocation28_spill] sm:$0xff] %v8691_v11  ;;  %v4659_v23 = vrot.slane %v8489_v63, %v7607_v54  ;;  %v4666_v44 = vrot.slane %v8489_v63, %v7610_v40  ;;  %v4673_v16 = vrot.slane %v8489_v63, %v7613_v37 }
 0x174   :  { %v2755_v28 = vcombine.low %v2747_v59, %v2754_v47  ;;  %v2870_v1 = vrot.slane %v9909_v53, %v7635_v20  ;;  %v2877_v38 = vrot.slane %v9910_v6, %v7635_v20  ;;  %v4680_v13 = vrot.slane %v8489_v63, %v7616_v12 }
 0x175   :  { %v8689_v25 = vpop.xlane.xlu1 %5350  ;;  %2637 = vperm.xlu1 %6709, %v2632_v29   ;;  %v4265_v7 = vrot.slane %v8511_v0, %v7607_v54  ;;  %v4272_v62 = vrot.slane %v8511_v0, %v7610_v40  ;;  %v4279_v27 = vrot.slane %v8511_v0, %v7613_v37  ;;  %v4286_v51 = vrot.slane %v8511_v0, %v7616_v12 }
 0x176   :  { %v8705_v58 = vpop.xlane.xlu0 %4984  ;;  %v3721_v39 = vcombine.low %v3713_v61, %v3720_v42  ;;  %v3835_v26 = vrot.slane %v8603_v21, %v7635_v20  ;;  %v3842_v63 = vrot.slane %v8605_v31, %v7635_v20  ;;  %v4781_v29 = vrot.slane %v8525_v4, %v7607_v54  ;;  %v9911_v31 = vld [vmem:[#allocation16_spill] sm:$0xff] }
 0x177   :  { %3618 = vperm.xlu0 %6708, %v3599_v49   ;;  %v4788_v59 = vrot.slane %v8525_v4, %v7610_v40  ;;  %v4795_v19 = vrot.slane %v8525_v4, %v7613_v37  ;;  %v4802_v0 = vrot.slane %v8525_v4, %v7616_v12  ;;  %v8739_v49 = vcombine.low %v4157_v15, %v4164_v45 }
 0x178   :  { %v2878_v21 = vcombine.low %v2870_v1, %v2877_v38  ;;  %v2993_v61 = vrot.slane %v9911_v31, %v7635_v20  ;;  %v3000_v42 = vrot.slane %v8291_v22, %v7635_v20  ;;  %v8747_v53 = vcombine.low %v4673_v16, %v4680_v13 }
 0x179   :  { %v8721_v8 = vpop.xlane.xlu1 %5353  ;;  %2760 = vperm.xlu1 %6709, %v2755_v28   ;;  %v8745_v28 = vcombine.low %v4659_v23, %v4666_v44  ;;  %v4387_v6 = vrot.slane %v8537_v50, %v7607_v54  ;;  %v4394_v4 = vrot.slane %v8537_v50, %v7610_v40  ;;  %v8755_v45 = vcombine.low %v4265_v7, %v4272_v62 }
 0x17a   :  { %v8737_v47 = vpop.xlane.xlu0 %5106  ;;  %9913 = vst [vmem:[#allocation14_spill] sm:$0xff] %v8747_v53  ;;  %v3843_v1 = vcombine.low %v3835_v26, %v3842_v63  ;;  %v3957_v38 = vrot.slane %v8621_v30, %v7635_v20  ;;  %v3964_v22 = vrot.slane %v8665_v10, %v7635_v20  ;;  %v8761_v23 = vcombine.low %v4279_v27, %v4286_v51  ;;  %v9916_v30 = vld [vmem:[#allocation17_spill] sm:$0xff]  ;;  %v9917_v10 = vld [vmem:[#allocation18_spill] sm:$0xff] }
 0x17b   :  { %3740 = vperm.xlu0 %6708, %v3721_v39   ;;  %9912 = vst [vmem:[#allocation15_spill] sm:$0xff] %v8745_v28  ;;  %v8763_v44 = vcombine.low %v4781_v29, %v4788_v59  ;;  %v8765_v16 = vcombine.low %v4795_v19, %v4802_v0  ;;  %v4401_v13 = vrot.slane %v8537_v50, %v7613_v37 }
 0x17c   :  { %v4408_v7 = vrot.slane %v8537_v50, %v7616_v12  ;;  %v3001_v62 = vcombine.low %v2993_v61, %v3000_v42  ;;  %v3116_v26 = vrot.slane %v9916_v30, %v7635_v20  ;;  %v3123_v27 = vrot.slane %v9917_v10, %v7635_v20 }
 0x17d   :  { %v8753_v15 = vpop.xlane.xlu1 %5472  ;;  %2883 = vperm.xlu1 %6709, %v2878_v21   ;;  %9914 = vst [vmem:[#allocation29_spill] sm:$0xff] %v8763_v44  ;;  %9915 = vst [vmem:[#allocation16_spill] sm:$0xff] %v8765_v16  ;;  %v8777_v51 = vcombine.low %v4387_v6, %v4394_v4  ;;  %v4903_v63 = vrot.slane %v8557_v35, %v7607_v54  ;;  %v4910_v29 = vrot.slane %v8557_v35, %v7610_v40 }
 0x17e   :  { %v8769_v39 = vpop.xlane.xlu0 %5228  ;;  %v4917_v59 = vrot.slane %v8557_v35, %v7613_v37  ;;  %v4924_v19 = vrot.slane %v8557_v35, %v7616_v12  ;;  %v3965_v0 = vcombine.low %v3957_v38, %v3964_v22  ;;  %v4079_v21 = vrot.slane %v8681_v9, %v7635_v20  ;;  %v9919_v22 = vld [vmem:[#allocation31_spill] sm:$0xff] }
 0x17f   :  { %3862 = vperm.xlu0 %6708, %v3843_v1   ;;  %v4086_v31 = vrot.slane %v8683_v17, %v7635_v20  ;;  %v4509_v61 = vrot.slane %v8575_v43, %v7607_v54  ;;  %v4516_v42 = vrot.slane %v8575_v43, %v7610_v40  ;;  %v4523_v6 = vrot.slane %v8575_v43, %v7613_v37  ;;  %v9918_v17 = vld [vmem:[#allocation30_spill] sm:$0xff] }
 0x180   :  { %v4530_v35 = vrot.slane %v8575_v43, %v7616_v12  ;;  %v5025_v9 = vrot.slane %v8591_v2, %v7607_v54  ;;  %v3124_v1 = vcombine.low %v3116_v26, %v3123_v27  ;;  %v3239_v38 = vrot.slane %v9918_v17, %v7635_v20 }
 0x181   :  { %v8785_v50 = vpop.xlane.xlu1 %5594  ;;  %3006 = vperm.xlu1 %6709, %v3001_v62   ;;  %v3246_v62 = vrot.slane %v9919_v22, %v7635_v20  ;;  %v5032_v30 = vrot.slane %v8591_v2, %v7610_v40  ;;  %v5039_v10 = vrot.slane %v8591_v2, %v7613_v37  ;;  %v5046_v43 = vrot.slane %v8591_v2, %v7616_v12 }
 0x182   :  { %v8801_v4 = vpop.xlane.xlu0 %5475  ;;  %v4631_v16 = vrot.slane %v8609_v57, %v7607_v54  ;;  %v4638_v26 = vrot.slane %v8609_v57, %v7610_v40  ;;  %v4087_v27 = vcombine.low %v4079_v21, %v4086_v31  ;;  %v4201_v17 = vrot.slane %v8699_v34, %v7635_v20 }
 0x183   :  { %3984 = vperm.xlu0 %6708, %v3965_v0   ;;  %v4208_v22 = vrot.slane %v8739_v49, %v7635_v20  ;;  %v4438_v44 = vcombine.low %v4401_v13, %v4408_v7  ;;  %v8825_v53 = vcombine.low %v4903_v63, %v4910_v29  ;;  %v8827_v2 = vcombine.low %v4917_v59, %v4924_v19 }
 0x184   :  { %v8829_v28 = vcombine.low %v4509_v61, %v4516_v42  ;;  %v8833_v18 = vcombine.low %v4523_v6, %v4530_v35  ;;  %v3247_v21 = vcombine.low %v3239_v38, %v3246_v62  ;;  %v3362_v31 = vrot.slane %v8364_v14, %v7635_v20 }
 0x185   :  { %v8817_v0 = vpop.xlane.xlu1 %5597  ;;  %3129 = vperm.xlu1 %6709, %v3124_v1   ;;  %v3369_v34 = vrot.slane %v8366_v36, %v7635_v20  ;;  %v8839_v49 = vcombine.low %v5025_v9, %v5032_v30  ;;  %v8841_v13 = vcombine.low %v5039_v10, %v5046_v43  ;;  %v4645_v7 = vrot.slane %v8609_v57, %v7613_v37 }
 0x186   :  { %v8831_v11 = vpop.xlane.xlu0 %6082  ;;  %v4652_v63 = vrot.slane %v8609_v57, %v7616_v12  ;;  %v8849_v59 = vcombine.low %v4631_v16, %v4638_v26  ;;  %v4209_v19 = vcombine.low %v4201_v17, %v4208_v22  ;;  %v4323_v14 = vrot.slane %v8755_v45, %v7635_v20 }
 0x187   :  { %4106 = vperm.xlu0 %6708, %v4087_v27   ;;  %9920 = vst [vmem:[#allocation17_spill] sm:$0xff] %v8841_v13  ;;  %v4330_v36 = vrot.slane %v8761_v23, %v7635_v20  ;;  %v5147_v61 = vrot.slane %v8623_v41, %v7607_v54  ;;  %v5154_v42 = vrot.slane %v8623_v41, %v7610_v40 }
 0x188   :  { %v5161_v57 = vrot.slane %v8623_v41, %v7613_v37  ;;  %v5168_v16 = vrot.slane %v8623_v41, %v7616_v12  ;;  %v4753_v6 = vrot.slane %v8641_v32, %v7607_v54  ;;  %v4760_v45 = vrot.slane %v8641_v32, %v7610_v40 }
 0x189   :  { %v8847_v29 = vpop.xlane.xlu1 %5716  ;;  %3252 = vperm.xlu1 %6709, %v3247_v21   ;;  %v4767_v23 = vrot.slane %v8641_v32, %v7613_v37  ;;  %v3370_v35 = vcombine.low %v3362_v31, %v3369_v34  ;;  %v4774_v9 = vrot.slane %v8641_v32, %v7616_v12  ;;  %v5269_v1 = vrot.slane %v8657_v56, %v7607_v54 }
 0x18a   :  { %v5276_v41 = vrot.slane %v8657_v56, %v7610_v40  ;;  %v8875_v38 = vpop.xlane.xlu0 %6204  ;;  %v3486_v30 = vrot.slane %v8369_v3, %v7635_v20  ;;  %v5283_v10 = vrot.slane %v8657_v56, %v7613_v37  ;;  %v4331_v43 = vcombine.low %v4323_v14, %v4330_v36  ;;  %v9922_v3 = vld [vmem:[#allocation19_spill] sm:$0xff]  ;;  %v9925_v36 = vld [vmem:[#allocation20_spill] sm:$0xff] }
 0x18b   :  { %4228 = vperm.xlu0 %6708, %v4209_v19   ;;  %v4445_v32 = vrot.slane %v8777_v51, %v7635_v20  ;;  %v4452_v26 = vrot.slane %v4438_v44, %v7635_v20  ;;  %v5290_v27 = vrot.slane %v8657_v56, %v7616_v12  ;;  %v4875_v17 = vrot.slane %v8673_v55, %v7607_v54 }
 0x18c   :  { %v4882_v22 = vrot.slane %v8673_v55, %v7610_v40  ;;  %v3493_v21 = vrot.slane %v9922_v3, %v7635_v20  ;;  %v4682_v31 = vcombine.low %v4645_v7, %v4652_v63  ;;  %v8894_v34 = vcombine.low %v5147_v61, %v5154_v42 }
 0x18d   :  { %v8877_v62 = vpop.xlane.xlu1 %5719  ;;  %3375 = vperm.xlu1 %6709, %v3370_v35   ;;  %v8896_v19 = vcombine.low %v5161_v57, %v5168_v16  ;;  %v8898_v51 = vcombine.low %v4753_v6, %v4760_v45  ;;  %v8900_v44 = vcombine.low %v4767_v23, %v4774_v9  ;;  %v3608_v35 = vrot.slane %v9925_v36, %v7635_v20 }
 0x18e   :  { %9921 = vst [vmem:[#allocation18_spill] sm:$0xff] %v8877_v62  ;;  %9923 = vst [vmem:[#allocation30_spill] sm:$0xff] %v8894_v34  ;;  %v3494_v14 = vcombine.low %v3486_v30, %v3493_v21  ;;  %v9926_v62 = vld [vmem:[#allocation21_spill] sm:$0xff]  ;;  %v8908_v3 = vcombine.low %v5269_v1, %v5276_v41  ;;  %v4453_v7 = vcombine.low %v4445_v32, %v4452_v26 }
 0x18f   :  { %9924 = vst [vmem:[#allocation31_spill] sm:$0xff] %v8896_v19  ;;  %4350 = vperm.xlu0 %6708, %v4331_v43   ;;  %v3615_v13 = vrot.slane %v9926_v62, %v7635_v20  ;;  %v4567_v63 = vrot.slane %v8829_v28, %v7635_v20  ;;  %v4574_v61 = vrot.slane %v8833_v18, %v7635_v20  ;;  %v9928_v62 = vld [vmem:[#allocation22_spill] sm:$0xff] }
 0x190   :  { %v8914_v42 = vcombine.low %v5283_v10, %v5290_v27  ;;  %v4889_v57 = vrot.slane %v8673_v55, %v7613_v37  ;;  %v4896_v16 = vrot.slane %v8673_v55, %v7616_v12  ;;  %v8920_v6 = vcombine.low %v4875_v17, %v4882_v22  ;;  %v9929_v10 = vld [vmem:[#allocation32_spill] sm:$0xff] }
 0x191   :  { %v8902_v56 = vpop.xlane.xlu1 %5838  ;;  %3499 = vperm.xlu1 %6709, %v3494_v14   ;;  %v5363_v23 = vrot.slane %v8689_v25, %v7607_v54  ;;  %v5370_v28 = vrot.slane %v8689_v25, %v7610_v40  ;;  %v5377_v18 = vrot.slane %v8689_v25, %v7613_v37  ;;  %v5384_v9 = vrot.slane %v8689_v25, %v7616_v12 }
 0x192   :  { %v8922_v45 = vpop.permute.xlu0 %636  ;;  %v4997_v55 = vrot.slane %v8705_v58, %v7607_v54  ;;  %v3616_v41 = vcombine.low %v3608_v35, %v3615_v13  ;;  %v3730_v30 = vrot.slane %v9928_v62, %v7635_v20  ;;  %v3737_v43 = vrot.slane %v9929_v10, %v7635_v20  ;;  %v9931_v62 = vld [vmem:[#allocation24_spill] sm:$0xff] }
 0x193   :  { %4472 = vperm.xlu0 %6708, %v4453_v7   ;;  %v5004_v32 = vrot.slane %v8705_v58, %v7610_v40  ;;  %v4575_v26 = vcombine.low %v4567_v63, %v4574_v61  ;;  %v4689_v25 = vrot.slane %v8849_v59, %v7635_v20  ;;  %v4696_v27 = vrot.slane %v4682_v31, %v7635_v20  ;;  %v9930_v61 = vld [vmem:[#allocation23_spill] sm:$0xff] }
 0x194   :  { %v5011_v17 = vrot.slane %v8705_v58, %v7613_v37  ;;  %v5018_v13 = vrot.slane %v8705_v58, %v7616_v12  ;;  %v5391_v22 = vrot.slane %v8721_v8, %v7607_v54  ;;  %v5398_v21 = vrot.slane %v8721_v8, %v7610_v40 }
 0x195   :  { %v8934_v1 = vpop.xlane.xlu1 %5841  ;;  %3621 = vperm.xlu1 %6709, %v3616_v41   ;;  %v5405_v59 = vrot.slane %v8721_v8, %v7613_v37  ;;  %v5412_v31 = vrot.slane %v8721_v8, %v7616_v12  ;;  %v5119_v36 = vrot.slane %v8737_v47, %v7607_v54  ;;  %v5126_v58 = vrot.slane %v8737_v47, %v7610_v40 }
 0x196   :  { %9927 = vst [vmem:[#allocation19_spill] sm:$0xff] %v8934_v1  ;;  %v8953_v14 = vpop.permute.xlu0 %761  ;;  %v4926_v35 = vcombine.low %v4889_v57, %v4896_v16  ;;  %v3738_v63 = vcombine.low %v3730_v30, %v3737_v43  ;;  %v3852_v41 = vrot.slane %v9930_v61, %v7635_v20  ;;  %v3859_v10 = vrot.slane %v9931_v62, %v7635_v20 }
 0x197   :  { %4594 = vperm.xlu0 %6708, %v4575_v26   ;;  %v8969_v1 = vcombine.low %v5363_v23, %v5370_v28  ;;  %v4697_v8 = vcombine.low %v4689_v25, %v4696_v27  ;;  %v4811_v19 = vrot.slane %v8898_v51, %v7635_v20  ;;  %v4818_v34 = vrot.slane %v8900_v44, %v7635_v20 }
 0x198   :  { %v8975_v26 = vcombine.low %v5377_v18, %v5384_v9  ;;  %v5047_v57 = vcombine.low %v4997_v55, %v5004_v32  ;;  %v5048_v16 = vcombine.low %v5011_v17, %v5018_v13  ;;  %v8977_v30 = vcombine.low %v5391_v22, %v5398_v21  ;;  %v9933_v32 = vld [vmem:[#allocation25_spill] sm:$0xff] }
 0x199   :  { %v8963_v7 = vpop.xlane.xlu1 %5960  ;;  %3743 = vperm.xlu1 %6709, %v3738_v63   ;;  %v8981_v61 = vcombine.low %v5405_v59, %v5412_v31  ;;  %v5133_v23 = vrot.slane %v8737_v47, %v7613_v37  ;;  %v5140_v51 = vrot.slane %v8737_v47, %v7616_v12  ;;  %v8987_v28 = vcombine.low %v5119_v36, %v5126_v58 }
 0x19a   :  { %v8979_v43 = vpop.permute.xlu0 %886  ;;  %v5485_v44 = vrot.slane %v8753_v15, %v7607_v54  ;;  %v3860_v9 = vcombine.low %v3852_v41, %v3859_v10  ;;  %v3974_v55 = vrot.slane %v8521_v46, %v7635_v20  ;;  %v3981_v25 = vrot.slane %v9933_v32, %v7635_v20  ;;  %v9935_v41 = vld [vmem:[#allocation33_spill] sm:$0xff] }
 0x19b   :  { %4716 = vperm.xlu0 %6708, %v4697_v8   ;;  %v5492_v27 = vrot.slane %v8753_v15, %v7610_v40  ;;  %v4819_v17 = vcombine.low %v4811_v19, %v4818_v34  ;;  %v4933_v47 = vrot.slane %v8920_v6, %v7635_v20  ;;  %v4940_v13 = vrot.slane %v4926_v35, %v7635_v20  ;;  %v9934_v35 = vld [vmem:[#allocation26_spill] sm:$0xff] }
 0x19c   :  { %v5499_v22 = vrot.slane %v8753_v15, %v7613_v37  ;;  %v5506_v21 = vrot.slane %v8753_v15, %v7616_v12  ;;  %v5241_v46 = vrot.slane %v8769_v39, %v7607_v54  ;;  %v5248_v59 = vrot.slane %v8769_v39, %v7610_v40 }
 0x19d   :  { %v8991_v18 = vpop.xlane.xlu1 %5963  ;;  %3865 = vperm.xlu1 %6709, %v3860_v9   ;;  %v5255_v34 = vrot.slane %v8769_v39, %v7613_v37  ;;  %v5262_v19 = vrot.slane %v8769_v39, %v7616_v12  ;;  %v5607_v6 = vrot.slane %v8785_v50, %v7607_v54  ;;  %v5614_v15 = vrot.slane %v8785_v50, %v7610_v40 }
 0x19e   :  { %9932 = vst [vmem:[#allocation20_spill] sm:$0xff] %v8991_v18  ;;  %v9010_v31 = vpop.permute.xlu0 %1011  ;;  %v5170_v36 = vcombine.low %v5133_v23, %v5140_v51  ;;  %v3982_v58 = vcombine.low %v3974_v55, %v3981_v25  ;;  %v4096_v63 = vrot.slane %v9934_v35, %v7635_v20  ;;  %v4103_v62 = vrot.slane %v9935_v41, %v7635_v20 }
 0x19f   :  { %4838 = vperm.xlu0 %6708, %v4819_v17   ;;  %v9024_v10 = vcombine.low %v5485_v44, %v5492_v27  ;;  %v4941_v8 = vcombine.low %v4933_v47, %v4940_v13  ;;  %v5055_v39 = vrot.slane %v5047_v57, %v7635_v20  ;;  %v5062_v32 = vrot.slane %v5048_v16, %v7635_v20 }
 0x1a0   :  { %v9030_v18 = vcombine.low %v5499_v22, %v5506_v21  ;;  %v5291_v17 = vcombine.low %v5241_v46, %v5248_v59  ;;  %v5621_v23 = vrot.slane %v8785_v50, %v7613_v37  ;;  %v5628_v51 = vrot.slane %v8785_v50, %v7616_v12 }
 0x1a1   :  { %v9026_v9 = vpop.xlane.xlu1 %6085  ;;  %3987 = vperm.xlu1 %6709, %v3982_v58   ;;  %v5292_v44 = vcombine.low %v5255_v34, %v5262_v19  ;;  %v9038_v25 = vcombine.low %v5607_v6, %v5614_v15  ;;  %v5513_v57 = vrot.slane %v8801_v4, %v7607_v54  ;;  %v9936_v27 = vlaneseq }
 0x1a2   :  { %v9036_v55 = vpop.permute.xlu0 %1136  ;;  %v5520_v47 = vrot.slane %v8801_v4, %v7610_v40  ;;  %v4104_v13 = vcombine.low %v4096_v63, %v4103_v62  ;;  %v4218_v50 = vrot.slane %v8599_v33, %v7635_v20  ;;  %v4225_v22 = vrot.slane %v8601_v52, %v7635_v20 }
 0x1a3   :  { %v9043_v16 = vand.u32 127, %v9936_v27  ;;  %4960 = vperm.xlu0 %6708, %v4941_v8   ;;  %v5063_v46 = vcombine.low %v5055_v39, %v5062_v32  ;;  %v5177_v34 = vrot.slane %v8987_v28, %v7635_v20  ;;  %v5184_v19 = vrot.slane %v5170_v36, %v7635_v20 }
 0x1a4   :  { %v9058_v6 = vcombine.low %v5621_v23, %v5628_v51  ;;  %v6095_v15 = vrot.slane %v8831_v11, %v7607_v54  ;;  %v6102_v33 = vrot.slane %v8831_v11, %v7610_v40  ;;  %v6109_v52 = vrot.slane %v8831_v11, %v7613_v37 }
 0x1a5   :  { %v9053_v59 = vpop.xlane.xlu1 %6207  ;;  %4109 = vperm.xlu1 %6709, %v4104_v13   ;;  %v6116_v35 = vrot.slane %v8831_v11, %v7616_v12  ;;  %v5729_v28 = vrot.slane %v8847_v29, %v7607_v54  ;;  %v5736_v36 = vrot.slane %v8847_v29, %v7610_v40  ;;  %v641_v63 = vadd.s32 4294967288, %v9043_v16 }
 0x1a6   :  { %v9066_v58 = vpop.permute.xlu0 %1261  ;;  %v4226_v62 = vcombine.low %v4218_v50, %v4225_v22  ;;  %v4340_v8 = vrot.slane %v8607_v5, %v7635_v20  ;;  %v4347_v39 = vrot.slane %v8617_v24, %v7635_v20  ;;  %v9081_v11 = vcombine.low %v5513_v57, %v5520_v47  ;;  %v9937_v22 = vld [vmem:[#allocation13_spill] sm:$0xff] }
 0x1a7   :  { %5082 = vperm.xlu0 %6708, %v5063_v46   ;;  %v5185_v32 = vcombine.low %v5177_v34, %v5184_v19  ;;  %v5299_v51 = vrot.slane %v5291_v17, %v7635_v20  ;;  %v5306_v27 = vrot.slane %v5292_v44, %v7635_v20  ;;  %v9087_v46 = vcombine.low %v6095_v15, %v6102_v33 }
 0x1a8   :  { %v5743_v50 = vrot.slane %v8847_v29, %v7613_v37  ;;  %v9095_v24 = vsub.s32 %v9043_v16, %v9937_v22  ;;  %v9097_v57 = vcombine.low %v6109_v52, %v6116_v35  ;;  %v5750_v17 = vrot.slane %v8847_v29, %v7616_v12 }
 0x1a9   :  { %v510_v23 = vpop.permute.xlu1 %509  ;;  %4231 = vperm.xlu1 %6709, %v4226_v62   ;;  %v9101_v44 = vcombine.low %v5729_v28, %v5736_v36  ;;  %v9104_v47 = vsub.s32 %v641_v63, %v9937_v22  ;;  %v766_v34 = vadd.s32 4294967280, %v9043_v16  ;;  %v4348_v19 = vcombine.low %v4340_v8, %v4347_v39 }
 0x1aa   :  { %v9091_v5 = vpop.permute.xlu0 %1386  ;;  %v4462_v15 = vrot.slane %v8667_v48, %v7635_v20  ;;  %v4469_v33 = vrot.slane %v8675_v60, %v7635_v20  ;;  %v5307_v52 = vcombine.low %v5299_v51, %v5306_v27  ;;  %v5316_v29 = vrot.slane %v8908_v3, %v7635_v20  ;;  %v9939_v27 = vld [vmem:[#allocation28_spill] sm:$0xff] }
 0x1ab   :  { %5204 = vperm.xlu0 %6708, %v5185_v32   ;;  %v5323_v28 = vrot.slane %v8914_v42, %v7635_v20  ;;  %v5851_v36 = vrot.slane %v8902_v56, %v7607_v54  ;;  %v5858_v63 = vrot.slane %v8902_v56, %v7610_v40  ;;  %v519_v48 = vrot.slane %v510_v23, %v9095_v24  ;;  %v9938_v23 = vld [vmem:[#allocation27_spill] sm:$0xff] }
 0x1ac   :  { %v5865_v8 = vrot.slane %v8902_v56, %v7613_v37  ;;  %v5872_v3 = vrot.slane %v8902_v56, %v7616_v12  ;;  %v891_v42 = vadd.s32 4294967272, %v9043_v16  ;;  %v4470_v32 = vcombine.low %v4462_v15, %v4469_v33 }
 0x1ad   :  { %v513_v35 = vpop.permute.xlu1 %512  ;;  %4353 = vperm.xlu1 %6709, %v4348_v19   ;;  %v4584_v51 = vrot.slane %v9938_v23, %v7635_v20  ;;  %v4591_v19 = vrot.slane %v9939_v27, %v7635_v20  ;;  %v5324_v13 = vcombine.low %v5316_v29, %v5323_v28  ;;  %v5543_v56 = vrot.slane %v9024_v10, %v7635_v20 }
 0x1ae   :  { %v9120_v62 = vpop.permute.xlu0 %1511  ;;  %v523_v60 = vrot.slane %v513_v35, %v9095_v24  ;;  %v5780_v41 = vcombine.low %v5743_v50, %v5750_v17  ;;  %v645_v15 = vrot.slane %v8922_v45, %v9104_v47  ;;  %v9141_v33 = vsub.s32 %v766_v34, %v9937_v22  ;;  %v9940_v50 = vld [vmem:[#allocation15_spill] sm:$0xff]  ;;  %v9941_v34 = vld [vmem:[#allocation14_spill] sm:$0xff] }
 0x1af   :  { %5326 = vperm.xlu0 %6708, %v5307_v52   ;;  %v5550_v52 = vrot.slane %v9030_v18, %v7635_v20  ;;  %v9146_v29 = vcombine.low %v5851_v36, %v5858_v63  ;;  %v9148_v28 = vcombine.low %v5865_v8, %v5872_v3  ;;  %v9151_v10 = vsub.s32 %v891_v42, %v9937_v22 }
 0x1b0   :  { %v525_v39 = vsel %vm524_vm0, %v523_v60, %v519_v48  ;;  %v4592_v18 = vcombine.low %v4584_v51, %v4591_v19  ;;  %v4706_v17 = vrot.slane %v9940_v50, %v7635_v20  ;;  %v5665_v3 = vrot.slane %v9038_v25, %v7635_v20 }
 0x1b1   :  { %v532_v35 = vrot.slane %v525_v39, %v7635_v20  ;;  %v640_v21 = vpop.permute.xlu1 %639  ;;  %4475 = vperm.xlu1 %6709, %v4470_v32   ;;  %v5551_v63 = vcombine.low %v5543_v56, %v5550_v52  ;;  %v770_v42 = vrot.slane %v8953_v14, %v9141_v33  ;;  %v5973_v39 = vrot.slane %v8963_v7, %v7607_v54  ;;  %v9943_v52 = vld [vmem:[#allocation16_spill] sm:$0xff] }
 0x1b2   :  { %v9143_v48 = vpop.permute.xlu0 %1636  ;;  %v649_v60 = vrot.slane %v640_v21, %v9104_v47  ;;  %v4713_v21 = vrot.slane %v9941_v34, %v7635_v20  ;;  %v1016_v32 = vadd.s32 4294967264, %v9043_v16  ;;  %v5980_v27 = vrot.slane %v8963_v7, %v7610_v40 }
 0x1b3   :  { %535 = vst.msk [vmem:[#allocation3] sm:$0x3] %vm534_vm1, %v532_v35  ;;  %5329 = vperm.xlu0 %6708, %v5324_v13   ;;  %v5672_v13 = vrot.slane %v9058_v6, %v7635_v20  ;;  %v5987_v25 = vrot.slane %v8963_v7, %v7613_v37  ;;  %v5994_v6 = vrot.slane %v8963_v7, %v7616_v12  ;;  %v9942_v35 = vld [vmem:[#allocation29_spill] sm:$0xff] }
 0x1b4   :  { %v650_v45 = vsel %vm524_vm0, %v649_v60, %v645_v15  ;;  %v4714_v19 = vcombine.low %v4706_v17, %v4713_v21  ;;  %v4828_v56 = vrot.slane %v9942_v35, %v7635_v20  ;;  %v4835_v15 = vrot.slane %v9943_v52, %v7635_v20 }
 0x1b5   :  { %v657_v36 = vrot.slane %v650_v45, %v7635_v20  ;;  %v765_v8 = vpop.permute.xlu1 %764  ;;  %4597 = vperm.xlu1 %6709, %v4592_v18   ;;  %v5673_v45 = vcombine.low %v5665_v3, %v5672_v13  ;;  %v5787_v7 = vrot.slane %v9101_v44, %v7635_v20  ;;  %v5794_v50 = vrot.slane %v5780_v41, %v7635_v20 }
 0x1b6   :  { %v9169_v23 = vpop.permute.xlu0 %1761  ;;  %v774_v51 = vrot.slane %v765_v8, %v9141_v33  ;;  %v895_v34 = vrot.slane %v8979_v43, %v9151_v10  ;;  %v9191_v17 = vsub.s32 %v1016_v32, %v9937_v22  ;;  %v1141_v21 = vadd.s32 4294967256, %v9043_v16 }
 0x1b7   :  { %660 = vst.msk [vmem:[#allocation3] sm:$0x3] %vm659_vm6, %v657_v36  ;;  %5570 = vperm.xlu0 %6708, %v5551_v63   ;;  %v6217_v8 = vrot.slane %v8875_v38, %v7607_v54  ;;  %v6023_v3 = vcombine.low %v5973_v39, %v5980_v27  ;;  %v6024_v44 = vcombine.low %v5987_v25, %v5994_v6 }
 0x1b8   :  { %v775_v14 = vsel %vm524_vm0, %v774_v51, %v770_v42  ;;  %v4836_v41 = vcombine.low %v4828_v56, %v4835_v15  ;;  %v4950_v13 = vrot.slane %v8825_v53, %v7635_v20  ;;  %v4957_v42 = vrot.slane %v8827_v2, %v7635_v20  ;;  %v9944_v15 = vld [vmem:[#allocation17_spill] sm:$0xff] }
 0x1b9   :  { %v782_v60 = vrot.slane %v775_v14, %v7635_v20  ;;  %v890_v18 = vpop.permute.xlu1 %889  ;;  %4719 = vperm.xlu1 %6709, %v4714_v19   ;;  %v5795_v51 = vcombine.low %v5787_v7, %v5794_v50  ;;  %v5909_v39 = vrot.slane %v9146_v29, %v7635_v20  ;;  %v5916_v27 = vrot.slane %v9148_v28, %v7635_v20 }
 0x1ba   :  { %v9194_v36 = vpop.permute.xlu0 %1886  ;;  %v899_v63 = vrot.slane %v890_v18, %v9151_v10  ;;  %v1020_v25 = vrot.slane %v9010_v31, %v9191_v17  ;;  %v9213_v6 = vsub.s32 %v1141_v21, %v9937_v22  ;;  %v1266_v53 = vadd.s32 4294967248, %v9043_v16 }
 0x1bb   :  { %785 = vst.msk [vmem:[#allocation3] sm:$0x3] %vm784_vm2, %v782_v60  ;;  %5692 = vperm.xlu0 %6708, %v5673_v45   ;;  %v6224_v35 = vrot.slane %v8875_v38, %v7610_v40  ;;  %v6231_v29 = vrot.slane %v8875_v38, %v7613_v37  ;;  %v6238_v28 = vrot.slane %v8875_v38, %v7616_v12 }
 0x1bc   :  { %v900_v43 = vsel %vm524_vm0, %v899_v63, %v895_v34  ;;  %v4958_v56 = vcombine.low %v4950_v13, %v4957_v42  ;;  %v5072_v52 = vrot.slane %v8839_v49, %v7635_v20  ;;  %v5079_v60 = vrot.slane %v9944_v15, %v7635_v20  ;;  %v9945_v42 = vld [vmem:[#allocation30_spill] sm:$0xff] }
 0x1bd   :  { %v907_v32 = vrot.slane %v900_v43, %v7635_v20  ;;  %v1015_v14 = vpop.permute.xlu1 %1014  ;;  %4841 = vperm.xlu1 %6709, %v4836_v41   ;;  %v5917_v18 = vcombine.low %v5909_v39, %v5916_v27  ;;  %v6031_v50 = vrot.slane %v6023_v3, %v7635_v20  ;;  %v6038_v38 = vrot.slane %v6024_v44, %v7635_v20 }
 0x1be   :  { %v9216_v19 = vpop.permute.xlu0 %2011  ;;  %v1024_v2 = vrot.slane %v1015_v14, %v9191_v17  ;;  %v1145_v34 = vrot.slane %v9036_v55, %v9213_v6  ;;  %v9237_v21 = vsub.s32 %v1266_v53, %v9937_v22  ;;  %v1391_v63 = vadd.s32 4294967240, %v9043_v16 }
 0x1bf   :  { %910 = vst.msk [vmem:[#allocation3] sm:$0x3] %vm9843_vm4, %v907_v32  ;;  %5814 = vperm.xlu0 %6708, %v5795_v51   ;;  %v5642_v41 = vrot.slane %v8817_v0, %v7610_v40  ;;  %v6267_v13 = vcombine.low %v6217_v8, %v6224_v35  ;;  %v6268_v3 = vcombine.low %v6231_v29, %v6238_v28  ;;  %v9946_v51 = vld [vmem:[#allocation31_spill] sm:$0xff]  ;;  %v1516_v29 = vadd.s32 4294967232, %v9043_v16 }
 0x1c0   :  { %v1025_v31 = vsel %vm524_vm0, %v1024_v2, %v1020_v25  ;;  %v5080_v44 = vcombine.low %v5072_v52, %v5079_v60  ;;  %v5194_v32 = vrot.slane %v9945_v42, %v7635_v20  ;;  %v5201_v14 = vrot.slane %v9946_v51, %v7635_v20 }
 0x1c1   :  { %v1032_v45 = vrot.slane %v1025_v31, %v7635_v20  ;;  %v1140_v7 = vpop.permute.xlu1 %1139  ;;  %4963 = vperm.xlu1 %6709, %v4958_v56   ;;  %v6039_v27 = vcombine.low %v6031_v50, %v6038_v38  ;;  %v6153_v8 = vrot.slane %v9087_v46, %v7635_v20  ;;  %v6160_v53 = vrot.slane %v9097_v57, %v7635_v20 }
 0x1c2   :  { %v9240_v49 = vpop.permute.xlu0 %2136  ;;  %v1149_v43 = vrot.slane %v1140_v7, %v9213_v6  ;;  %v1270_v2 = vrot.slane %v9066_v58, %v9237_v21  ;;  %v9259_v35 = vsub.s32 %v1391_v63, %v9937_v22  ;;  %v9947_v56 = vrot.slane %v8801_v4, %v7616_v12 }
 0x1c3   :  { %1035 = vst.msk [vmem:[#allocation3] sm:$0x3] %vm1034_vm3, %v1032_v45  ;;  %5936 = vperm.xlu0 %6708, %v5917_v18   ;;  %v9948_v46 = vrot.slane %v8801_v4, %v7613_v37  ;;  %v5649_v58 = vrot.slane %v8817_v0, %v7613_v37  ;;  %v5656_v52 = vrot.slane %v8817_v0, %v7616_v12 }
 0x1c4   :  { %v1150_v55 = vsel %vm524_vm0, %v1149_v43, %v1145_v34  ;;  %v5202_v60 = vcombine.low %v5194_v32, %v5201_v14  ;;  %v5421_v45 = vrot.slane %v8969_v1, %v7635_v20  ;;  %v5428_v4 = vrot.slane %v8975_v26, %v7635_v20 }
 0x1c5   :  { %v1157_v39 = vrot.slane %v1150_v55, %v7635_v20  ;;  %v1265_v25 = vpop.permute.xlu1 %1264  ;;  %5085 = vperm.xlu1 %6709, %v5080_v44   ;;  %v9271_v57 = vcombine.low %v9948_v46, %v9947_v56  ;;  %v6161_v7 = vcombine.low %v6153_v8, %v6160_v53  ;;  %v6275_v38 = vrot.slane %v6267_v13, %v7635_v20  ;;  %v9951_v56 = vld [vmem:[#allocation19_spill] sm:$0xff] }
 0x1c6   :  { %v9262_v28 = vpop.permute.xlu0 %2261  ;;  %v1274_v31 = vrot.slane %v1265_v25, %v9237_v21  ;;  %v6282_v34 = vrot.slane %v6268_v3, %v7635_v20  ;;  %v1395_v63 = vrot.slane %v9091_v5, %v9259_v35  ;;  %v9289_v43 = vsub.s32 %v1516_v29, %v9937_v22  ;;  %v9950_v3 = vld [vmem:[#allocation18_spill] sm:$0xff] }
 0x1c7   :  { %1160 = vst.msk [vmem:[#allocation3] sm:$0x3] %vm1159_vm5, %v1157_v39  ;;  %6058 = vperm.xlu0 %6708, %v6039_v27   ;;  %v1641_v55 = vadd.s32 4294967224, %v9043_v16  ;;  %v9949_v44 = vrot.slane %v8817_v0, %v7607_v54  ;;  %v9300_v13 = vcombine.low %v5649_v58, %v5656_v52  ;;  %v5757_v5 = vrot.slane %v9950_v3, %v7607_v54 }
 0x1c8   :  { %v1275_v15 = vsel %vm524_vm0, %v1274_v31, %v1270_v2  ;;  %v5429_v51 = vcombine.low %v5421_v45, %v5428_v4  ;;  %v5438_v14 = vrot.slane %v8977_v30, %v7635_v20  ;;  %v5445_v0 = vrot.slane %v8981_v61, %v7635_v20 }
 0x1c9   :  { %v1282_v18 = vrot.slane %v1275_v15, %v7635_v20  ;;  %v1390_v50 = vpop.permute.xlu1 %1389  ;;  %5207 = vperm.xlu1 %6709, %v5202_v60   ;;  %v9298_v42 = vcombine.low %v9949_v44, %v5642_v41  ;;  %v5764_v41 = vrot.slane %v9950_v3, %v7610_v40  ;;  %v5771_v39 = vrot.slane %v9950_v3, %v7613_v37 }
 0x1ca   :  { %v9292_v1 = vpop.permute.xlu0 %2386  ;;  %v1399_v26 = vrot.slane %v1390_v50, %v9259_v35  ;;  %v6283_v25 = vcombine.low %v6275_v38, %v6282_v34  ;;  %v1520_v53 = vrot.slane %v9120_v62, %v9289_v43  ;;  %v9318_v2 = vsub.s32 %v1641_v55, %v9937_v22 }
 0x1cb   :  { %1285 = vst.msk [vmem:[#allocation3] sm:$0x3] %vm1284_vm7, %v1282_v18  ;;  %6180 = vperm.xlu0 %6708, %v6161_v7   ;;  %v1766_v30 = vadd.s32 4294967216, %v9043_v16  ;;  %v5778_v31 = vrot.slane %v9950_v3, %v7616_v12  ;;  %v5879_v46 = vrot.slane %v9951_v56, %v7607_v54  ;;  %v5886_v58 = vrot.slane %v9951_v56, %v7610_v40 }
 0x1cc   :  { %v1400_v32 = vsel %vm524_vm0, %v1399_v26, %v1395_v63  ;;  %v5446_v52 = vcombine.low %v5438_v14, %v5445_v0  ;;  %v5560_v15 = vrot.slane %v9081_v11, %v7635_v20  ;;  %v5567_v60 = vrot.slane %v9271_v57, %v7635_v20  ;;  %v9952_v14 = vld [vmem:[#allocation20_spill] sm:$0xff] }
 0x1cd   :  { %v1407_v27 = vrot.slane %v1400_v32, %v7635_v20  ;;  %v1515_v8 = vpop.permute.xlu1 %1514  ;;  %5448 = vperm.xlu1 %6709, %v5429_v51   ;;  %v5893_v45 = vrot.slane %v9951_v56, %v7613_v37  ;;  %v5900_v4 = vrot.slane %v9951_v56, %v7616_v12  ;;  %v1645_v50 = vrot.slane %v9143_v48, %v9318_v2 }
 0x1ce   :  { %v9321_v29 = vpop.permute.xlu0 %2511  ;;  %v1524_v61 = vrot.slane %v1515_v8, %v9289_v43  ;;  %v9344_v38 = vsub.s32 %v1766_v30, %v9937_v22  ;;  %v1891_v11 = vadd.s32 4294967208, %v9043_v16  ;;  %v5796_v63 = vcombine.low %v5757_v5, %v5764_v41 }
 0x1cf   :  { %1410 = vst.msk [vmem:[#allocation3] sm:$0x3] %vm1409_vm8, %v1407_v27  ;;  %6302 = vperm.xlu0 %6708, %v6283_v25   ;;  %v5797_v55 = vcombine.low %v5771_v39, %v5778_v31  ;;  %v9350_v26 = vcombine.low %v5879_v46, %v5886_v58  ;;  %v5568_v48 = vcombine.low %v5560_v15, %v5567_v60 }
 0x1d0   :  { %v1525_v62 = vsel %vm524_vm0, %v1524_v61, %v1520_v53  ;;  %v5682_v3 = vrot.slane %v9298_v42, %v7635_v20  ;;  %v5689_v32 = vrot.slane %v9300_v13, %v7635_v20  ;;  %v5919_v51 = vcombine.low %v5893_v45, %v5900_v4 }
 0x1d1   :  { %v1532_v18 = vrot.slane %v1525_v62, %v7635_v20  ;;  %v1640_v7 = vpop.permute.xlu1 %1639  ;;  %5451 = vperm.xlu1 %6709, %v5446_v52   ;;  %v6001_v0 = vrot.slane %v9952_v14, %v7607_v54  ;;  %v6008_v5 = vrot.slane %v9952_v14, %v7610_v40  ;;  %v1770_v27 = vrot.slane %v9169_v23, %v9344_v38 }
 0x1d2   :  { %v9347_v34 = vpop.permute.xlu0 %2634  ;;  %v1649_v57 = vrot.slane %v1640_v7, %v9318_v2  ;;  %v9366_v25 = vsub.s32 %v1891_v11, %v9937_v22  ;;  %v2016_v42 = vadd.s32 4294967200, %v9043_v16  ;;  %v6015_v53 = vrot.slane %v9952_v14, %v7613_v37 }
 0x1d3   :  { %1535 = vst.msk [vmem:[#allocation3] sm:$0x3] %vm1534_vm9, %v1532_v18  ;;  %v6022_v30 = vrot.slane %v9952_v14, %v7616_v12  ;;  %v6123_v61 = vrot.slane %v9026_v9, %v7607_v54  ;;  %v5690_v31 = vcombine.low %v5682_v3, %v5689_v32  ;;  %v5804_v56 = vrot.slane %v5796_v63, %v7635_v20 }
 0x1d4   :  { %v1650_v44 = vsel %vm524_vm0, %v1649_v57, %v1645_v50  ;;  %v5811_v46 = vrot.slane %v5797_v55, %v7635_v20  ;;  %v6130_v58 = vrot.slane %v9026_v9, %v7610_v40  ;;  %v6137_v62 = vrot.slane %v9026_v9, %v7613_v37 }
 0x1d5   :  { %v1657_v41 = vrot.slane %v1650_v44, %v7635_v20  ;;  %v1765_v39 = vpop.permute.xlu1 %1764  ;;  %5573 = vperm.xlu1 %6709, %v5568_v48   ;;  %v6144_v52 = vrot.slane %v9026_v9, %v7616_v12  ;;  %v1895_v45 = vrot.slane %v9194_v36, %v9366_v25  ;;  %v9392_v4 = vsub.s32 %v2016_v42, %v9937_v22  ;;  %v6357_v42 = vld [vmem:[%s9825_s3 + $0xf8] sm:$0xff] }
 0x1d6   :  { %v9369_v8 = vpop.permute.xlu0 %2757  ;;  %v1774_v13 = vrot.slane %v1765_v39, %v9344_v38  ;;  %v2141_v18 = vadd.s32 4294967192, %v9043_v16  ;;  %v6040_v11 = vcombine.low %v6001_v0, %v6008_v5  ;;  %v6041_v57 = vcombine.low %v6015_v53, %v6022_v30  ;;  %6610 = vmatprep.subr.mxu0 %v6357_v42  ;;  %v6337_v42 = vld [vmem:[%s9825_s3 + $0x58] sm:$0xff] }
 0x1d7   :  { %1660 = vst.msk [vmem:[#allocation3] sm:$0x3] %vm1659_vm10, %v1657_v41  ;;  %v5812_v63 = vcombine.low %v5804_v56, %v5811_v46  ;;  %v5926_v36 = vrot.slane %v9350_v26, %v7635_v20  ;;  %v5933_v55 = vrot.slane %v5919_v51, %v7635_v20  ;;  %v9403_v44 = vcombine.low %v6123_v61, %v6130_v58 }
 0x1d8   :  { %v1775_v23 = vsel %vm524_vm0, %v1774_v13, %v1770_v27  ;;  %v9405_v48 = vcombine.low %v6137_v62, %v6144_v52  ;;  %v6245_v3 = vrot.slane %v9053_v59, %v7607_v54  ;;  %v2020_v0 = vrot.slane %v9216_v19, %v9392_v4  ;;  %v6373_v13 = vld [vmem:[%s9825_s3 + $0x178] sm:$0xff] }
 0x1d9   :  { %v1782_v15 = vrot.slane %v1775_v23, %v7635_v20  ;;  %v1890_v60 = vpop.permute.xlu1 %1889  ;;  %5695 = vperm.xlu1 %6709, %v5690_v31   ;;  %v9413_v5 = vsub.s32 %v2141_v18, %v9937_v22  ;;  %v2266_v26 = vadd.s32 4294967184, %v9043_v16  ;;  %v6252_v39 = vrot.slane %v9053_v59, %v7610_v40  ;;  %v6341_v40 = vld [vmem:[%s9825_s3 + $0x78] sm:$0xff]  ;;  %6663 = vmatpush3.msra.mxu1 %v6373_v13 }
 0x1da   :  { %v9395_v7 = vpop.permute.xlu0 %2880  ;;  %v1899_v50 = vrot.slane %v1890_v60, %v9366_v25  ;;  %v6259_v54 = vrot.slane %v9053_v59, %v7613_v37  ;;  %v6266_v27 = vrot.slane %v9053_v59, %v7616_v12  ;;  %v6048_v19 = vrot.slane %v6040_v11, %v7635_v20  ;;  %6611 = vmatpush3.msra.mxu0 %v6341_v40  ;;  %v6340_v60 = vld [vmem:[%s9825_s3 + $0x70] sm:$0xff]  ;;  %v6355_v11 = vld [vmem:[%s9825_s3 + $0xe8] sm:$0xff] }
 0x1db   :  { %1785 = vst.msk [vmem:[#allocation3] sm:$0x3] %vm1784_vm12, %v1782_v15  ;;  %v5934_v12 = vcombine.low %v5926_v36, %v5933_v55  ;;  %v6055_v59 = vrot.slane %v6041_v57, %v7635_v20  ;;  %v9953_v61 = vmov 0.0   ;;  %v2145_v23 = vrot.slane %v9240_v49, %v9413_v5  ;;  %v6356_v49 = vld [vmem:[%s9825_s3 + $0xf0] sm:$0xff]  ;;  %v6371_v57 = vld [vmem:[%s9825_s3 + $0x168] sm:$0xff] }
 0x1dc   :  { %v1900_v9 = vsel %vm524_vm0, %v1899_v50, %v1895_v45  ;;  %6664 = vmatprep.subr.mxu1 %v9953_v61  ;;  %v9443_v31 = vsub.s32 %v2266_v26, %v9937_v22  ;;  %v2391_v56 = vadd.s32 4294967176, %v9043_v16  ;;  %v6284_v62 = vcombine.low %v6245_v3, %v6252_v39  ;;  %v6372_v16 = vld [vmem:[%s9825_s3 + $0x170] sm:$0xff]  ;;  %6612 = vmatprep.subr.mxu0 %v6356_v49  ;;  %v6353_v39 = vld [vmem:[%s9825_s3 + $0xd8] sm:$0xff] }
 0x1dd   :  { %v1907_v32 = vrot.slane %v1900_v9, %v7635_v20  ;;  %v2015_v14 = vpop.permute.xlu1 %2014  ;;  %5817 = vperm.xlu1 %6709, %v5812_v63   ;;  %v6285_v52 = vcombine.low %v6259_v54, %v6266_v27  ;;  %v6170_v15 = vrot.slane %v9403_v44, %v7635_v20  ;;  %v6056_v18 = vcombine.low %v6048_v19, %v6055_v59  ;;  %v6339_v9 = vld [vmem:[%s9825_s3 + $0x68] sm:$0xff]  ;;  %v6369_v54 = vld [vmem:[%s9825_s3 + $0x158] sm:$0xff]  ;;  %v6368_v59 = vld [vmem:[%s9825_s3 + $0x150] sm:$0xff] }
 0x1de   :  { %v9416_v41 = vpop.permute.xlu0 %3003  ;;  %v2024_v51 = vrot.slane %v2015_v14, %v9392_v4  ;;  %v6177_v50 = vrot.slane %v9405_v48, %v7635_v20  ;;  %6665 = vmatpush3.msra.mxu1 %v6372_v16  ;;  %6613 = vmatpush3.msra.mxu0 %v6340_v60  ;;  %v2270_v55 = vrot.slane %v9262_v28, %v9443_v31  ;;  %v6354_v14 = vld [vmem:[%s9825_s3 + $0xe0] sm:$0xff] }
 0x1df   :  { %1910 = vst.msk [vmem:[#allocation3] sm:$0x3] %vm1909_vm13, %v1907_v32  ;;  %6666 = vmatprep.subr.mxu1 %v9953_v61  ;;  %v9478_v44 = vsub.s32 %v2391_v56, %v9937_v22  ;;  %6614 = vmatprep.subr.mxu0 %v6355_v11  ;;  %v6292_v32 = vrot.slane %v6284_v62, %v7635_v20  ;;  %v6370_v22 = vld [vmem:[%s9825_s3 + $0x160] sm:$0xff]  ;;  %v6367_v62 = vld [vmem:[%s9825_s3 + $0x148] sm:$0xff] }
 0x1e0   :  { %v2025_v37 = vsel %vm524_vm0, %v2024_v51, %v2020_v0  ;;  %6667 = vmatpush3.msra.mxu1 %v6371_v57  ;;  %6615 = vmatpush3.msra.mxu0 %v6339_v9  ;;  %v6338_v28 = vld [vmem:[%s9825_s3 + $0x60] sm:$0xff]  ;;  %v6178_v26 = vcombine.low %v6170_v15, %v6177_v50  ;;  %v6299_v51 = vrot.slane %v6285_v52, %v7635_v20  ;;  %v6335_v52 = vld [vmem:[%s9825_s3 + $0x48] sm:$0xff]  ;;  %v6349_v50 = vld [vmem:[%s9825_s3 + $0xb8] sm:$0xff] }
 0x1e1   :  { %v2032_v53 = vrot.slane %v2025_v37, %v7635_v20  ;;  %v2140_v30 = vpop.permute.xlu1 %2139  ;;  %5939 = vperm.xlu1 %6709, %v5934_v12   ;;  %6668 = vmatprep.subr.mxu1 %v9953_v61  ;;  %v2395_v13 = vrot.slane %v9292_v1, %v9478_v44  ;;  %v6352_v12 = vld [vmem:[%s9825_s3 + $0xd0] sm:$0xff]  ;;  %v2519_v15 = vrot.slane %v9321_v29, %v9095_v24  ;;  %v6350_v60 = vld [vmem:[%s9825_s3 + $0xc0] sm:$0xff]  ;;  %v6365_v9 = vld [vmem:[%s9825_s3 + $0x138] sm:$0xff] }
 0x1e2   :  { %v9446_v46 = vpop.permute.xlu0 %3126  ;;  %v2149_v58 = vrot.slane %v2140_v30, %v9413_v5  ;;  %6616 = vmatprep.subr.mxu0 %v6354_v14  ;;  %6669 = vmatpush3.msra.mxu1 %v6370_v22  ;;  %v6336_v1 = vld [vmem:[%s9825_s3 + $0x50] sm:$0xff]  ;;  %v6300_v30 = vcombine.low %v6292_v32, %v6299_v51  ;;  %v6334_v29 = vld [vmem:[%s9825_s3 + $0x40] sm:$0xff]  ;;  %v6363_v51 = vld [vmem:[%s9825_s3 + $0x128] sm:$0xff] }
 0x1e3   :  { %2035 = vst.msk [vmem:[#allocation3] sm:$0x3] %vm2034_vm14, %v2032_v53  ;;  %6617 = vmatpush3.msra.mxu0 %v6338_v28  ;;  %6670 = vmatprep.subr.mxu1 %v9953_v61  ;;  %v6348_v32 = vld [vmem:[%s9825_s3 + $0xb0] sm:$0xff]  ;;  %v6347_v28 = vld [vmem:[%s9825_s3 + $0xa8] sm:$0xff] }
 0x1e4   :  { %v2150_v45 = vsel %vm524_vm0, %v2149_v58, %v2145_v23  ;;  %6618 = vmatprep.subr.mxu0 %v6353_v39  ;;  %6671 = vmatpush3.msra.mxu1 %v6369_v54  ;;  %v6351_v23 = vld [vmem:[%s9825_s3 + $0xc8] sm:$0xff]  ;;  %v6364_v14 = vld [vmem:[%s9825_s3 + $0x130] sm:$0xff]  ;;  %v2765_v54 = vrot.slane %v9369_v8, %v9141_v33  ;;  %v6330_v8 = vld [vmem:[%s9825_s3 + $0x20] sm:$0xff] }
 0x1e5   :  { %v2157_v63 = vrot.slane %v2150_v45, %v7635_v20  ;;  %v2265_v36 = vpop.permute.xlu1 %2264  ;;  %6061 = vperm.xlu1 %6709, %v6056_v18   ;;  %6619 = vmatpush3.msra.mxu0 %v6337_v42  ;;  %v6366_v45 = vld [vmem:[%s9825_s3 + $0x140] sm:$0xff]  ;;  %v6331_v39 = vld [vmem:[%s9825_s3 + $0x28] sm:$0xff] }
 0x1e6   :  { %v9480_v48 = vpop.permute.xlu0 %3249  ;;  %v2274_v3 = vrot.slane %v2265_v36, %v9443_v31  ;;  %6672 = vmatprep.subr.mxu1 %v9953_v61  ;;  %6620 = vmatprep.subr.mxu0 %v6352_v12  ;;  %v2642_v36 = vrot.slane %v9347_v34, %v9104_v47  ;;  %v6332_v34 = vld [vmem:[%s9825_s3 + $0x30] sm:$0xff]  ;;  %v6346_v42 = vld [vmem:[%s9825_s3 + $0xa0] sm:$0xff]  ;;  %v6345_v12 = vld [vmem:[%s9825_s3 + $0x98] sm:$0xff] }
 0x1e7   :  { %2160 = vst.msk [vmem:[#allocation3] sm:$0x3] %vm9842_vm11, %v2157_v63  ;;  %vm2409_vm11 = vcmask 1042368   ;;  %6673 = vmatpush3.msra.mxu1 %v6368_v59  ;;  %6621 = vmatpush3.msra.mxu0 %v6336_v1  ;;  %v6333_v63 = vld [vmem:[%s9825_s3 + $0x38] sm:$0xff] }
 0x1e8   :  { %v2275_v0 = vsel %vm524_vm0, %v2274_v3, %v2270_v55  ;;  %6674 = vmatprep.subr.mxu1 %v9953_v61  ;;  %6622 = vmatprep.subr.mxu0 %v6351_v23  ;;  %v2888_v23 = vrot.slane %v9395_v7, %v9151_v10  ;;  %v6328_v7 = vld [vmem:[%s9825_s3 + $0x10] sm:$0xff] }
 0x1e9   :  { %v2282_v27 = vrot.slane %v2275_v0, %v7635_v20  ;;  %v2390_v19 = vpop.permute.xlu1 %2389  ;;  %6183 = vperm.xlu1 %6709, %v6178_v26   ;;  %6675 = vmatpush3.msra.mxu1 %v6367_v62  ;;  %v6344_v62 = vld [vmem:[%s9825_s3 + $0x90] sm:$0xff] }
 0x1ea   :  { %v9509_v40 = vpop.permute.xlu0 %3372  ;;  %v2399_v37 = vrot.slane %v2390_v19, %v9478_v44  ;;  %6623 = vmatpush3.msra.mxu0 %v6335_v52  ;;  %6676 = vmatprep.subr.mxu1 %v9953_v61  ;;  %v6360_v52 = vld [vmem:[%s9825_s3 + $0x110] sm:$0xff] }
 0x1eb   :  { %2285 = vst.msk [vmem:[#allocation3] sm:$0x3] %vm2284_vm15, %v2282_v27  ;;  %6624 = vmatprep.subr.mxu0 %v6350_v60  ;;  %6677 = vmatpush3.msra.mxu1 %v6366_v45 }
 0x1ec   :  { %v2400_v53 = vsel %vm524_vm0, %v2399_v37, %v2395_v13  ;;  %6625 = vmatpush3.msra.mxu0 %v6334_v29  ;;  %6678 = vmatprep.subr.mxu1 %v9953_v61  ;;  %v6362_v13 = vld [vmem:[%s9825_s3 + $0x120] sm:$0xff]  ;;  %v6359_v29 = vld [vmem:[%s9825_s3 + $0x108] sm:$0xff] }
 0x1ed   :  { %v2407_v56 = vrot.slane %v2400_v53, %v7635_v20  ;;  %v2515_v58 = vpop.permute.xlu1 %2514  ;;  %6305 = vperm.xlu1 %6709, %v6300_v30   ;;  %6626 = vmatprep.subr.mxu0 %v6349_v50  ;;  %v6361_v53 = vld [vmem:[%s9825_s3 + $0x118] sm:$0xff]  ;;  %v3011_v50 = vrot.slane %v9416_v41, %v9191_v17 }
 0x1ee   :  { %v9537_v49 = vpop.permute.xlu0 %3496  ;;  %v2523_v16 = vrot.slane %v2515_v58, %v9095_v24  ;;  %6679 = vmatpush3.msra.mxu1 %v6365_v9  ;;  %6627 = vmatpush3.msra.mxu0 %v6333_v63  ;;  %v6329_v30 = vld [vmem:[%s9825_s3 + $0x18] sm:$0xff]  ;;  %v6342_v9 = vld [vmem:[%s9825_s3 + $0x80] sm:$0xff] }
 0x1ef   :  { %2410 = vst.msk [vmem:[#allocation3] sm:$0x3] %vm2409_vm11, %v2407_v56  ;;  %6680 = vmatprep.subr.mxu1 %v9953_v61  ;;  %6628 = vmatprep.subr.mxu0 %v6348_v32  ;;  %v6358_v63 = vld [vmem:[%s9825_s3 + $0x100] sm:$0xff] }
 0x1f0   :  { %v2524_v18 = vsel %vm524_vm0, %v2523_v16, %v2519_v15  ;;  %6681 = vmatpush3.msra.mxu1 %v6364_v14  ;;  %6629 = vmatpush3.msra.mxu0 %v6332_v34  ;;  %v6343_v16 = vld [vmem:[%s9825_s3 + $0x88] sm:$0xff]  ;;  %v3134_v14 = vrot.slane %v9446_v46, %v9213_v6 }
 0x1f1   :  { %v2531_v11 = vrot.slane %v2524_v18, %v7635_v20  ;;  %v2638_v57 = vpop.permute.xlu1 %2637  ;;  %6682 = vmatprep.subr.mxu1 %v9953_v61  ;;  %6630 = vmatprep.subr.mxu0 %v6347_v28  ;;  %v6327_v18 = vld [vmem:[%s9825_s3 + $0x8] sm:$0xff] }
 0x1f2   :  { %v9565_v55 = vpop.permute.xlu0 %3618  ;;  %v2646_v3 = vrot.slane %v2638_v57, %v9104_v47  ;;  %6683 = vmatpush3.msra.mxu1 %v6363_v51  ;;  %6631 = vmatpush3.msra.mxu0 %v6331_v39  ;;  %v3257_v51 = vrot.slane %v9480_v48, %v9237_v21 }
 0x1f3   :  { %2533 = vst.msk [vmem:[#allocation3 + $0x2] sm:$0x3] %vm534_vm1, %v2531_v11  ;;  %6684 = vmatprep.subr.mxu1 %v9953_v61  ;;  %6632 = vmatprep.subr.mxu0 %v6346_v42  ;;  %v3380_v42 = vrot.slane %v9509_v40, %v9259_v35 }
 0x1f4   :  { %v2647_v22 = vsel %vm524_vm0, %v2646_v3, %v2642_v36  ;;  %6685 = vmatpush3.msra.mxu1 %v6362_v13  ;;  %6633 = vmatpush3.msra.mxu0 %v6330_v8  ;;  %v6326_v36 = vld [vmem:[%s9825_s3] sm:$0xff] }
 0x1f5   :  { %v2654_v0 = vrot.slane %v2647_v22, %v7635_v20  ;;  %v2761_v26 = vpop.permute.xlu1 %2760  ;;  %6686 = vmatprep.subr.mxu1 %v9953_v61  ;;  %6634 = vmatprep.subr.mxu0 %v6345_v12 }
 0x1f6   :  { %v9593_v27 = vpop.permute.xlu0 %3740  ;;  %v2769_v19 = vrot.slane %v2761_v26, %v9141_v33  ;;  %6687 = vmatpush3.msra.mxu1 %v6361_v53  ;;  %6635 = vmatpush3.msra.mxu0 %v6329_v30 }
 0x1f7   :  { %2656 = vst.msk [vmem:[#allocation3 + $0x2] sm:$0x3] %vm659_vm6, %v2654_v0  ;;  %6688 = vmatprep.subr.mxu1 %v9953_v61  ;;  %6636 = vmatprep.subr.mxu0 %v6344_v62 }
 0x1f8   :  { %v2770_v37 = vsel %vm524_vm0, %v2769_v19, %v2765_v54  ;;  %6689 = vmatpush3.msra.mxu1 %v6360_v52  ;;  %6637 = vmatpush3.msra.mxu0 %v6328_v7 }
 0x1f9   :  { %v2777_v59 = vrot.slane %v2770_v37, %v7635_v20  ;;  %v2884_v1 = vpop.permute.xlu1 %2883  ;;  %6690 = vmatprep.subr.mxu1 %v9953_v61  ;;  %6638 = vmatprep.subr.mxu0 %v6343_v16  ;;  %v3748_v16 = vrot.slane %v9593_v27, %v9344_v38 }
 0x1fa   :  { %v9621_v56 = vpop.permute.xlu0 %3862  ;;  %v2892_v58 = vrot.slane %v2884_v1, %v9151_v10  ;;  %6691 = vmatpush3.msra.mxu1 %v6359_v29  ;;  %6639 = vmatpush3.msra.mxu0 %v6327_v18 }
 0x1fb   :  { %2779 = vst.msk [vmem:[#allocation3 + $0x2] sm:$0x3] %vm784_vm2, %v2777_v59  ;;  %6692 = vmatprep.subr.mxu1 %v9953_v61  ;;  %6640 = vmatprep.subr.mxu0 %v6342_v9  ;;  %v3504_v59 = vrot.slane %v9537_v49, %v9289_v43 }
 0x1fc   :  { %v2893_v15 = vsel %vm524_vm0, %v2892_v58, %v2888_v23  ;;  %6693 = vmatpush3.msra.mxu1 %v6358_v63  ;;  %6641 = vmatpush3.msra.mxu0 %v6326_v36  ;;  %v3626_v58 = vrot.slane %v9565_v55, %v9318_v2 }
 0x1fd   :  { %v2900_v60 = vrot.slane %v2893_v15, %v7635_v20  ;;  %v3007_v45 = vpop.permute.xlu1 %3006 }
 0x1fe   :  { %v9649_v11 = vpop.permute.xlu0 %3984  ;;  %v3015_v57 = vrot.slane %v3007_v45, %v9191_v17 }
 0x1ff   :  { %2902 = vst.msk [vmem:[#allocation3 + $0x2] sm:$0x3] %vm9843_vm4, %v2900_v60  ;;  %vm6770_vm4 = vmmov 0  }
 0x200   :  { %v3016_v41 = vsel %vm524_vm0, %v3015_v57, %v3011_v50  ;;  %6694 = vmatprep.mubr.msk.f32.mxu1 %vm6770_vm4, %v9953_v61  ;;  %v3870_v50 = vrot.slane %v9621_v56, %v9366_v25  ;;  %vm9954_vm4 = vcmask 911168  }
 0x201   :  { %v3023_v3 = vrot.slane %v3016_v41, %v7635_v20  ;;  %v3130_v32 = vpop.permute.xlu1 %3129  ;;  %v3992_v41 = vrot.slane %v9649_v11, %v9392_v4 }
 0x202   :  { %v9668_v34 = vpop.permute.xlu0 %4106  ;;  %v3138_v22 = vrot.slane %v3130_v32, %v9213_v6 }
 0x203   :  { %3025 = vst.msk [vmem:[#allocation3 + $0x2] sm:$0x3] %vm1034_vm3, %v3023_v3 }
 0x204   :  { %v3139_v28 = vsel %vm524_vm0, %v3138_v22, %v3134_v14  ;;  %v4114_v22 = vrot.slane %v9668_v34, %v9413_v5 }
 0x205   :  { %v3146_v0 = vrot.slane %v3139_v28, %v7635_v20  ;;  %v3253_v26 = vpop.permute.xlu1 %3252 }
 0x206   :  { %v4229_v46 = vpop.permute.xlu0 %4228  ;;  %v3261_v39 = vrot.slane %v3253_v26, %v9237_v21 }
 0x207   :  { %3148 = vst.msk [vmem:[#allocation3 + $0x2] sm:$0x3] %vm1159_vm5, %v3146_v0 }
 0x208   :  { %v3262_v54 = vsel %vm524_vm0, %v3261_v39, %v3257_v51  ;;  %v4236_v39 = vrot.slane %v4229_v46, %v9443_v31 }
 0x209   :  { %v3269_v61 = vrot.slane %v3262_v54, %v7635_v20  ;;  %v3376_v19 = vpop.permute.xlu1 %3375 }
 0x20a   :  { %v4351_v13 = vpop.permute.xlu0 %4350  ;;  %v3384_v8 = vrot.slane %v3376_v19, %v9259_v35 }
 0x20b   :  { %3271 = vst.msk [vmem:[#allocation3 + $0x2] sm:$0x3] %vm1284_vm7, %v3269_v61 }
 0x20c   :  { %v3385_v48 = vsel %vm524_vm0, %v3384_v8, %v3380_v42  ;;  %v4358_v42 = vrot.slane %v4351_v13, %v9478_v44 }
 0x20d   :  { %v3392_v37 = vrot.slane %v3385_v48, %v7635_v20  ;;  %v3500_v12 = vpop.permute.xlu1 %3499 }
 0x20e   :  { %v4473_v1 = vpop.permute.xlu0 %4472  ;;  %v3508_v53 = vrot.slane %v3500_v12, %v9289_v43 }
 0x20f   :  { %3394 = vst.msk [vmem:[#allocation3 + $0x2] sm:$0x3] %vm1409_vm8, %v3392_v37 }
 0x210   :  { %v3509_v40 = vsel %vm524_vm0, %v3508_v53, %v3504_v59  ;;  %v4480_v59 = vrot.slane %v4473_v1, %v9095_v24 }
 0x211   :  { %v3516_v30 = vrot.slane %v3509_v40, %v7635_v20  ;;  %v3622_v23 = vpop.permute.xlu1 %3621 }
 0x212   :  { %v3630_v62 = vrot.slane %v3622_v23, %v9318_v2  ;;  %v4595_v52 = vpop.permute.xlu0 %4594 }
 0x213   :  { %3518 = vst.msk [vmem:[#allocation3 + $0x2] sm:$0x3] %vm1534_vm9, %v3516_v30 }
 0x214   :  { %v3631_v49 = vsel %vm524_vm0, %v3630_v62, %v3626_v58  ;;  %v4602_v58 = vrot.slane %v4595_v52, %v9104_v47 }
 0x215   :  { %v3638_v7 = vrot.slane %v3631_v49, %v7635_v20  ;;  %v3744_v15 = vpop.permute.xlu1 %3743 }
 0x216   :  { %v3752_v60 = vrot.slane %v3744_v15, %v9344_v38  ;;  %v4717_v55 = vpop.permute.xlu0 %4716 }
 0x217   :  { %3640 = vst.msk [vmem:[#allocation3 + $0x2] sm:$0x3] %vm1659_vm10, %v3638_v7 }
 0x218   :  { %v3753_v45 = vsel %vm524_vm0, %v3752_v60, %v3748_v16 }
 0x219   :  { %v3760_v29 = vrot.slane %v3753_v45, %v7635_v20  ;;  %v3866_v18 = vpop.permute.xlu1 %3865 }
 0x21a   :  { %v3874_v57 = vrot.slane %v3866_v18, %v9366_v25  ;;  %v4839_v3 = vpop.permute.xlu0 %4838 }
 0x21b   :  { %3762 = vst.msk [vmem:[#allocation3 + $0x2] sm:$0x3] %vm1784_vm12, %v3760_v29 }
 0x21c   :  { %v3875_v9 = vsel %vm524_vm0, %v3874_v57, %v3870_v50 }
 0x21d   :  { %v3882_v27 = vrot.slane %v3875_v9, %v7635_v20  ;;  %v3988_v63 = vpop.permute.xlu1 %3987 }
 0x21e   :  { %v3996_v36 = vrot.slane %v3988_v63, %v9392_v4  ;;  %v4961_v11 = vpop.permute.xlu0 %4960 }
 0x21f   :  { %3884 = vst.msk [vmem:[#allocation3 + $0x2] sm:$0x3] %vm1909_vm13, %v3882_v27  ;;  %v4968_v57 = vrot.slane %v4961_v11, %v9191_v17 }
 0x220   :  { %v3997_v32 = vsel %vm524_vm0, %v3996_v36, %v3992_v41 }
 0x221   :  { %v4004_v56 = vrot.slane %v3997_v32, %v7635_v20  ;;  %v4110_v14 = vpop.permute.xlu1 %4109 }
 0x222   :  { %v4118_v28 = vrot.slane %v4110_v14, %v9413_v5  ;;  %v5083_v48 = vpop.permute.xlu0 %5082 }
 0x223   :  { %4006 = vst.msk [vmem:[#allocation3 + $0x2] sm:$0x3] %vm2034_vm14, %v4004_v56 }
 0x224   :  { %v4119_v0 = vsel %vm524_vm0, %v4118_v28, %v4114_v22 }
 0x225   :  { %v4126_v26 = vrot.slane %v4119_v0, %v7635_v20  ;;  %v4232_v51 = vpop.permute.xlu1 %4231 }
 0x226   :  { %v4240_v54 = vrot.slane %v4232_v51, %v9443_v31  ;;  %v5205_v30 = vpop.permute.xlu0 %5204 }
 0x227   :  { %4128 = vst.msk [vmem:[#allocation3 + $0x2] sm:$0x3] %vm9954_vm4, %v4126_v26  ;;  %v5212_v28 = vrot.slane %v5205_v30, %v9237_v21 }
 0x228   :  { %v4241_v61 = vsel %vm524_vm0, %v4240_v54, %v4236_v39 }
 0x229   :  { %v4248_v34 = vrot.slane %v4241_v61, %v7635_v20  ;;  %v4354_v19 = vpop.permute.xlu1 %4353 }
 0x22a   :  { %v4362_v8 = vrot.slane %v4354_v19, %v9478_v44  ;;  %v5327_v16 = vpop.permute.xlu0 %5326 }
 0x22b   :  { %4250 = vst.msk [vmem:[#allocation3 + $0x2] sm:$0x3] %vm2284_vm15, %v4248_v34 }
 0x22c   :  { %v4363_v37 = vsel %vm524_vm0, %v4362_v8, %v4358_v42 }
 0x22d   :  { %v4370_v46 = vrot.slane %v4363_v37, %v7635_v20  ;;  %v4476_v12 = vpop.permute.xlu1 %4475 }
 0x22e   :  { %v4484_v53 = vrot.slane %v4476_v12, %v9095_v24  ;;  %v4724_v24 = vrot.slane %v4717_v55, %v9141_v33  ;;  %v5330_v50 = vpop.permute.xlu0 %5329 }
 0x22f   :  { %4372 = vst.msk [vmem:[#allocation3 + $0x2] sm:$0x3] %vm2409_vm11, %v4370_v46 }
 0x230   :  { %v4485_v40 = vsel %vm524_vm0, %v4484_v53, %v4480_v59 }
 0x231   :  { %v4492_v13 = vrot.slane %v4485_v40, %v7635_v20  ;;  %v4598_v23 = vpop.permute.xlu1 %4597 }
 0x232   :  { %v4606_v62 = vrot.slane %v4598_v23, %v9104_v47  ;;  %v4846_v47 = vrot.slane %v4839_v3, %v9151_v10  ;;  %v5338_v3 = vrot.slane %v5330_v50, %v9259_v35  ;;  %v5571_v32 = vpop.permute.xlu0 %5570 }
 0x233   :  { %4494 = vst.msk [vmem:[#allocation3 + $0x4] sm:$0x3] %vm534_vm1, %v4492_v13  ;;  %vm9955_vm1 = vcmask 255168  }
 0x234   :  { %v4607_v49 = vsel %vm524_vm0, %v4606_v62, %v4602_v58 }
 0x235   :  { %v4614_v1 = vrot.slane %v4607_v49, %v7635_v20  ;;  %v4720_v7 = vpop.permute.xlu1 %4719 }
 0x236   :  { %v4728_v15 = vrot.slane %v4720_v7, %v9141_v33  ;;  %v5693_v26 = vpop.permute.xlu0 %5692 }
 0x237   :  { %4616 = vst.msk [vmem:[#allocation3 + $0x4] sm:$0x3] %vm659_vm6, %v4614_v1  ;;  %vm9956_vm6 = vmmov %vm9954_vm4 }
 0x238   :  { %v4729_v60 = vsel %vm524_vm0, %v4728_v15, %v4724_v24 }
 0x239   :  { %v4736_v52 = vrot.slane %v4729_v60, %v7635_v20  ;;  %v4842_v45 = vpop.permute.xlu1 %4841 }
 0x23a   :  { %v4850_v29 = vrot.slane %v4842_v45, %v9151_v10  ;;  %v5090_v10 = vrot.slane %v5083_v48, %v9213_v6  ;;  %v5815_v34 = vpop.permute.xlu0 %5814  ;;  %v5578_v48 = vrot.slane %v5571_v32, %v9318_v2 }
 0x23b   :  { %4738 = vst.msk [vmem:[#allocation3 + $0x4] sm:$0x3] %vm784_vm2, %v4736_v52 }
 0x23c   :  { %v4851_v18 = vsel %vm524_vm0, %v4850_v29, %v4846_v47 }
 0x23d   :  { %v4858_v55 = vrot.slane %v4851_v18, %v7635_v20  ;;  %v4964_v33 = vpop.permute.xlu1 %4963 }
 0x23e   :  { %v4972_v9 = vrot.slane %v4964_v33, %v9191_v17  ;;  %v5334_v17 = vrot.slane %v5327_v16, %v9259_v35  ;;  %v5937_v12 = vpop.permute.xlu0 %5936 }
 0x23f   :  { %4860 = vst.msk [vmem:[#allocation3 + $0x4] sm:$0x3] %vm9955_vm1, %v4858_v55 }
 0x240   :  { %v4973_v27 = vsel %vm524_vm0, %v4972_v9, %v4968_v57  ;;  %v5339_v11 = vsel %vm524_vm0, %v5338_v3, %v5334_v17 }
 0x241   :  { %v4980_v63 = vrot.slane %v4973_v27, %v7635_v20  ;;  %v5086_v41 = vpop.permute.xlu1 %5085  ;;  %v5346_v54 = vrot.slane %v5339_v11, %v7635_v20 }
 0x242   :  { %v5094_v36 = vrot.slane %v5086_v41, %v9213_v6  ;;  %v6059_v62 = vpop.permute.xlu0 %6058 }
 0x243   :  { %4982 = vst.msk [vmem:[#allocation3 + $0x4] sm:$0x3] %vm1034_vm3, %v4980_v63  ;;  %v6066_v52 = vrot.slane %v6059_v62, %v9413_v5 }
 0x244   :  { %v5095_v56 = vsel %vm524_vm0, %v5094_v36, %v5090_v10 }
 0x245   :  { %v5102_v14 = vrot.slane %v5095_v56, %v7635_v20  ;;  %v5208_v22 = vpop.permute.xlu1 %5207 }
 0x246   :  { %v5216_v0 = vrot.slane %v5208_v22, %v9237_v21  ;;  %v6181_v16 = vpop.permute.xlu0 %6180 }
 0x247   :  { %5104 = vst.msk [vmem:[#allocation3 + $0x4] sm:$0x3] %vm1159_vm5, %v5102_v14  ;;  %v6609_v14 = vld [vmem:[%s9826_s4] ss:$0 sm:$0xff] }
 0x248   :  { %v5217_v6 = vsel %vm524_vm0, %v5216_v0, %v5212_v28 }
 0x249   :  { %v5224_v51 = vrot.slane %v5217_v6, %v7635_v20  ;;  %v5449_v39 = vpop.permute.xlu1 %5448 }
 0x24a   :  { %v5456_v61 = vrot.slane %v5449_v39, %v9289_v43  ;;  %v6303_v55 = vpop.permute.xlu0 %6302 }
 0x24b   :  { %5226 = vst.msk [vmem:[#allocation3 + $0x4] sm:$0x3] %vm1284_vm7, %v5224_v51 }
 0x24c   :  { %5348 = vst.msk [vmem:[#allocation3 + $0x4] sm:$0x3] %vm1409_vm8, %v5346_v54 }
 0x24d   :  { %v5452_v35 = vpop.permute.xlu1 %5451 }
 0x24e   :  { %v5460_v21 = vrot.slane %v5452_v35, %v9289_v43  ;;  %v5700_v43 = vrot.slane %v5693_v26, %v9344_v38 }
 0x250   :  { %v5461_v19 = vsel %vm524_vm0, %v5460_v21, %v5456_v61 }
 0x251   :  { %v5468_v42 = vrot.slane %v5461_v19, %v7635_v20  ;;  %v5574_v8 = vpop.permute.xlu1 %5573 }
 0x252   :  { %v5582_v37 = vrot.slane %v5574_v8, %v9318_v2  ;;  %v5822_v2 = vrot.slane %v5815_v34, %v9366_v25 }
 0x253   :  { %5470 = vst.msk [vmem:[#allocation3 + $0x4] sm:$0x3] %vm1534_vm9, %v5468_v42 }
 0x254   :  { %v5583_v46 = vsel %vm524_vm0, %v5582_v37, %v5578_v48 }
 0x255   :  { %v5590_v59 = vrot.slane %v5583_v46, %v7635_v20  ;;  %v5696_v53 = vpop.permute.xlu1 %5695 }
 0x256   :  { %v5704_v40 = vrot.slane %v5696_v53, %v9344_v38  ;;  %v5944_v38 = vrot.slane %v5937_v12, %v9392_v4 }
 0x257   :  { %5592 = vst.msk [vmem:[#allocation3 + $0x4] sm:$0x3] %vm1659_vm10, %v5590_v59 }
 0x258   :  { %v5705_v30 = vsel %vm524_vm0, %v5704_v40, %v5700_v43 }
 0x259   :  { %v5712_v13 = vrot.slane %v5705_v30, %v7635_v20  ;;  %v5818_v23 = vpop.permute.xlu1 %5817 }
 0x25a   :  { %v5826_v58 = vrot.slane %v5818_v23, %v9366_v25 }
 0x25b   :  { %5714 = vst.msk [vmem:[#allocation3 + $0x4] sm:$0x3] %vm1784_vm12, %v5712_v13 }
 0x25c   :  { %v5827_v49 = vsel %vm524_vm0, %v5826_v58, %v5822_v2 }
 0x25d   :  { %v5834_v1 = vrot.slane %v5827_v49, %v7635_v20  ;;  %v5940_v7 = vpop.permute.xlu1 %5939 }
 0x25e   :  { %v5948_v24 = vrot.slane %v5940_v7, %v9392_v4  ;;  %v6188_v4 = vrot.slane %v6181_v16, %v9443_v31 }
 0x25f   :  { %5836 = vst.msk [vmem:[#allocation3 + $0x4] sm:$0x3] %vm1909_vm13, %v5834_v1 }
 0x260   :  { %v5949_v15 = vsel %vm524_vm0, %v5948_v24, %v5944_v38 }
 0x261   :  { %v5956_v60 = vrot.slane %v5949_v15, %v7635_v20  ;;  %v6062_v25 = vpop.permute.xlu1 %6061 }
 0x262   :  { %v6070_v45 = vrot.slane %v6062_v25, %v9413_v5  ;;  %v6310_v5 = vrot.slane %v6303_v55, %v9478_v44 }
 0x263   :  { %5958 = vst.msk [vmem:[#allocation3 + $0x4] sm:$0x3] %vm2034_vm14, %v5956_v60 }
 0x264   :  { %v6071_v47 = vsel %vm524_vm0, %v6070_v45, %v6066_v52 }
 0x265   :  { %v6078_v29 = vrot.slane %v6071_v47, %v7635_v20  ;;  %v6184_v18 = vpop.permute.xlu1 %6183 }
 0x266   :  { %v6192_v50 = vrot.slane %v6184_v18, %v9443_v31 }
 0x267   :  { %6080 = vst.msk [vmem:[#allocation3 + $0x4] sm:$0x3] %vm9956_vm6, %v6078_v29 }
 0x268   :  { %v6193_v33 = vsel %vm524_vm0, %v6192_v50, %v6188_v4 }
 0x269   :  { %v6200_v57 = vrot.slane %v6193_v33, %v7635_v20  ;;  %v6306_v9 = vpop.permute.xlu1 %6305 }
 0x26a   :  { %v6314_v27 = vrot.slane %v6306_v9, %v9478_v44 }
 0x26b   :  { %6202 = vst.msk [vmem:[#allocation3 + $0x4] sm:$0x3] %vm2284_vm15, %v6200_v57 }
 0x26c   :  { %v6315_v63 = vsel %vm524_vm0, %v6314_v27, %v6310_v5  ;;  %vm6541_vm0 = vcmask 33792  }
 0x26d   :  { %v6322_v41 = vrot.slane %v6315_v63, %v7635_v20 }
 0x26f   :  { %6324 = vst.msk [vmem:[#allocation3 + $0x4] sm:$0x3] %vm2409_vm11, %v6322_v41 }
 0x276   :  { %v6325_v31 = vld [vmem:[#allocation3] sm:$0x3f] }
 0x277   :  { %v6382_v10 = vcombine.high %v6325_v31, %v6325_v31  ;;  %v6389_v36 = vrot.slane %v6325_v31, %v7635_v20 }
 0x279   :  { %v6397_v3 = vcombine.high %v6389_v36, %v6389_v36  ;;  %v6396_v32 = vrot.slane %v6382_v10, %v7635_v20 }
 0x27b   :  { %6465 = vmatprep.mubr.f32.mxu0 %v6397_v3  ;;  %6695 = vmatmul.mubr.f32.vlgmr.msra.gmra.mxu1 %v6396_v32 }
 0x27c   :  { %6466 = vmatmul.mubr.f32.vlgmr.msra.gmra.mxu0 %v6389_v36 }
 0x33b   :  { %v6537_v56 = vpop.f32.mrf.mxu1 }
 0x33c   :  { %v6642_v44 = vpop.f32.mrf.mxu0 }
 0x33d   :  { %v6696_v17 = vpop.f32.mrf.mxu1 }
 0x33e   :  { %v6643_v22 = vpop.f32.mrf.mxu0 }
 0x33f   :  { %v6644_v28 = vadd.f32 %v6643_v22, %v6642_v44 }
 0x341   :  { %v6468_v0 = vadd.f32 %v6644_v28, %v6609_v14 }
 0x343   :  { %v6538_v11 = vadd.f32 %v6537_v56, %v6468_v0 }
 0x345   :  { %6542 = vst.msk [vmem:[#allocation9] sm:$0x3] %vm6541_vm0, %v6538_v11 }
 0x346   :  { %6746 = shalt.err (!%p6743_p0)
}
 0x347   :  { %6552 = dma.vmem_to_hbm [thread:$0]  %s6550_s26, 32, %s9827_s5, [#allocation5]  }
 0x348   :  { %6759 = dma.done.wait [#allocation5], 32  }
 0x349   :  { %6760 = vsyncadd [#allocation5], 4294967264 }
 0x34a   :  { %6556 = vsyncpa [#allocation5], 1 }
 0x34b   :  { %6557 = vsyncpa [#allocation6], 1 }
 0x34c   :  { %6558 = vsyncpa [#allocation8], 1 }

</bundles_post_ra>
